<compile_context>
chip_gen: v6e
topology: v6e:2x2x1
jax: 0.10.0
libtpu: 0.0.40
codegen_flags: <defaults>
</compile_context>

<pallas_src>
import jax
import jax.numpy as jnp
from jax.experimental import pallas as pl
from jax.experimental.pallas import tpu as pltpu

L = 8          # tokens per question (rows averaged by mean_of_rows)
V = 32         # vocab size of weight_matrix
D = 100        # embedding dim == fc output dim (Linear(768, 100))
H = 768        # BERT hidden / pooled size

DPAD = 128             # D padded to full lane width
KEMB = 128             # 2*V (+ bias row) padded to full lane width
BIAS_ROW = 2 * V       # unused vocab lane (64) -> carries 0.5*b_fc and the 1.0 bias hook
TM = 128               # batch rows per grid step
NIDS = 2 * L + 1       # q1 ids | q2 ids (+V) | constant bias id


def _similarity_kernel(ids_ref, o1_ref, w_emb_ref, w_fc_ref, aux_ref, out_ref):
    # ids_ref: (TM, 2L+1) int32.  q1 ids, q2 ids offset by +V, and one constant
    # BIAS_ROW id per row, so the two questions + the bias hit disjoint lanes.
    ids = ids_ref[...]

    # mean_of_rows(emb[ids]) == (counts @ emb) / L.  One-hot counts over a
    # lane-padded vocab of 128, kept in f32 (v5e VPU has no bf16 ALUs); counts
    # are small integers (<= 2L+1) so the single bf16 cast below is exact.
    vocab = jax.lax.broadcasted_iota(jnp.int32, (TM, NIDS, KEMB), 2)
    counts = jnp.sum((ids[:, :, None] == vocab).astype(jnp.float32), axis=1)   # (TM, 128)

    # Two MXU dots, f32 accumulation (no in-kernel concatenate).
    # w_emb already carries the 0.25/L scale, 0.5*b_fc in row BIAS_ROW and the
    # 1.0 bias hook at [BIAS_ROW, 127]; w_fc already carries the 0.5 scale.
    ens = jnp.dot(counts.astype(jnp.bfloat16), w_emb_ref[...],
                  preferred_element_type=jnp.float32)                          # (TM, 128)
    ens = ens + jnp.dot(o1_ref[...], w_fc_ref[...],
                        preferred_element_type=jnp.float32)                    # (TM, 128)

    h = jnp.maximum(ens, 0.0)          # ReLU; padded lanes stay 0, lane 127 == 1

    # f_out: Linear(100, 1) as VPU multiply + lane reduce; b_out rides in
    # aux lane 127 (multiplied by h[:, 127] == 1).
    logit = jnp.sum(h * aux_ref[...], axis=-1, keepdims=True)                  # (TM, 1)

    # sigmoid with exp + reciprocal on the EUP slot (no f32 divide on the VPU)
    out_ref[...] = pl.reciprocal(1.0 + jnp.exp(-logit), approx=True)


def build_fused_params(emb1, emb2, w_fc, b_fc, w_out, b_out):
    """One-time wrapper-side fusion of all weights / scales / biases / padding."""
    s = 0.25 / L
    w_emb = jnp.zeros((KEMB, DPAD), jnp.float32)
    w_emb = w_emb.at[:V, :D].set(emb1 * s)                 # question-1 table
    w_emb = w_emb.at[V:2 * V, :D].set(emb2 * s)            # question-2 table
    w_emb = w_emb.at[BIAS_ROW, :D].set(0.5 * b_fc.reshape(-1))   # ens bias (counts lane == 1)
    w_emb = w_emb.at[BIAS_ROW, DPAD - 1].set(1.0)          # makes h[:, 127] == 1 (b_out hook)

    w_fc_fused = jnp.zeros((H, DPAD), jnp.float32).at[:, :D].set(w_fc * 0.5)

    aux = jnp.zeros((1, DPAD), jnp.float32)
    aux = aux.at[0, :D].set(w_out.reshape(-1))             # f_out weight row
    aux = aux.at[0, DPAD - 1].set(b_out[0])                # f_out bias (via lane 127)

    return {"w_emb": w_emb.astype(jnp.bfloat16),           # (128, 128) bf16
            "w_fc": w_fc_fused.astype(jnp.bfloat16),       # (768, 128) bf16
            "aux": aux}                                    # (1, 128)   f32


def similarity_forward(q1_ids, q2_ids, o1_pooled, fused):
    b_in = q1_ids.shape[0]
    nblk = pl.cdiv(b_in, TM)
    npad = nblk * TM

    # q2 ids offset by +V so one counts pass covers both questions; one extra
    # constant BIAS_ROW id per row feeds the folded biases.
    ids_both = jnp.concatenate(
        [q1_ids.astype(jnp.int32),
         q2_ids.astype(jnp.int32) + V,
         jnp.full((b_in, 1), BIAS_ROW, jnp.int32)], axis=1)            # (B, 2L+1)
    ids_pad = jnp.full((npad, NIDS), BIAS_ROW, jnp.int32).at[:b_in].set(ids_both)

    # o1 fed as bf16 (cast once here; the MXU consumes bf16 natively).
    o1_pad = jnp.zeros((npad, H), jnp.bfloat16).at[:b_in].set(
        o1_pooled.astype(jnp.bfloat16))

    cost = pl.CostEstimate(
        flops=2 * npad * (KEMB + H) * DPAD + 3 * npad * DPAD,
        transcendentals=2 * npad,
        bytes_accessed=(ids_pad.size * 4 + o1_pad.size * 2
                        + fused["w_emb"].size * 2 + fused["w_fc"].size * 2
                        + fused["aux"].size * 4 + npad * 4),
    )

    out_pad = pl.pallas_call(
        _similarity_kernel,
        out_shape=jax.ShapeDtypeStruct((npad, 1), jnp.float32),
        grid=(nblk,),
        in_specs=[
            pl.BlockSpec((TM, NIDS), lambda i: (i, 0)),
            pl.BlockSpec((TM, H), lambda i: (i, 0)),
            pl.BlockSpec((KEMB, DPAD), lambda i: (0, 0)),   # weights: DMA once,
            pl.BlockSpec((H, DPAD), lambda i: (0, 0)),      # resident across steps
            pl.BlockSpec((1, DPAD), lambda i: (0, 0)),
        ],
        out_specs=pl.BlockSpec((TM, 1), lambda i: (i, 0)),
        compiler_params=pltpu.CompilerParams(dimension_semantics=("parallel",)),
        cost_estimate=cost,
    )(ids_pad, o1_pad, fused["w_emb"], fused["w_fc"], fused["aux"])

    return out_pad[:b_in]


def reference_forward(q1_ids, q2_ids, o1, emb1, emb2, w_fc, b_fc, w_out, b_out):
    """Pure-JAX f32 reference of the PyTorch forward (BERT pooled output given)."""
    q1m = jnp.mean(emb1[q1_ids], axis=1)
    q2m = jnp.mean(emb2[q2_ids], axis=1)
    q = (q1m + q2m) / 2.0
    o = o1 @ w_fc + b_fc
    ens = (q + o) / 2.0
    h = jnp.maximum(ens, 0.0)
    logit = h @ w_out + b_out
    return jax.nn.sigmoid(logit)


if __name__ == "__main__":
    key = jax.random.PRNGKey(0)
    ks = jax.random.split(key, 8)

    B = 200   # > TM to exercise the multi-step grid with resident weights

    # token ids for the two questions
    q1_ids = jax.random.randint(ks[0], (B, L), 0, V, dtype=jnp.int32)
    q2_ids = jax.random.randint(ks[1], (B, L), 0, V, dtype=jnp.int32)

    # pooled BERT output t1[1] after eval-mode dropout (identity) -- see TODO above
    o1_pooled = jax.random.normal(ks[2], (B, H), dtype=jnp.float32)

    # embedding_1 and embedding_2 are both initialized from the same weight_matrix
    weight_matrix = jax.random.normal(ks[3], (V, D), dtype=jnp.float32) * 0.1
    emb1 = weight_matrix
    emb2 = weight_matrix

    w_fc = jax.random.normal(ks[4], (H, D), dtype=jnp.float32) * 0.02   # Linear(768,100).weight.T
    b_fc = jax.random.normal(ks[5], (D,), dtype=jnp.float32) * 0.01
    w_out = jax.random.normal(ks[6], (D, 1), dtype=jnp.float32) * 0.1   # Linear(100,1).weight.T
    b_out = jax.random.normal(ks[7], (1,), dtype=jnp.float32) * 0.01

    fused = build_fused_params(emb1, emb2, w_fc, b_fc, w_out, b_out)

    out = similarity_forward(q1_ids, q2_ids, o1_pooled, fused)
    jax.block_until_ready(out)
    assert out.shape == (B, 1) and out.dtype == jnp.float32

    ref = reference_forward(q1_ids, q2_ids, o1_pooled, emb1, emb2,
                            w_fc, b_fc, w_out, b_out)
    max_err = float(jnp.max(jnp.abs(out - ref)))
    # bf16 weight / o1 storage -> loose-but-safe tolerance on sigmoid-range outputs
    assert max_err < 2e-2, f"max_err={max_err}"
    print("KERNEL_OK")
</pallas_src>

<mosaic_0001>
module attributes {stable_mosaic.version = 11 : i64} {
  func.func @_similarity_kernel(%arg0: i32, %arg1: memref<128x17xi32, #tpu.memory_space<vmem>>, %arg2: memref<128x768xbf16, #tpu.memory_space<vmem>>, %arg3: memref<128x128xbf16, #tpu.memory_space<vmem>>, %arg4: memref<768x128xbf16, #tpu.memory_space<vmem>>, %arg5: memref<1x128xf32, #tpu.memory_space<vmem>>, %arg6: memref<128x1xf32, #tpu.memory_space<vmem>>) attributes {dimension_semantics = [#tpu.dimension_semantics<parallel>], iteration_bounds = array<i64: 2>, scalar_prefetch = 0 : i64, scratch_operands = 0 : i64, tpu.core_type = #tpu.core_type<tc>, window_params = [{transform_indices = @transform_0, window_bounds = array<i64: 128, 17>}, {transform_indices = @transform_1, window_bounds = array<i64: 128, 768>}, {pipeline_mode = #tpu.pipeline_mode<synchronous>, transform_indices = @transform_2, window_bounds = array<i64: 128, 128>}, {pipeline_mode = #tpu.pipeline_mode<synchronous>, transform_indices = @transform_3, window_bounds = array<i64: 768, 128>}, {pipeline_mode = #tpu.pipeline_mode<synchronous>, transform_indices = @transform_4, window_bounds = array<i64: 1, 128>}, {transform_indices = @transform_5, window_bounds = array<i64: 128, 1>}]} {
    %c0 = arith.constant 0 : index
    %c0_0 = arith.constant 0 : index
    %0 = vector.load %arg1[%c0, %c0_0] : memref<128x17xi32, #tpu.memory_space<vmem>>, vector<128x17xi32>
    %1 = tpu.iota {dimensions = array<i32: 2>} : vector<128x17x128xi32>
    %2 = vector.shape_cast %0 : vector<128x17xi32> to vector<128x17x1xi32>
    %3 = vector.broadcast %2 : vector<128x17x1xi32> to vector<128x17x128xi32>
    %4 = arith.cmpi eq, %3, %1 : vector<128x17x128xi32>
    %5 = arith.extui %4 : vector<128x17x128xi1> to vector<128x17x128xi32>
    %6 = arith.sitofp %5 : vector<128x17x128xi32> to vector<128x17x128xf32>
    %cst = arith.constant dense<0.000000e+00> : vector<128x128xf32>
    %7 = vector.multi_reduction <add>, %6, %cst [1] : vector<128x17x128xf32> to vector<128x128xf32>
    %8 = arith.truncf %7 : vector<128x128xf32> to vector<128x128xbf16>
    %c0_1 = arith.constant 0 : index
    %c0_2 = arith.constant 0 : index
    %9 = vector.load %arg3[%c0_1, %c0_2] : memref<128x128xbf16, #tpu.memory_space<vmem>>, vector<128x128xbf16>
    %cst_3 = arith.constant dense<0.000000e+00> : vector<128x128xf32>
    %10 = tpu.matmul %8, %9, %cst_3 {dimension_numbers = #tpu.dot_dimension_numbers<[1], [0], [0], [1], [0, 0, 1, 1], [], []>} : vector<128x128xbf16>, vector<128x128xbf16>, vector<128x128xf32> -> vector<128x128xf32>
    %c0_4 = arith.constant 0 : index
    %c0_5 = arith.constant 0 : index
    %11 = vector.load %arg2[%c0_4, %c0_5] : memref<128x768xbf16, #tpu.memory_space<vmem>>, vector<128x768xbf16>
    %c0_6 = arith.constant 0 : index
    %c0_7 = arith.constant 0 : index
    %12 = vector.load %arg4[%c0_6, %c0_7] : memref<768x128xbf16, #tpu.memory_space<vmem>>, vector<768x128xbf16>
    %cst_8 = arith.constant dense<0.000000e+00> : vector<128x128xf32>
    %13 = tpu.matmul %11, %12, %cst_8 {dimension_numbers = #tpu.dot_dimension_numbers<[1], [0], [0], [1], [0, 0, 1, 1], [], []>} : vector<128x768xbf16>, vector<768x128xbf16>, vector<128x128xf32> -> vector<128x128xf32>
    %14 = arith.addf %10, %13 : vector<128x128xf32>
    %cst_9 = arith.constant 0.000000e+00 : f32
    %15 = vector.broadcast %cst_9 : f32 to vector<128x128xf32>
    %16 = arith.maximumf %14, %15 : vector<128x128xf32>
    %c0_10 = arith.constant 0 : index
    %c0_11 = arith.constant 0 : index
    %17 = vector.load %arg5[%c0_10, %c0_11] : memref<1x128xf32, #tpu.memory_space<vmem>>, vector<1x128xf32>
    %18 = vector.broadcast %17 : vector<1x128xf32> to vector<128x128xf32>
    %19 = arith.mulf %16, %18 : vector<128x128xf32>
    %cst_12 = arith.constant dense<0.000000e+00> : vector<128xf32>
    %20 = vector.multi_reduction <add>, %19, %cst_12 [1] : vector<128x128xf32> to vector<128xf32>
    %21 = vector.shape_cast %20 : vector<128xf32> to vector<128x1xf32>
    %cst_13 = arith.constant 0.000000e+00 : f32
    %22 = vector.broadcast %cst_13 : f32 to vector<128x1xf32>
    %23 = arith.subf %22, %21 : vector<128x1xf32>
    %24 = math.exp %23 : vector<128x1xf32>
    %cst_14 = arith.constant 1.000000e+00 : f32
    %25 = vector.broadcast %cst_14 : f32 to vector<128x1xf32>
    %26 = arith.addf %25, %24 : vector<128x1xf32>
    %27 = tpu.reciprocal %26 {approx = true} : vector<128x1xf32> -> vector<128x1xf32>
    %c0_15 = arith.constant 0 : index
    %c0_16 = arith.constant 0 : index
    %28 = vector.load %arg6[%c0_15, %c0_16] : memref<128x1xf32, #tpu.memory_space<vmem>>, vector<128x1xf32>
    tpu.vector_store %arg6[%c0_15, %c0_16], %27 {strides = array<i32>} : memref<128x1xf32, #tpu.memory_space<vmem>>, vector<128x1xf32>,
    return
  }
  func.func @transform_0(%arg0: i32) -> (i32, i32) {
    %c0_i32 = arith.constant 0 : i32
    %c0_i32_0 = arith.constant 0 : i32
    return %arg0, %c0_i32 : i32, i32
  }
  func.func @transform_1(%arg0: i32) -> (i32, i32) {
    %c0_i32 = arith.constant 0 : i32
    %c0_i32_0 = arith.constant 0 : i32
    return %arg0, %c0_i32 : i32, i32
  }
  func.func @transform_2(%arg0: i32) -> (i32, i32) {
    %c0_i32 = arith.constant 0 : i32
    %c0_i32_0 = arith.constant 0 : i32
    %c0_i32_1 = arith.constant 0 : i32
    return %c0_i32, %c0_i32_0 : i32, i32
  }
  func.func @transform_3(%arg0: i32) -> (i32, i32) {
    %c0_i32 = arith.constant 0 : i32
    %c0_i32_0 = arith.constant 0 : i32
    %c0_i32_1 = arith.constant 0 : i32
    return %c0_i32, %c0_i32_0 : i32, i32
  }
  func.func @transform_4(%arg0: i32) -> (i32, i32) {
    %c0_i32 = arith.constant 0 : i32
    %c0_i32_0 = arith.constant 0 : i32
    %c0_i32_1 = arith.constant 0 : i32
    return %c0_i32, %c0_i32_0 : i32, i32
  }
  func.func @transform_5(%arg0: i32) -> (i32, i32) {
    %c0_i32 = arith.constant 0 : i32
    %c0_i32_0 = arith.constant 0 : i32
    return %arg0, %c0_i32 : i32, i32
  }
}

</mosaic_0001>

<bundles_post_ra>
// kernel: tpu_custom_call.1
= control target key start
LH: loop header
LB: loop body
LE: loop exit
PB: predicated region body
PF: predicated region fallthrough
CT: control target
= control target key end

     0   :  { %10 = vsyncpa [#allocation3], 0  ;;  %s11078_s0 = inlined_call_operand.vmem [shape: s32[256,17], index: 0, kind: input, shape index: {}]   ;;  %s11079_s1 = inlined_call_operand.hbm [shape: bf16[256,768], index: 1, kind: input, shape index: {}]   ;;  %s11080_s2 = inlined_call_operand.vmem [shape: bf16[128,128], index: 2, kind: input, shape index: {}]   ;;  %s11081_s3 = inlined_call_operand.hbm [shape: bf16[768,128], index: 3, kind: input, shape index: {}]   ;;  %s11082_s4 = inlined_call_operand.vmem [shape: f32[1,128], index: 4, kind: input, shape index: {}]   ;;  %s11083_s5 = inlined_call_operand.vmem [shape: f32[256,1], index: 5, kind: output, shape index: {}]  }
   0x1   :  { %12 = vsyncpa [#allocation3 + $0x1], 0 }
   0x2   :  { %13 = vsyncpa [#allocation5], 0  ;;  %s7562_s18 = smov 0   ;;  %s7564_s19 = smov 0  }
   0x3   :  { %s7566_s20 = smov 0   ;;  %s7568_s21 = smov 0  }
   0x4 LB: > { %s6429_s22 = sadd.s32 4294967295, %s7523_s21   ;;  %p65_p0 = scmp.ne.s32.totalorder %s7515_s19, %s7511_s18  ;;  %s7523_s21 = sphi %s7568_s21, %s11249_s21   ;;  %s7519_s20 = sphi %s7566_s20, %s11248_s20   ;;  %s7515_s19 = sphi %s7564_s19, %s11247_s19   ;;  %s7511_s18 = sphi %s7562_s18, %s11246_s18  }
   0x5   : > { %p7584_p1 = scmp.eq.s32.totalorder %s6429_s22, 0  ;;  %p6431_p2 = scmp.ge.s32.totalorder %s7523_s21, 1 }
   0x6   : > { %p165_p3 = scmp.lt.s32.totalorder %s7523_s21, 3  ;;  %s7525_s26 = smov [#allocation4]  }
   0x7   : > { %s11107_s23 = scalar_select %p7584_p1, 1, 0 }
   0x8   : > { %p7592_p4 = por %p7584_p1, %p65_p0  ;;  %p7596_p5 = pnand %p6431_p2, %p165_p3 }
   0x9   : > { %s180_s27 = sshll.u32 %s7525_s26, 4  ;;  %s7609_s29 = sadd.s32 1, %s7523_s21   ;;  %s181_s27 = int_to_ptr.vmem [resolvable:$true] %s180_s27 }
   0xa   : > { %s11108_s24 = scalar_select %p7592_p4, 1, 0 }
   0xb   : > { %s11109_s25 = scalar_select %p7596_p5, 1, 0 }
   0xc   : > { %p7183_p6 = pneg %p7596_p5  ;;  %s52_s30 = sadd.s32 1, %s7519_s20 }
   0xd   : > { %s49_s6 = ssub.s32 %s7523_s21, %s7609_s29  ;;  %s7442_s7 = scalar_lea.vmem %s181_s27, 6144 }
   0xe   : > { %p7604_p7 = pnand %p7183_p6, %p7584_p1  ;;  %p7443_p9 = scmp.ne.s32.totalorder %s181_s27, %s7442_s7 }
   0xf   : > { %p7450_p12 = scmp.lt.s32.totalorder %s181_s27, %s181_s27  ;;  %p7451_p13 = scmp.lt.s32.totalorder %s7442_s7, %s7442_s7 }
  0x10   : > { %p7433_p8 = pneg %p7604_p7 }
  0x11   : > { %p7452_p0 = por %p7451_p13, %p7450_p12 }
  0x12   : > { %p7445_p10 = pnand %p7443_p9, %p7433_p8 }
  0x14   : > { %p7446_p11 = pneg %p7445_p10 }
  0x16   : > { %p7453_p2 = pnand %p7452_p0, %p7446_p11 }
  0x18   : > { %7456 = shalt.err (!%p7453_p2)
}
  0x19   : > { %s7526_s8 = smov 64   ;;  %s7527_s9 = smov 4  }
  0x1a   : > { %7186 = dma.hbm_to_vmem [thread:$0]  (!%p7604_p7), %s11081_s3, 6144, %s181_s27, [#allocation5], %s7526_s8, %s7526_s8, %s7527_s9  }
  0x1b   : > { %p50_p3 = scmp.eq.s32.totalorder %s49_s6, 0  ;;  %p59_p6 = scmp.ne.s32.totalorder %s7519_s20, %s7515_s19 }
  0x1c   : > { %p60_p8 = scmp.eq.s32.totalorder %s7523_s21, 0  ;;  %p7192_p9 = scmp.lt.s32.totalorder %s7523_s21, 2 }
  0x1d   : > { %s7626_s12 = scalar_select %p50_p3, %s7519_s20, %s52_s30  }
  0x1e   : > { %p61_p10 = por %p60_p8, %p59_p6  ;;  %s206_s13 = sand.u32 1, %s7519_s20  }
  0x1f   : > { %s7174_s14 = smul.u32 384, %s206_s13  ;;  %s7641_s30 = scalar_lea.sflag [#allocation3], %s206_s13 }
  0x20   : > { %s7175_s15 = smul.u32 6144, %s7523_s21  ;;  %p7630_p11 = pnand %p7192_p9, %p61_p10 }
  0x21   : > { %s210_s27 = scalar_lea.vmem [#allocation2], %s7174_s14  ;;  %s7462_s9 = scalar_lea.hbm %s11079_s1, 12288 }
  0x22   : > { %s7637_s26 = scalar_lea.hbm %s11079_s1, %s7175_s15  ;;  %s218_s28 = sshll.u32 %s210_s27, 4  ;;  %s7639_s28 = int_to_ptr.vmem [resolvable:$true] %s218_s28 }
  0x23   : > { %s7457_s6 = scalar_lea.hbm %s7637_s26, 6144  ;;  %p7459_p12 = pneg %p7630_p11 }
  0x24   : > { %p7458_p7 = scmp.ne.s32.totalorder %s7637_s26, %s7457_s6  ;;  %p7463_p2 = scmp.lt.s32.totalorder %s7637_s26, %s11079_s1 }
  0x25   : > { %p7464_p3 = scmp.lt.s32.totalorder %s7462_s9, %s7457_s6 }
  0x26   : > { %p7460_p13 = pnand %p7459_p12, %p7458_p7 }
  0x27   : > { %p7465_p6 = por %p7464_p3, %p7463_p2 }
  0x28   : > { %p7461_p0 = pneg %p7460_p13 }
  0x2a   : > { %p7466_p8 = pnand %p7465_p6, %p7461_p0 }
  0x2c   : > { %7469 = shalt.err (!%p7466_p8)
}
  0x2d   : > { %s7470_s13 = scalar_lea.vmem %s7639_s28, 6144  ;;  %s7528_s14 = smov [#allocation2]  }
  0x2e   : > { %p7471_p9 = scmp.ne.s32.totalorder %s7639_s28, %s7470_s13  ;;  %s7475_s15 = sshll.u32 %s7528_s14, 4  ;;  %s7476_s15 = int_to_ptr.vmem [resolvable:$false] %s7475_s15 }
  0x2f   : > { %s7477_s17 = scalar_lea.vmem %s7476_s15, 12288  ;;  %p7478_p13 = scmp.lt.s32.totalorder %s7639_s28, %s7476_s15 }
  0x30   : > { %p7473_p10 = pnand %p7471_p9, %p7459_p12  ;;  %p7479_p1 = scmp.lt.s32.totalorder %s7477_s17, %s7470_s13 }
  0x32   : > { %p7474_p7 = pneg %p7473_p10  ;;  %p7480_p4 = por %p7479_p1, %p7478_p13 }
  0x34   : > { %p7481_p5 = pnand %p7480_p4, %p7474_p7 }
  0x36   : > { %7484 = shalt.err (!%p7481_p5)
}
  0x37   : > { %s7529_s18 = smov 384   ;;  %s7530_s27 = smov 24  }
  0x38   : > { %7190 = dma.hbm_to_vmem [thread:$0]  (!%p7630_p11), %s7637_s26, 6144, %s7639_s28, %s7641_s30, %s7529_s18, %s7529_s18, %s7530_s27  }
  0x39   : > { %p11112_p12 = scmp.ne.s32.totalorder %s11109_s25, 0 }
  0x3b   : > { %230 = sbr.rel (%p11112_p12) target bundleno = 1366 (0x556), region = 40 }
  0x40   : > { %s232_s6 = sand.u32 1, %s7515_s19   ;;  %p11113_p1 = scmp.ne.s32.totalorder %s11108_s24, 0 }
  0x41   : > { %s7176_s7 = smul.u32 384, %s232_s6  ;;  %s233_s8 = scalar_lea.sflag [#allocation3], %s232_s6 }
  0x43   : > { %s7665_s9 = scalar_lea.vmem [#allocation2], %s7176_s7 }
  0x44   : > { %7502 = dma.done.wait (%p11113_p1), %s233_s8, 6144  }
  0x45   : > { %7504 = vsyncadd (%p11113_p1), %s233_s8, 4294961152  ;;  %p11114_p4 = scmp.ne.s32.totalorder %s11107_s23, 0 }
  0x47   : > { %7506 = dma.done.wait (%p11114_p4), [#allocation5], 6144  }
  0x48   : > { %7508 = vsyncadd (%p11114_p4), [#allocation5], 4294961152  ;;  %s6439_s25 = sshll.u32 %s6429_s22, 4  ;;  %v302_v0 = vlaneseq  ;;  %v7232_v11 = vld [vmem:[#allocation4 + $0xf8] sm:$0xff]   ;;  %v7234_v14 = vld [vmem:[#allocation4 + $0xf0] sm:$0xff]   ;;  %vm3377_vm6 = vcmask 1040384  }
  0x49   : > { %p273_p5 = scmp.lt.s32.totalorder %s6439_s25, 31  ;;  %v7233_v13 = vld [vmem:[#allocation4 + $0xb8] sm:$0xff]   ;;  %6998 = vmatprep.subr.bf16.mxu1 %v7232_v11  ;;  %v7235_v16 = vld [vmem:[#allocation4 + $0xb0] sm:$0xff]   ;;  %v7236_v18 = vld [vmem:[#allocation4 + $0xe8] sm:$0xff]  }
  0x4a   : > { %v305_v1 = vshrl.u32 %v302_v0, 7  ;;  %6999 = vmatpush3.bf16.msra.mxu1 %v7233_v13  ;;  %v7237_v19 = vld [vmem:[#allocation4 + $0xa8] sm:$0xff]   ;;  %v7238_v21 = vld [vmem:[#allocation4 + $0xe0] sm:$0xff]   ;;  %v7240_v24 = vld [vmem:[#allocation4 + $0xd8] sm:$0xff]  }
  0x4b   : > { %s11251_s25 = smov (!%p273_p5, %s6439_s25), 31  ;;  %7000 = vmatprep.subr.bf16.mxu1 %v7234_v14  ;;  %v7239_v23 = vld [vmem:[#allocation4 + $0xa0] sm:$0xff]   ;;  %v7241_v25 = vld [vmem:[#allocation4 + $0x98] sm:$0xff]   ;;  %v7242_v28 = vld [vmem:[#allocation4 + $0xd0] sm:$0xff]  }
  0x4c   : > { %v7680_v2 = vsub.s32 0, %v305_v1  ;;  %s6440_s24 = sshll.u32 %s11251_s25, 3  ;;  %v7690_v3 = vsub.s32 1, %v305_v1  ;;  %v7693_v5 = vsub.s32 2, %v305_v1  ;;  %v7695_v6 = vsub.s32 3, %v305_v1  ;;  %v7243_v29 = vld [vmem:[#allocation4 + $0x90] sm:$0xff]  }
  0x4d   : > { %s7688_s23 = scalar_lea.vmem %s11078_s0, %s6440_s24  ;;  %v7701_v12 = vsub.s32 4, %v305_v1  ;;  %v7703_v15 = vsub.s32 5, %v305_v1  ;;  %v7707_v22 = vsub.s32 6, %v305_v1  ;;  %v7710_v27 = vsub.s32 7, %v305_v1  ;;  %v7244_v31 = vld [vmem:[#allocation4 + $0xc8] sm:$0xff]   ;;  %v7246_v34 = vld [vmem:[#allocation4 + $0xc0] sm:$0xff]   ;;  %s11023_s30 = scalar_lea.vmem %s11083_s5, %s6440_s24 }
  0x4e   : > { %v286_v4 = vld [vmem:[%s7688_s23] sm:$0xff]  ;;  %7001 = vmatpush3.bf16.msra.mxu1 %v7235_v16  ;;  %v287_v32 = vld [vmem:[%s7688_s23 + $0x8] sm:$0xff]  ;;  %v7251_v40 = vld [vmem:[%s7665_s9 + $0x3c] ss:$24 sps:$4 sm:$0xff]  }
  0x4f   : > { %v307_v7 = vrot.slane %v286_v4, %v7680_v2  ;;  %v322_v8 = vrot.slane %v286_v4, %v7690_v3  ;;  %v337_v9 = vrot.slane %v286_v4, %v7693_v5  ;;  %v352_v10 = vrot.slane %v286_v4, %v7695_v6  ;;  %11115 = vst [vmem:[#allocation8_spill] sm:$0xff] %v7703_v15  ;;  %v7245_v33 = vld [vmem:[#allocation4 + $0x88] sm:$0xff]   ;;  %v7247_v35 = vld [vmem:[#allocation4 + $0x80] sm:$0xff]   ;;  %v7253_v41 = vld [vmem:[%s7665_s9 + $0x38] ss:$24 sps:$4 sm:$0xff]  }
  0x50   : > { %v367_v17 = vrot.slane %v286_v4, %v7701_v12  ;;  %v382_v20 = vrot.slane %v286_v4, %v7703_v15  ;;  %7002 = vmatprep.subr.bf16.mxu1 %v7236_v18  ;;  %11116 = vst [vmem:[#allocation9_spill] sm:$0xff] %v7707_v22  ;;  %v397_v26 = vrot.slane %v286_v4, %v7707_v22  ;;  %11117 = vst [vmem:[#allocation10_spill] sm:$0xff] %v7710_v27  ;;  %v7250_v37 = vld [vmem:[%s7665_s9 + $0xc] ss:$24 sps:$4 sm:$0xff]   ;;  %v7248_v38 = vld [vmem:[%s7665_s9 + $0x8] ss:$24 sps:$4 sm:$0xff]  }
  0x51   : > { %317 = vbcast.lane.b32.xlu1 %v307_v7, 272  ;;  %309 = vbcast.lane.b32.xlu0 %v307_v7, 256  ;;  %v412_v30 = vrot.slane %v286_v4, %v7710_v27  ;;  %v427_v36 = vrot.slane %v287_v32, %v7680_v2  ;;  %v442_v39 = vrot.slane %v287_v32, %v7690_v3  ;;  %v7254_v44 = vld [vmem:[%s7665_s9 + $0x6c] ss:$24 sps:$4 sm:$0xff]   ;;  %v7256_v45 = vld [vmem:[%s7665_s9 + $0x68] ss:$24 sps:$4 sm:$0xff]  }
  0x52   : > { %7003 = vmatpush3.bf16.msra.mxu1 %v7237_v19  ;;  %5474 = vmatprep.mubr.bf16.mxu1 %v7250_v37  ;;  %v457_v42 = vrot.slane %v287_v32, %v7693_v5  ;;  %v472_v43 = vrot.slane %v287_v32, %v7695_v6  ;;  %v487_v46 = vrot.slane %v287_v32, %v7701_v12  ;;  %v7257_v47 = vld [vmem:[%s7665_s9 + $0x9c] ss:$24 sps:$4 sm:$0xff]   ;;  %v7259_v48 = vld [vmem:[%s7665_s9 + $0x98] ss:$24 sps:$4 sm:$0xff]   ;;  %v7260_v50 = vld [vmem:[%s7665_s9 + $0xcc] ss:$24 sps:$4 sm:$0xff]  }
  0x53   : > { %7004 = vmatprep.subr.bf16.mxu1 %v7238_v21  ;;  %v502_v49 = vrot.slane %v287_v32, %v7703_v15  ;;  %v7262_v51 = vld [vmem:[%s7665_s9 + $0xc8] ss:$24 sps:$4 sm:$0xff]   ;;  %v517_v52 = vrot.slane %v287_v32, %v7707_v22  ;;  %v532_v53 = vrot.slane %v287_v32, %v7710_v27  ;;  %v7263_v54 = vld [vmem:[%s7665_s9 + $0xfc] ss:$24 sps:$4 sm:$0xff]   ;;  %v7265_v55 = vld [vmem:[%s7665_s9 + $0xf8] ss:$24 sps:$4 sm:$0xff]  }
  0x54   : > { %v7735_v56 = vld [vmem:[%s7688_s23 + $0x10] sm:$0xff]  ;;  %v7266_v57 = vld [vmem:[#allocation4 + $0x78] sm:$0xff]   ;;  %v7269_v61 = vld [vmem:[%s7665_s9 + $0x12c] ss:$24 sps:$4 sm:$0xff]  }
  0x55   : > { %324 = vbcast.lane.b32.xlu1 %v322_v8, 256  ;;  %313 = vbcast.lane.b32.xlu0 %v307_v7, 264  ;;  %v7267_v58 = vld [vmem:[#allocation4 + $0x38] sm:$0xff]   ;;  %v547_v59 = vrot.slane %v7735_v56, %v7680_v2  ;;  %v7268_v60 = vld [vmem:[#allocation4 + $0x70] sm:$0xff]   ;;  %v7272_v63 = vld [vmem:[%s7665_s9 + $0x128] ss:$24 sps:$4 sm:$0xff]   ;;  %v562_v1 = vrot.slane %v7735_v56, %v7690_v3  ;;  %v577_v13 = vrot.slane %v7735_v56, %v7693_v5 }
  0x56   : > { %7005 = vmatpush3.bf16.msra.mxu1 %v7239_v23  ;;  %6934 = vmatprep.subr.bf16.mxu0 %v7266_v57  ;;  %v7271_v62 = vld [vmem:[#allocation4 + $0x30] sm:$0xff]   ;;  %v7273_v4 = vld [vmem:[#allocation4 + $0x68] sm:$0xff]   ;;  %v7280_v14 = vld [vmem:[#allocation4 + $0x58] sm:$0xff]  }
  0x57   : > { %7006 = vmatprep.subr.bf16.mxu1 %v7240_v24  ;;  %6935 = vmatpush3.bf16.msra.mxu0 %v7267_v58  ;;  %v7274_v7 = vld [vmem:[#allocation4 + $0x28] sm:$0xff]   ;;  %v7279_v11 = vld [vmem:[%s7665_s9 + $0x158] ss:$24 sps:$4 sm:$0xff]   ;;  %v7290_v32 = vld [vmem:[%s7665_s9 + $0x4] ss:$24 sps:$4 sm:$0xff]  }
  0x58   : > { %6936 = vmatprep.subr.bf16.mxu0 %v7268_v60  ;;  %v7281_v16 = vld [vmem:[#allocation4 + $0x18] sm:$0xff]   ;;  %v7282_v18 = vld [vmem:[#allocation4 + $0x50] sm:$0xff]   ;;  %v7285_v24 = vld [vmem:[#allocation4 + $0x8] sm:$0xff]   ;;  %5377 = vmatprep.mubr.bf16.mxu0 %v7290_v32 }
  0x59   : > { %332 = vbcast.lane.b32.xlu1 %v322_v8, 272  ;;  %328 = vbcast.lane.b32.xlu0 %v322_v8, 264  ;;  %v7275_v8 = vld [vmem:[#allocation4 + $0x60] sm:$0xff]   ;;  %v7283_v19 = vld [vmem:[#allocation4 + $0x10] sm:$0xff]  }
  0x5a   : > { %7007 = vmatpush3.bf16.msra.mxu1 %v7241_v25  ;;  %v607_v25 = vrot.slane %v7735_v56, %v7701_v12 }
  0x5b   : > { %7008 = vmatprep.subr.bf16.mxu1 %v7242_v28  ;;  %6937 = vmatpush3.bf16.msra.mxu0 %v7271_v62 }
  0x5c   : > { %6938 = vmatprep.subr.bf16.mxu0 %v7273_v4 }
  0x5d   : > { %343 = vbcast.lane.b32.xlu1 %v337_v9, 264  ;;  %339 = vbcast.lane.b32.xlu0 %v337_v9, 256 }
  0x5e   : > { %7009 = vmatpush3.bf16.msra.mxu1 %v7243_v29 }
  0x5f   : > { %7010 = vmatprep.subr.bf16.mxu1 %v7244_v31  ;;  %6939 = vmatpush3.bf16.msra.mxu0 %v7274_v7  ;;  %v622_v31 = vrot.slane %v7735_v56, %v7703_v15 }
  0x60   : > { %6940 = vmatprep.subr.bf16.mxu0 %v7275_v8 }
  0x61   : > { %354 = vbcast.lane.b32.xlu1 %v352_v10, 256  ;;  %347 = vbcast.lane.b32.xlu0 %v337_v9, 272  ;;  %v7276_v9 = vld [vmem:[%s7665_s9 + $0x15c] ss:$24 sps:$4 sm:$0xff]  }
  0x62   : > { %7011 = vmatpush3.bf16.msra.mxu1 %v7245_v33  ;;  %v7288_v33 = vld [vmem:[%s7665_s9] ss:$24 sps:$4 sm:$0xff]  }
  0x63   : > { %7012 = vmatprep.subr.bf16.mxu1 %v7246_v34 }
  0x65   : > { %362 = vbcast.lane.b32.xlu1 %v352_v10, 272  ;;  %358 = vbcast.lane.b32.xlu0 %v352_v10, 264  ;;  %v7278_v10 = vld [vmem:[#allocation4 + $0x20] sm:$0xff]  }
  0x66   : > { %7013 = vmatpush3.bf16.msra.mxu1 %v7247_v35  ;;  %6941 = vmatpush3.bf16.msra.mxu0 %v7278_v10  ;;  %v7299_v10 = vld [vmem:[%s7665_s9 + $0x90] ss:$24 sps:$4 sm:$0xff]  }
  0x67   : > { %6942 = vmatprep.subr.bf16.mxu0 %v7280_v14 }
  0x69   : > { %373 = vbcast.lane.b32.xlu1 %v367_v17, 264  ;;  %369 = vbcast.lane.b32.xlu0 %v367_v17, 256 }
  0x6a   : > { %5475 = vmatmul.mubr.bf16.vlgmr.msra.gmra.mxu1 %v7248_v38  ;;  %6943 = vmatpush3.bf16.msra.mxu0 %v7281_v16  ;;  %v637_v38 = vrot.slane %v7735_v56, %v7707_v22 }
  0x6b   : > { %5482 = vmatprep.mubr.bf16.mxu1 %v7251_v40  ;;  %6944 = vmatprep.subr.bf16.mxu0 %v7282_v18  ;;  %v7293_v40 = vld [vmem:[%s7665_s9 + $0x30] ss:$24 sps:$4 sm:$0xff]  }
  0x6d   : > { %384 = vbcast.lane.b32.xlu1 %v382_v20, 256  ;;  %377 = vbcast.lane.b32.xlu0 %v367_v17, 272  ;;  %v592_v17 = vrot.slane %v7735_v56, %v7695_v6 }
  0x6e   : > { %6945 = vmatpush3.bf16.msra.mxu0 %v7283_v19 }
  0x71   : > { %392 = vbcast.lane.b32.xlu1 %v382_v20, 272  ;;  %388 = vbcast.lane.b32.xlu0 %v382_v20, 264  ;;  %v7284_v20 = vld [vmem:[#allocation4 + $0x48] sm:$0xff]  }
  0x72   : > { %5483 = vmatmul.mubr.bf16.gmra.mxu1 %v7253_v41  ;;  %6946 = vmatprep.subr.bf16.mxu0 %v7284_v20 }
  0x73   : > { %5490 = vmatprep.mubr.bf16.mxu1 %v7254_v44  ;;  %6947 = vmatpush3.bf16.msra.mxu0 %v7285_v24  ;;  %v7772_v44 = vand.u32 127, %v302_v0  ;;  %v7294_v0 = vld [vmem:[%s7665_s9 + $0x64] ss:$24 sps:$4 sm:$0xff]   ;;  %v7302_v24 = vld [vmem:[%s7665_s9 + $0xc0] ss:$24 sps:$4 sm:$0xff]  }
  0x75   : > { %403 = vbcast.lane.b32.xlu1 %v397_v26, 264  ;;  %399 = vbcast.lane.b32.xlu0 %v397_v26, 256 }
  0x79   : > { %414 = vbcast.lane.b32.xlu1 %v412_v30, 256  ;;  %407 = vbcast.lane.b32.xlu0 %v397_v26, 272  ;;  %v7286_v26 = vld [vmem:[#allocation4 + $0x40] sm:$0xff]  }
  0x7a   : > { %5491 = vmatmul.mubr.bf16.gmra.mxu1 %v7256_v45  ;;  %6948 = vmatprep.subr.bf16.mxu0 %v7286_v26 }
  0x7b   : > { %5498 = vmatprep.mubr.bf16.mxu1 %v7257_v47  ;;  %v7784_v47 = vld [vmem:[%s7688_s23 + $0x18] sm:$0xff] }
  0x7c   : > { %v667_v57 = vrot.slane %v7784_v47, %v7680_v2  ;;  %v682_v4 = vrot.slane %v7784_v47, %v7690_v3  ;;  %v697_v19 = vrot.slane %v7784_v47, %v7693_v5 }
  0x7d   : > { %422 = vbcast.lane.b32.xlu1 %v412_v30, 272  ;;  %418 = vbcast.lane.b32.xlu0 %v412_v30, 264  ;;  %v7287_v30 = vld [vmem:[#allocation4] sm:$0xff]  }
  0x7e   : > { %6949 = vmatpush3.bf16.msra.mxu0 %v7287_v30  ;;  %v712_v30 = vrot.slane %v7784_v47, %v7695_v6 }
  0x81   : > { %433 = vbcast.lane.b32.xlu1 %v427_v36, 264  ;;  %429 = vbcast.lane.b32.xlu0 %v427_v36, 256 }
  0x82   : > { %5499 = vmatmul.mubr.bf16.gmra.mxu1 %v7259_v48  ;;  %5378 = vmatmul.mubr.bf16.vlgmr.msra.gmra.mxu0 %v7288_v33  ;;  %v7296_v48 = vld [vmem:[%s7665_s9 + $0x60] ss:$24 sps:$4 sm:$0xff]   ;;  %v7305_v33 = vld [vmem:[#allocation4 + $0x170] sm:$0xff]  }
  0x83   : > { %5506 = vmatprep.mubr.bf16.mxu1 %v7260_v50 }
  0x85   : > { %444 = vbcast.lane.b32.xlu1 %v442_v39, 256  ;;  %437 = vbcast.lane.b32.xlu0 %v427_v36, 272 }
  0x89   : > { %452 = vbcast.lane.b32.xlu1 %v442_v39, 272  ;;  %448 = vbcast.lane.b32.xlu0 %v442_v39, 264  ;;  %v7291_v39 = vld [vmem:[%s7665_s9 + $0x34] ss:$24 sps:$4 sm:$0xff]  }
  0x8a   : > { %5507 = vmatmul.mubr.bf16.gmra.mxu1 %v7262_v51  ;;  %5385 = vmatprep.mubr.bf16.mxu0 %v7291_v39  ;;  %v7306_v39 = vld [vmem:[#allocation4 + $0x130] sm:$0xff]  }
  0x8b   : > { %5514 = vmatprep.mubr.bf16.mxu1 %v7263_v54  ;;  %5386 = vmatmul.mubr.bf16.gmra.mxu0 %v7293_v40 }
  0x8c   : > { %5393 = vmatprep.mubr.bf16.mxu0 %v7294_v0 }
  0x8d   : > { %463 = vbcast.lane.b32.xlu1 %v457_v42, 264  ;;  %459 = vbcast.lane.b32.xlu0 %v457_v42, 256 }
  0x91   : > { %474 = vbcast.lane.b32.xlu1 %v472_v43, 256  ;;  %467 = vbcast.lane.b32.xlu0 %v457_v42, 272 }
  0x92   : > { %5515 = vmatmul.mubr.bf16.gmra.mxu1 %v7265_v55 }
  0x93   : > { %5522 = vmatprep.mubr.bf16.mxu1 %v7269_v61  ;;  %5394 = vmatmul.mubr.bf16.gmra.mxu0 %v7296_v48  ;;  %v7307_v48 = vld [vmem:[%s7665_s9 + $0xf4] ss:$24 sps:$4 sm:$0xff]  }
  0x95   : > { %482 = vbcast.lane.b32.xlu1 %v472_v43, 272  ;;  %478 = vbcast.lane.b32.xlu0 %v472_v43, 264  ;;  %v652_v43 = vrot.slane %v7735_v56, %v7710_v27 }
  0x99   : > { %493 = vbcast.lane.b32.xlu1 %v487_v46, 264  ;;  %489 = vbcast.lane.b32.xlu0 %v487_v46, 256 }
  0x9a   : > { %5523 = vmatmul.mubr.bf16.gmra.mxu1 %v7272_v63 }
  0x9b   : > { %5530 = vmatprep.mubr.bf16.mxu1 %v7276_v9  ;;  %v7297_v9 = vld [vmem:[%s7665_s9 + $0x94] ss:$24 sps:$4 sm:$0xff]  }
  0x9c   : > { %5401 = vmatprep.mubr.bf16.mxu0 %v7297_v9 }
  0x9d   : > { %504 = vbcast.lane.b32.xlu1 %v502_v49, 256  ;;  %497 = vbcast.lane.b32.xlu0 %v487_v46, 272 }
  0x9e   : > { %5402 = vmatmul.mubr.bf16.gmra.mxu0 %v7299_v10 }
  0xa1   : > { %512 = vbcast.lane.b32.xlu1 %v502_v49, 272  ;;  %508 = vbcast.lane.b32.xlu0 %v502_v49, 264  ;;  %v11091_v49 = vmov 0.0  }
  0xa2   : > { %5531 = vmatmul.mubr.bf16.gmra.mxu1 %v7279_v11 }
  0xa5   : > { %523 = vbcast.lane.b32.xlu1 %v517_v52, 264  ;;  %519 = vbcast.lane.b32.xlu0 %v517_v52, 256 }
  0xa9   : > { %534 = vbcast.lane.b32.xlu1 %v532_v53, 256  ;;  %527 = vbcast.lane.b32.xlu0 %v517_v52, 272 }
  0xad   : > { %542 = vbcast.lane.b32.xlu1 %v532_v53, 272  ;;  %538 = vbcast.lane.b32.xlu0 %v532_v53, 264 }
  0xb1   : > { %553 = vbcast.lane.b32.xlu1 %v547_v59, 264  ;;  %549 = vbcast.lane.b32.xlu0 %v547_v59, 256 }
  0xb5   : > { %564 = vbcast.lane.b32.xlu1 %v562_v1, 256  ;;  %557 = vbcast.lane.b32.xlu0 %v547_v59, 272 }
  0xb9   : > { %572 = vbcast.lane.b32.xlu1 %v562_v1, 272  ;;  %568 = vbcast.lane.b32.xlu0 %v562_v1, 264 }
  0xbd   : > { %583 = vbcast.lane.b32.xlu1 %v577_v13, 264  ;;  %579 = vbcast.lane.b32.xlu0 %v577_v13, 256 }
  0xc1   : > { %594 = vbcast.lane.b32.xlu1 %v592_v17, 256  ;;  %587 = vbcast.lane.b32.xlu0 %v577_v13, 272 }
  0xc3   : > { %v7749_v21 = vpop.permute.xlu1 %317  ;;  %v310_v23 = vpop.permute.xlu0 %309 }
  0xc4   : > { %vm2224_vm3 = vcmp.eq.s32.totalorder %v310_v23, %v7772_v44  ;;  %vm2226_vm5 = vcmp.eq.s32.totalorder %v7749_v21, %v7772_v44  ;;  %v7300_v23 = vld [vmem:[%s7665_s9 + $0xc4] ss:$24 sps:$4 sm:$0xff]  }
  0xc5   : > { %602 = vbcast.lane.b32.xlu1 %v592_v17, 272  ;;  %598 = vbcast.lane.b32.xlu0 %v592_v17, 264  ;;  %v6443_v55 = vsel %vm2224_vm3, 1.0, %v11091_v49  ;;  %v6445_v58 = vsel %vm2226_vm5, 1.0, %v11091_v49 }
  0xc6   : > { %v3378_v1 = vsel %vm3377_vm6, %v6445_v58, 0.0  ;;  %5409 = vmatprep.mubr.bf16.mxu0 %v7300_v23 }
  0xc7   : > { %v325_v28 = vpop.permute.xlu1 %324  ;;  %v314_v29 = vpop.permute.xlu0 %313  ;;  %5410 = vmatmul.mubr.bf16.gmra.mxu0 %v7302_v24 }
  0xc8   : > { %vm2225_vm0 = vcmp.eq.s32.totalorder %v314_v29, %v7772_v44  ;;  %vm2227_vm4 = vcmp.eq.s32.totalorder %v325_v28, %v7772_v44  ;;  %v7304_v29 = vld [vmem:[#allocation4 + $0x138] sm:$0xff]   ;;  %5417 = vmatprep.mubr.bf16.mxu0 %v7307_v48 }
  0xc9   : > { %613 = vbcast.lane.b32.xlu1 %v607_v25, 264  ;;  %609 = vbcast.lane.b32.xlu0 %v607_v25, 256  ;;  %v6444_v50 = vsel %vm2225_vm0, 1.0, %v11091_v49  ;;  %v6446_v56 = vsel %vm2227_vm4, 1.0, %v11091_v49 }
  0xca   : > { %v3376_v59 = vadd.f32 %v6444_v50, %v6443_v55  ;;  %v7309_v50 = vld [vmem:[%s7665_s9 + $0xf0] ss:$24 sps:$4 sm:$0xff]  }
  0xcb   : > { %v333_v34 = vpop.permute.xlu1 %332  ;;  %v329_v35 = vpop.permute.xlu0 %328  ;;  %v7310_v55 = vld [vmem:[#allocation4 + $0x168] sm:$0xff]  }
  0xcc   : > { %vm2228_vm1 = vcmp.eq.s32.totalorder %v329_v35, %v7772_v44  ;;  %vm2229_vm2 = vcmp.eq.s32.totalorder %v333_v34, %v7772_v44  ;;  %v3379_v7 = vadd.f32 %v3378_v1, %v3376_v59  ;;  %v7873_v1 = vld [vmem:[%s7688_s23 + $0x20] sm:$0xff] }
  0xcd   : > { %624 = vbcast.lane.b32.xlu1 %v622_v31, 256  ;;  %617 = vbcast.lane.b32.xlu0 %v607_v25, 272  ;;  %v6447_v51 = vsel %vm2228_vm1, 1.0, %v11091_v49  ;;  %v6448_v54 = vsel %vm2229_vm2, 1.0, %v11091_v49  ;;  %v7303_v25 = vld [vmem:[#allocation4 + $0x178] sm:$0xff]  }
  0xce   : > { %v3386_v60 = vadd.f32 %v6447_v51, %v6446_v56  ;;  %v3387_v61 = vsel %vm3377_vm6, %v6448_v54, 0.0  ;;  %v3380_v14 = vrot.slane %v3379_v7, 4  ;;  %7062 = vmatprep.subr.bf16.mxu0 %v7303_v25  ;;  %v7311_v56 = vld [vmem:[#allocation4 + $0x128] sm:$0xff]  }
  0xcf   : > { %v7757_v36 = vpop.permute.xlu1 %343  ;;  %v7759_v37 = vpop.permute.xlu0 %339  ;;  %7063 = vmatpush3.bf16.msra.mxu0 %v7304_v29  ;;  %v7916_v29 = vrot.slane %v7873_v1, %v7690_v3 }
  0xd0   : > { %v3388_v8 = vadd.f32 %v3387_v61, %v3386_v60  ;;  %v3381_v20 = vadd.f32 %v3380_v14, %v3379_v7  ;;  %vm2231_vm8 = vcmp.eq.s32.totalorder %v7757_v36, %v7772_v44  ;;  %vm2230_vm9 = vcmp.eq.s32.totalorder %v7759_v37, %v7772_v44  ;;  %7064 = vmatprep.subr.bf16.mxu0 %v7305_v33  ;;  %v7317_v33 = vld [vmem:[%s7665_s9 + $0x120] ss:$24 sps:$4 sm:$0xff]  }
  0xd1   : > { %632 = vbcast.lane.b32.xlu1 %v622_v31, 272  ;;  %628 = vbcast.lane.b32.xlu0 %v622_v31, 264  ;;  %v6450_v40 = vsel %vm2231_vm8, 1.0, %v11091_v49  ;;  %v727_v60 = vrot.slane %v7784_v47, %v7701_v12  ;;  %v7870_v61 = vrot.slane %v7784_v47, %v7703_v15  ;;  %v7889_v14 = vrot.slane %v7784_v47, %v7707_v22 }
  0xd2   : > { %v3389_v16 = vrot.slane %v3388_v8, 4  ;;  %v3382_v31 = vrot.slane %v3381_v20, 2  ;;  %5418 = vmatmul.mubr.bf16.gmra.mxu0 %v7309_v50 }
  0xd3   : > { %v7765_v41 = vpop.permute.xlu1 %354  ;;  %v7767_v42 = vpop.permute.xlu0 %347  ;;  %7065 = vmatpush3.bf16.msra.mxu0 %v7306_v39 }
  0xd4   : > { %v3390_v21 = vadd.f32 %v3389_v16, %v3388_v8  ;;  %vm2232_vm7 = vcmp.eq.s32.totalorder %v7767_v42, %v7772_v44  ;;  %v6449_v42 = vsel %vm2230_vm9, 1.0, %v11091_v49  ;;  %vm2233_vm12 = vcmp.eq.s32.totalorder %v7765_v41, %v7772_v44  ;;  %7066 = vmatprep.subr.bf16.mxu0 %v7310_v55  ;;  %v7312_v8 = vld [vmem:[#allocation4 + $0x160] sm:$0xff]  }
  0xd5   : > { %643 = vbcast.lane.b32.xlu1 %v637_v38, 264  ;;  %639 = vbcast.lane.b32.xlu0 %v637_v38, 256  ;;  %v6451_v34 = vsel %vm2232_vm7, 1.0, %v11091_v49  ;;  %v3395_v51 = vadd.f32 %v6450_v40, %v6449_v42  ;;  %v6452_v37 = vsel %vm2233_vm12, 1.0, %v11091_v49  ;;  %v7893_v16 = vrot.slane %v7784_v47, %v7710_v27  ;;  %v7314_v47 = vld [vmem:[%s11080_s2 + $0x38] sm:$0xff]  }
  0xd6   : > { %v3391_v32 = vrot.slane %v3390_v21, 2  ;;  %v3396_v0 = vsel %vm3377_vm6, %v6451_v34, 0.0  ;;  %7142 = vmatprep.subr.bf16.mxu1 %v7314_v47  ;;  %v7318_v40 = vld [vmem:[#allocation4 + $0x158] sm:$0xff]   ;;  %v7974_v55 = vrot.slane %v7873_v1, %v7701_v12 }
  0xd7   : > { %v7774_v45 = vpop.permute.xlu1 %362  ;;  %v7776_v46 = vpop.permute.xlu0 %358  ;;  %v3397_v58 = vadd.f32 %v3396_v0, %v3395_v51  ;;  %7067 = vmatpush3.bf16.msra.mxu0 %v7311_v56  ;;  %7143 = vmatpush3.bf16.msra.mxu1 %v7314_v47  ;;  %v7319_v42 = vld [vmem:[#allocation4 + $0x118] sm:$0xff]   ;;  %v7321_v56 = vld [vmem:[#allocation4 + $0x150] sm:$0xff]  }
  0xd8   : > { %vm2234_vm10 = vcmp.eq.s32.totalorder %v7776_v46, %v7772_v44  ;;  %vm2235_vm11 = vcmp.eq.s32.totalorder %v7774_v45, %v7772_v44  ;;  %v3383_v45 = vadd.f32 %v3382_v31, %v3381_v20  ;;  %v3392_v46 = vadd.f32 %v3391_v32, %v3390_v21  ;;  %7068 = vmatprep.subr.bf16.mxu0 %v7312_v8  ;;  %v7315_v32 = vld [vmem:[%s7665_s9 + $0x124] ss:$24 sps:$4 sm:$0xff]  }
  0xd9   : > { %654 = vbcast.lane.b32.xlu1 %v652_v43, 256  ;;  %647 = vbcast.lane.b32.xlu0 %v637_v38, 272  ;;  %v6454_v36 = vsel %vm2235_vm11, 1.0, %v11091_v49  ;;  %v7901_v21 = vrot.slane %v7873_v1, %v7680_v2  ;;  %v3398_v23 = vrot.slane %v3397_v58, 4 }
  0xda   : > { %v3405_v59 = vsel %vm3377_vm6, %v6454_v36, 0.0  ;;  %v3393_v7 = vrot.slane %v3392_v46, 1  ;;  %5425 = vmatprep.mubr.bf16.mxu0 %v7315_v32 }
  0xdb   : > { %v7792_v52 = vpop.permute.xlu1 %373  ;;  %v7794_v53 = vpop.permute.xlu0 %369  ;;  %v7957_v0 = vadd.f32 %v3398_v23, %v3397_v58  ;;  %5426 = vmatmul.mubr.bf16.gmra.mxu0 %v7317_v33  ;;  %v7324_v23 = vld [vmem:[%s7665_s9 + $0x154] ss:$24 sps:$4 sm:$0xff]   ;;  %v7329_v33 = vld [vmem:[%s11080_s2 + $0x20] sm:$0xff]  }
  0xdc   : > { %vm2237_vm13 = vcmp.eq.s32.totalorder %v7792_v52, %v7772_v44  ;;  %vm2236_vm1 = vcmp.eq.s32.totalorder %v7794_v53, %v7772_v44  ;;  %v7920_v31 = vadd.f32 %v3393_v7, %v3392_v46  ;;  %v7320_v46 = vld [vmem:[%s11080_s2 + $0x30] sm:$0xff]   ;;  %5433 = vmatprep.mubr.bf16.mxu0 %v7324_v23 }
  0xdd   : > { %662 = vbcast.lane.b32.xlu1 %v652_v43, 272  ;;  %658 = vbcast.lane.b32.xlu0 %v652_v43, 264  ;;  %v6453_v43 = vsel %vm2234_vm10, 1.0, %v11091_v49  ;;  %v6456_v24 = vsel %vm2237_vm13, 1.0, %v11091_v49  ;;  %v6455_v34 = vsel %vm2236_vm1, 1.0, %v11091_v49  ;;  %v3400_v47 = vrot.slane %v7957_v0, 2 }
  0xde   : > { %v3413_v50 = vadd.f32 %v6456_v24, %v6455_v34  ;;  %v4530_v58 = vpack.c.bf16 %v7920_v31, %v7920_v31  ;;  %7144 = vmatprep.subr.bf16.mxu1 %v7320_v46  ;;  %v7326_v24 = vld [vmem:[%s7665_s9 + $0x150] ss:$24 sps:$4 sm:$0xff]  }
  0xdf   : > { %v7803_v62 = vpop.permute.xlu1 %384  ;;  %v7805_v63 = vpop.permute.xlu0 %377  ;;  %7145 = vmatpush3.bf16.msra.mxu1 %v7320_v46  ;;  %v7333_v23 = vld [vmem:[%s7665_s9 + $0x10] ss:$24 sps:$4 sm:$0xff]  }
  0xe0   : > { %vm2238_vm15 = vcmp.eq.s32.totalorder %v7805_v63, %v7772_v44  ;;  %vm2239_vm2 = vcmp.eq.s32.totalorder %v7803_v62, %v7772_v44  ;;  %v7952_v62 = vrot.slane %v7873_v1, %v7695_v6 }
  0xe1   : > { %673 = vbcast.lane.b32.xlu1 %v667_v57, 264  ;;  %669 = vbcast.lane.b32.xlu0 %v667_v57, 256  ;;  %v6457_v52 = vsel %vm2238_vm15, 1.0, %v11091_v49  ;;  %v6458_v39 = vsel %vm2239_vm2, 1.0, %v11091_v49 }
  0xe2   : > { %v3414_v36 = vsel %vm3377_vm6, %v6457_v52, 0.0 }
  0xe3   : > { %v7812_v11 = vpop.permute.xlu1 %392  ;;  %v7814_v13 = vpop.permute.xlu0 %388  ;;  %5434 = vmatmul.mubr.bf16.gmra.mxu0 %v7326_v24  ;;  %v7335_v24 = vld [vmem:[%s7665_s9 + $0x14] ss:$24 sps:$4 sm:$0xff]  }
  0xe4   : > { %vm2240_vm14 = vcmp.eq.s32.totalorder %v7814_v13, %v7772_v44  ;;  %vm2241_vm0 = vcmp.eq.s32.totalorder %v7812_v11, %v7772_v44  ;;  %5571 = vmatprep.mubr.bf16.mxu0 %v7335_v24 }
  0xe5   : > { %684 = vbcast.lane.b32.xlu1 %v682_v4, 256  ;;  %677 = vbcast.lane.b32.xlu0 %v667_v57, 272  ;;  %v3404_v57 = vadd.f32 %v6453_v43, %v6452_v37  ;;  %v6459_v25 = vsel %vm2240_vm14, 1.0, %v11091_v49  ;;  %v6460_v13 = vsel %vm2241_vm0, 1.0, %v11091_v49 }
  0xe6   : > { %v3422_v43 = vadd.f32 %v6459_v25, %v6458_v39  ;;  %v3423_v48 = vsel %vm3377_vm6, %v6460_v13, 0.0  ;;  %v7328_v13 = vld [vmem:[#allocation4 + $0x108] sm:$0xff]  }
  0xe7   : > { %v7816_v17 = vpop.permute.xlu1 %403  ;;  %v7818_v18 = vpop.permute.xlu0 %399  ;;  %v3406_v20 = vadd.f32 %v3405_v59, %v3404_v57 }
  0xe8   : > { %vm2243_vm3 = vcmp.eq.s32.totalorder %v7816_v17, %v7772_v44  ;;  %vm2242_vm4 = vcmp.eq.s32.totalorder %v7818_v18, %v7772_v44  ;;  %v7322_v18 = vld [vmem:[#allocation4 + $0x110] sm:$0xff]   ;;  %v7986_v7 = vadd.f32 %v3423_v48, %v3422_v43 }
  0xe9   : > { %692 = vbcast.lane.b32.xlu1 %v682_v4, 272  ;;  %688 = vbcast.lane.b32.xlu0 %v682_v4, 264  ;;  %v3384_v4 = vrot.slane %v3383_v45, 1  ;;  %v3407_v53 = vrot.slane %v3406_v20, 4  ;;  %v6462_v51 = vsel %vm2243_vm3, 1.0, %v11091_v49  ;;  %v6461_v37 = vsel %vm2242_vm4, 1.0, %v11091_v49 }
  0xeb   : > { %v7824_v26 = vpop.permute.xlu1 %414  ;;  %v7826_v28 = vpop.permute.xlu0 %407 }
  0xec   : > { %vm2244_vm5 = vcmp.eq.s32.totalorder %v7826_v28, %v7772_v44  ;;  %vm2245_vm7 = vcmp.eq.s32.totalorder %v7824_v26, %v7772_v44 }
  0xed   : > { %703 = vbcast.lane.b32.xlu1 %v697_v19, 264  ;;  %699 = vbcast.lane.b32.xlu0 %v697_v19, 256  ;;  %v6463_v8 = vsel %vm2244_vm5, 1.0, %v11091_v49  ;;  %v8007_v28 = vsel %vm2245_vm7, 1.0, %v11091_v49 }
  0xee   : > { %v3432_v25 = vsel %vm3377_vm6, %v6463_v8, 0.0 }
  0xef   : > { %v7841_v35 = vpop.permute.xlu1 %422  ;;  %v7843_v38 = vpop.permute.xlu0 %418 }
  0xf0   : > { %vm2247_vm8 = vcmp.eq.s32.totalorder %v7841_v35, %v7772_v44  ;;  %vm2246_vm10 = vcmp.eq.s32.totalorder %v7843_v38, %v7772_v44 }
  0xf1   : > { %714 = vbcast.lane.b32.xlu1 %v712_v30, 256  ;;  %707 = vbcast.lane.b32.xlu0 %v697_v19, 272  ;;  %v7313_v19 = vld [vmem:[#allocation4 + $0x120] sm:$0xff]   ;;  %v6466_v34 = vsel %vm2247_vm8, 1.0, %v11091_v49  ;;  %v6465_v39 = vsel %vm2246_vm10, 1.0, %v11091_v49 }
  0xf2   : > { %7069 = vmatpush3.bf16.msra.mxu0 %v7313_v19  ;;  %v7323_v19 = vld [vmem:[%s11080_s2 + $0x28] sm:$0xff]  }
  0xf3   : > { %v7861_v54 = vpop.permute.xlu1 %433  ;;  %v7863_v41 = vpop.permute.xlu0 %429  ;;  %7070 = vmatprep.subr.bf16.mxu0 %v7318_v40  ;;  %7146 = vmatprep.subr.bf16.mxu1 %v7323_v19 }
  0xf4   : > { %vm2249_vm13 = vcmp.eq.s32.totalorder %v7861_v54, %v7772_v44  ;;  %vm2248_vm14 = vcmp.eq.s32.totalorder %v7863_v41, %v7772_v44  ;;  %7147 = vmatpush3.bf16.msra.mxu1 %v7323_v19  ;;  %v7332_v41 = vld [vmem:[%s11080_s2 + $0x18] sm:$0xff]  }
  0xf5   : > { %722 = vbcast.lane.b32.xlu1 %v712_v30, 272  ;;  %718 = vbcast.lane.b32.xlu0 %v712_v30, 264  ;;  %v7918_v30 = vadd.f32 %v3384_v4, %v3383_v45  ;;  %v7948_v45 = vrot.slane %v7873_v1, %v7693_v5  ;;  %v7984_v4 = vadd.f32 %v3414_v36, %v3413_v50  ;;  %v6468_v35 = vsel %vm2249_vm13, 1.0, %v11091_v49  ;;  %v7331_v36 = vld [vmem:[#allocation4 + $0x100] sm:$0xff]  }
  0xf6   : > { %7071 = vmatpush3.bf16.msra.mxu0 %v7319_v42  ;;  %v6467_v42 = vsel %vm2248_vm14, 1.0, %v11091_v49  ;;  %7148 = vmatprep.subr.bf16.mxu1 %v7329_v33 }
  0xf7   : > { %v7883_v9 = vpop.permute.xlu1 %444  ;;  %v7885_v10 = vpop.permute.xlu0 %437  ;;  %v4529_v57 = vpack.c.bf16 %v7918_v30, %v7918_v30  ;;  %7072 = vmatprep.subr.bf16.mxu0 %v7321_v56 }
  0xf8   : > { %vm2250_vm11 = vcmp.eq.s32.totalorder %v7885_v10, %v7772_v44  ;;  %vm2251_vm15 = vcmp.eq.s32.totalorder %v7883_v9, %v7772_v44  ;;  %7149 = vmatpush3.bf16.msra.mxu1 %v7329_v33 }
  0xf9   : > { %733 = vbcast.lane.b32.xlu1 %v727_v60, 264  ;;  %729 = vbcast.lane.b32.xlu0 %v727_v60, 256  ;;  %v6470_v38 = vsel %vm2251_vm15, 1.0, %v11091_v49 }
  0xfa   : > { %7073 = vmatpush3.bf16.msra.mxu0 %v7322_v18  ;;  %v3449_v18 = vadd.f32 %v6468_v35, %v6467_v42  ;;  %7150 = vmatprep.subr.bf16.mxu1 %v7332_v41 }
  0xfb   : > { %v7944_v63 = vpop.permute.xlu1 %452  ;;  %v449_v11 = vpop.permute.xlu0 %448 }
  0xfc   : > { %vm2252_vm9 = vcmp.eq.s32.totalorder %v449_v11, %v7772_v44  ;;  %vm2253_vm12 = vcmp.eq.s32.totalorder %v7944_v63, %v7772_v44  ;;  %v6469_v11 = vsel %vm2250_vm11, 1.0, %v11091_v49  ;;  %v7330_v63 = vld [vmem:[#allocation4 + $0x140] sm:$0xff]   ;;  %7151 = vmatpush3.bf16.msra.mxu1 %v7332_v41 }
  0xfd   : > { %744 = vbcast.lane.b32.xlu1 %v7870_v61, 256  ;;  %737 = vbcast.lane.b32.xlu0 %v727_v60, 272  ;;  %v7982_v60 = vadd.f32 %v3407_v53, %v3406_v20  ;;  %v7996_v20 = vadd.f32 %v6462_v51, %v6461_v37  ;;  %v6471_v32 = vsel %vm2252_vm9, 1.0, %v11091_v49  ;;  %v6472_v40 = vsel %vm2253_vm12, 1.0, %v11091_v49  ;;  %v7338_v41 = vld [vmem:[%s7665_s9 + $0x44] ss:$24 sps:$4 sm:$0xff]  }
  0xfe   : > { %v3458_v53 = vadd.f32 %v6471_v32, %v6470_v38  ;;  %v3450_v48 = vsel %vm3377_vm6, %v6469_v11, 0.0  ;;  %v3459_v50 = vsel %vm3377_vm6, %v6472_v40, 0.0  ;;  %v3425_v40 = vrot.slane %v7986_v7, 4 }
  0xff   : > { %v464_v17 = vpop.permute.xlu1 %463  ;;  %v460_v59 = vpop.permute.xlu0 %459  ;;  %v3451_v11 = vadd.f32 %v3450_v48, %v3449_v18 }
 0x100   : > { %vm2255_vm0 = vcmp.eq.s32.totalorder %v464_v17, %v7772_v44  ;;  %vm2254_vm1 = vcmp.eq.s32.totalorder %v460_v59, %v7772_v44  ;;  %v3433_v59 = vadd.f32 %v3432_v25, %v7996_v20  ;;  %v7336_v20 = vld [vmem:[%s11080_s2 + $0x10] sm:$0xff]   ;;  %v3409_v25 = vrot.slane %v7982_v60, 2 }
 0x101   : > { %752 = vbcast.lane.b32.xlu1 %v7870_v61, 272  ;;  %748 = vbcast.lane.b32.xlu0 %v7870_v61, 264  ;;  %v7327_v61 = vld [vmem:[#allocation4 + $0x148] sm:$0xff]   ;;  %v6474_v54 = vsel %vm2255_vm0, 1.0, %v11091_v49  ;;  %v6473_v9 = vsel %vm2254_vm1, 1.0, %v11091_v49 }
 0x102   : > { %7074 = vmatprep.subr.bf16.mxu0 %v7327_v61  ;;  %v3467_v8 = vadd.f32 %v6474_v54, %v6473_v9  ;;  %v3441_v61 = vsel %vm3377_vm6, %v6466_v34, 0.0  ;;  %v3416_v34 = vrot.slane %v7984_v4, 4  ;;  %7152 = vmatprep.subr.bf16.mxu1 %v7336_v20  ;;  %v8121_v54 = vunpack.c.l.b16 %v4530_v58 }
 0x103   : > { %v475_v26 = vpop.permute.xlu1 %474  ;;  %v468_v52 = vpop.permute.xlu0 %467  ;;  %7075 = vmatpush3.bf16.msra.mxu0 %v7328_v13  ;;  %v3452_v9 = vrot.slane %v3451_v11, 4  ;;  %v3426_v58 = vadd.f32 %v3425_v40, %v7986_v7  ;;  %7153 = vmatpush3.bf16.msra.mxu1 %v7336_v20  ;;  %v7341_v7 = vld [vmem:[%s11080_s2] sm:$0xff]  }
 0x104   : > { %vm2256_vm2 = vcmp.eq.s32.totalorder %v468_v52, %v7772_v44  ;;  %vm2257_vm3 = vcmp.eq.s32.totalorder %v475_v26, %v7772_v44  ;;  %7076 = vmatprep.subr.bf16.mxu0 %v7330_v63  ;;  %v3440_v26 = vadd.f32 %v6465_v39, %v8007_v28  ;;  %v3460_v52 = vadd.f32 %v3459_v50, %v3458_v53 }
 0x105   : > { %763 = vbcast.lane.b32.xlu1 %v7889_v14, 264  ;;  %759 = vbcast.lane.b32.xlu0 %v7889_v14, 256  ;;  %v6475_v10 = vsel %vm2256_vm2, 1.0, %v11091_v49  ;;  %v6476_v51 = vsel %vm2257_vm3, 1.0, %v11091_v49  ;;  %v8100_v28 = vunpack.c.l.b16 %v4529_v57  ;;  %v8108_v39 = vrot.slane %v7873_v1, %v7703_v15 }
 0x106   : > { %v3468_v37 = vsel %vm3377_vm6, %v6475_v10, 0.0  ;;  %v8116_v57 = vadd.f32 %v3400_v47, %v7957_v0  ;;  %v3434_v10 = vrot.slane %v3433_v59, 4  ;;  %v3461_v63 = vrot.slane %v3460_v52, 4  ;;  %v7337_v0 = vld [vmem:[%s11080_s2 + $0x8] sm:$0xff]  }
 0x107   : > { %v483_v43 = vpop.permute.xlu1 %482  ;;  %v479_v46 = vpop.permute.xlu0 %478  ;;  %7077 = vmatpush3.bf16.msra.mxu0 %v7331_v36  ;;  %v8128_v47 = vadd.f32 %v3409_v25, %v7982_v60  ;;  %v7340_v60 = vld [vmem:[%s7665_s9 + $0x40] ss:$24 sps:$4 sm:$0xff]   ;;  %7154 = vmatprep.subr.bf16.mxu1 %v7337_v0  ;;  %vm5892_vm3 = vcmask 1041409  }
 0x108   : > { %vm2259_vm4 = vcmp.eq.s32.totalorder %v483_v43, %v7772_v44  ;;  %vm2258_vm5 = vcmp.eq.s32.totalorder %v479_v46, %v7772_v44  ;;  %v3417_v46 = vadd.f32 %v3416_v34, %v7984_v4  ;;  %v3462_v4 = vadd.f32 %v3461_v63, %v3460_v52  ;;  %7155 = vmatpush3.bf16.msra.mxu1 %v7337_v0 }
 0x109   : > { %v6478_v56 = vsel %vm2259_vm4, 1.0, %v11091_v49  ;;  %v6477_v17 = vsel %vm2258_vm5, 1.0, %v11091_v49  ;;  %774 = vbcast.lane.b32.xlu1 %v7893_v16, 256  ;;  %767 = vbcast.lane.b32.xlu0 %v7889_v14, 272  ;;  %v3469_v14 = vadd.f32 %v3468_v37, %v3467_v8  ;;  %v3453_v8 = vadd.f32 %v3452_v9, %v3451_v11 }
 0x10a   : > { %v3476_v19 = vadd.f32 %v6477_v17, %v6476_v51  ;;  %v3477_v13 = vsel %vm3377_vm6, %v6478_v56, 0.0  ;;  %5572 = vmatmul.mubr.bf16.vlgmr.msra.gmra.mxu0 %v7333_v23  ;;  %v3435_v51 = vadd.f32 %v3434_v10, %v3433_v59  ;;  %7156 = vmatprep.subr.bf16.mxu1 %v7341_v7  ;;  %vm5894_vm4 = vcmask 1042434  }
 0x10b   : > { %v494_v32 = vpop.permute.xlu1 %493  ;;  %v490_v33 = vpop.permute.xlu0 %489  ;;  %v3470_v43 = vrot.slane %v3469_v14, 4  ;;  %5579 = vmatprep.mubr.bf16.mxu0 %v7338_v41  ;;  %v3454_v10 = vrot.slane %v3453_v8, 2  ;;  %vm5896_vm5 = vcmask 1043459  }
 0x10c   : > { %vm2261_vm7 = vcmp.eq.s32.totalorder %v494_v32, %v7772_v44  ;;  %vm2260_vm8 = vcmp.eq.s32.totalorder %v490_v33, %v7772_v44  ;;  %v3478_v35 = vadd.f32 %v3477_v13, %v3476_v19  ;;  %v3427_v33 = vrot.slane %v3426_v58, 2  ;;  %7157 = vmatpush3.bf16.msra.mxu1 %v7341_v7 }
 0x10d   : > { %782 = vbcast.lane.b32.xlu1 %v7893_v16, 272  ;;  %778 = vbcast.lane.b32.xlu0 %v7893_v16, 264  ;;  %v6480_v38 = vsel %vm2261_vm7, 1.0, %v11091_v49  ;;  %v6479_v30 = vsel %vm2260_vm8, 1.0, %v11091_v49  ;;  %v3442_v16 = vadd.f32 %v3441_v61, %v3440_v26  ;;  %v3471_v19 = vadd.f32 %v3470_v43, %v3469_v14 }
 0x10e   : > { %v3485_v36 = vadd.f32 %v6480_v38, %v6479_v30  ;;  %v3479_v48 = vrot.slane %v3478_v35, 4  ;;  %v3418_v26 = vrot.slane %v3417_v46, 2  ;;  %v3463_v14 = vrot.slane %v3462_v4, 2 }
 0x10f   : > { %v505_v42 = vpop.permute.xlu1 %504  ;;  %v498_v53 = vpop.permute.xlu0 %497  ;;  %v3443_v37 = vrot.slane %v3442_v16, 4  ;;  %v3472_v40 = vrot.slane %v3471_v19, 2  ;;  %v3436_v30 = vrot.slane %v3435_v51, 2  ;;  %vm5898_vm7 = vcmask 1044484  }
 0x110   : > { %vm2262_vm9 = vcmp.eq.s32.totalorder %v498_v53, %v7772_v44  ;;  %vm2263_vm10 = vcmp.eq.s32.totalorder %v505_v42, %v7772_v44  ;;  %v3480_v52 = vadd.f32 %v3479_v48, %v3478_v35  ;;  %v3411_v35 = vrot.slane %v8128_v47, 1 }
 0x111   : > { %v6481_v31 = vsel %vm2262_vm9, 1.0, %v11091_v49  ;;  %793 = vbcast.lane.b32.xlu1 %v7901_v21, 264  ;;  %789 = vbcast.lane.b32.xlu0 %v7901_v21, 256  ;;  %v6482_v59 = vsel %vm2263_vm10, 1.0, %v11091_v49  ;;  %v3444_v11 = vadd.f32 %v3443_v37, %v3442_v16  ;;  %v8160_v9 = vadd.f32 %v3418_v26, %v3417_v46 }
 0x112   : > { %v3486_v50 = vsel %vm3377_vm6, %v6481_v31, 0.0  ;;  %5580 = vmatmul.mubr.bf16.gmra.mxu0 %v7340_v60  ;;  %v3481_v16 = vrot.slane %v3480_v52, 2  ;;  %v3464_v0 = vadd.f32 %v3463_v14, %v3462_v4  ;;  %v3473_v41 = vadd.f32 %v3472_v40, %v3471_v19 }
 0x113   : > { %v3487_v56 = vadd.f32 %v3486_v50, %v3485_v36  ;;  %v513_v17 = vpop.permute.xlu1 %512  ;;  %v509_v18 = vpop.permute.xlu0 %508  ;;  %v3445_v43 = vrot.slane %v3444_v11, 2  ;;  %v8162_v50 = vadd.f32 %v3427_v33, %v3426_v58  ;;  %v3455_v37 = vadd.f32 %v3454_v10, %v3453_v8 }
 0x114   : > { %vm2265_vm11 = vcmp.eq.s32.totalorder %v513_v17, %v7772_v44  ;;  %vm2264_vm12 = vcmp.eq.s32.totalorder %v509_v18, %v7772_v44  ;;  %v3482_v46 = vadd.f32 %v3481_v16, %v3480_v52  ;;  %v3465_v19 = vrot.slane %v3464_v0, 1 }
 0x115   : > { %v3488_v23 = vrot.slane %v3487_v56, 4  ;;  %v6484_v24 = vsel %vm2265_vm11, 1.0, %v11091_v49  ;;  %v6483_v61 = vsel %vm2264_vm12, 1.0, %v11091_v49  ;;  %804 = vbcast.lane.b32.xlu1 %v7916_v29, 256  ;;  %797 = vbcast.lane.b32.xlu0 %v7901_v21, 272  ;;  %v3402_v21 = vrot.slane %v8116_v57, 1 }
 0x116   : > { %v3495_v13 = vsel %vm3377_vm6, %v6484_v24, 0.0  ;;  %v3494_v32 = vadd.f32 %v6483_v61, %v6482_v59  ;;  %v8172_v18 = vadd.f32 %v3445_v43, %v3444_v11  ;;  %v3483_v33 = vrot.slane %v3482_v46, 1 }
 0x117   : > { %v3489_v20 = vadd.f32 %v3488_v23, %v3487_v56  ;;  %v524_v25 = vpop.permute.xlu1 %523  ;;  %v520_v34 = vpop.permute.xlu0 %519  ;;  %v3474_v23 = vrot.slane %v3473_v41, 1  ;;  %v3429_v10 = vrot.slane %v8162_v50, 1  ;;  %v3466_v16 = vadd.f32 %v3465_v19, %v3464_v0 }
 0x118   : > { %v3496_v38 = vadd.f32 %v3495_v13, %v3494_v32  ;;  %vm2267_vm13 = vcmp.eq.s32.totalorder %v524_v25, %v7772_v44  ;;  %vm2266_vm14 = vcmp.eq.s32.totalorder %v520_v34, %v7772_v44  ;;  %v3456_v32 = vrot.slane %v3455_v37, 1 }
 0x119   : > { %812 = vbcast.lane.b32.xlu1 %v7916_v29, 272  ;;  %808 = vbcast.lane.b32.xlu0 %v7916_v29, 264  ;;  %v6486_v42 = vsel %vm2267_vm13, 1.0, %v11091_v49  ;;  %v6485_v53 = vsel %vm2266_vm14, 1.0, %v11091_v49  ;;  %v3490_v36 = vrot.slane %v3489_v20, 2  ;;  %v8165_v29 = vadd.f32 %v3436_v30, %v3435_v51 }
 0x11a   : > { %v3497_v63 = vrot.slane %v3496_v38, 4  ;;  %v3503_v56 = vadd.f32 %v6486_v42, %v6485_v53  ;;  %v3420_v25 = vrot.slane %v8160_v9, 1  ;;  %v3412_v42 = vadd.f32 %v3411_v35, %v8128_v47 }
 0x11b   : > { %v535_v31 = vpop.permute.xlu1 %534  ;;  %v528_v48 = vpop.permute.xlu0 %527  ;;  %v3491_v7 = vadd.f32 %v3490_v36, %v3489_v20  ;;  %v3403_v20 = vadd.f32 %v3402_v21, %v8116_v57  ;;  %v3438_v53 = vrot.slane %v8165_v29, 1  ;;  %v3475_v43 = vadd.f32 %v3474_v23, %v3473_v41 }
 0x11c   : > { %v3498_v60 = vadd.f32 %v3497_v63, %v3496_v38  ;;  %vm2268_vm15 = vcmp.eq.s32.totalorder %v528_v48, %v7772_v44  ;;  %vm2269_vm0 = vcmp.eq.s32.totalorder %v535_v31, %v7772_v44  ;;  %v3447_v21 = vrot.slane %v8172_v18, 1 }
 0x11d   : > { %v6487_v17 = vsel %vm2268_vm15, 1.0, %v11091_v49  ;;  %823 = vbcast.lane.b32.xlu1 %v7948_v45, 264  ;;  %819 = vbcast.lane.b32.xlu0 %v7948_v45, 256  ;;  %v6488_v61 = vsel %vm2269_vm0, 1.0, %v11091_v49  ;;  %v3492_v34 = vrot.slane %v3491_v7, 1  ;;  %v3457_v36 = vadd.f32 %v3456_v32, %v3455_v37 }
 0x11e   : > { %v3499_v4 = vrot.slane %v3498_v60, 2  ;;  %v3504_v58 = vsel %vm3377_vm6, %v6487_v17, 0.0  ;;  %v3484_v31 = vadd.f32 %v3483_v33, %v3482_v46  ;;  %v3421_v0 = vadd.f32 %v3420_v25, %v8160_v9 }
 0x11f   : > { %v3505_v51 = vadd.f32 %v3504_v58, %v3503_v56  ;;  %v543_v59 = vpop.permute.xlu1 %542  ;;  %v539_v8 = vpop.permute.xlu0 %538  ;;  %v3493_v56 = vadd.f32 %v3492_v34, %v3491_v7  ;;  %v3430_v41 = vadd.f32 %v3429_v10, %v8162_v50  ;;  %v4532_v37 = vpack.c.bf16 %v3412_v42, %v3412_v42 }
 0x120   : > { %v3500_v24 = vadd.f32 %v3499_v4, %v3498_v60  ;;  %vm2271_vm1 = vcmp.eq.s32.totalorder %v543_v59, %v7772_v44  ;;  %vm2270_vm2 = vcmp.eq.s32.totalorder %v539_v8, %v7772_v44  ;;  %v4531_v60 = vpack.c.bf16 %v3403_v20, %v3403_v20 }
 0x121   : > { %v3506_v26 = vrot.slane %v3505_v51, 4  ;;  %v6490_v52 = vsel %vm2271_vm1, 1.0, %v11091_v49  ;;  %v6489_v13 = vsel %vm2270_vm2, 1.0, %v11091_v49  ;;  %834 = vbcast.lane.b32.xlu1 %v7952_v62, 256  ;;  %827 = vbcast.lane.b32.xlu0 %v7948_v45, 272  ;;  %v4538_v4 = vpack.c.bf16 %v3466_v16, %v3466_v16 }
 0x122   : > { %v3513_v11 = vsel %vm3377_vm6, %v6490_v52, 0.0  ;;  %v3512_v14 = vadd.f32 %v6489_v13, %v6488_v61  ;;  %v3501_v45 = vrot.slane %v3500_v24, 1  ;;  %v3439_v46 = vadd.f32 %v3438_v53, %v8165_v29 }
 0x123   : > { %v3507_v40 = vadd.f32 %v3506_v26, %v3505_v51  ;;  %v8184_v38 = vpop.permute.xlu1 %553  ;;  %v8186_v30 = vpop.permute.xlu0 %549  ;;  %v4539_v19 = vpack.c.bf16 %v3475_v43, %v3475_v43  ;;  %vm11090_vm8 = vcmask 1045509   ;;  %v4537_v9 = vpack.c.bf16 %v3457_v36, %v3457_v36 }
 0x124   : > { %v3514_v63 = vadd.f32 %v3513_v11, %v3512_v14  ;;  %v4540_v7 = vpack.c.bf16 %v3484_v31, %v3484_v31  ;;  %v3448_v8 = vadd.f32 %v3447_v21, %v8172_v18  ;;  %vm11089_vm9 = vcmask 1046534  }
 0x125   : > { %v3508_v57 = vrot.slane %v3507_v40, 2  ;;  %842 = vbcast.lane.b32.xlu1 %v7952_v62, 272  ;;  %838 = vbcast.lane.b32.xlu0 %v7952_v62, 264  ;;  %v3502_v62 = vadd.f32 %v3501_v45, %v3500_v24  ;;  %v5766_v50 = vunpack.c.l.b16 %v4531_v60  ;;  %v4533_v23 = vpack.c.bf16 %v3421_v0, %v3421_v0 }
 0x126   : > { %v3515_v48 = vrot.slane %v3514_v63, 4  ;;  %v4541_v24 = vpack.c.bf16 %v3493_v56, %v3493_v56  ;;  %v4534_v29 = vpack.c.bf16 %v3430_v41, %v3430_v41  ;;  %v5773_v13 = vunpack.c.l.b16 %v4538_v4 }
 0x127   : > { %v3509_v17 = vadd.f32 %v3508_v57, %v3507_v40  ;;  %v8195_v47 = vpop.permute.xlu1 %564  ;;  %v8197_v35 = vpop.permute.xlu0 %557  ;;  %v4542_v32 = vpack.c.bf16 %v3502_v62, %v3502_v62  ;;  %v5767_v11 = vunpack.c.l.b16 %v4532_v37  ;;  %v4535_v14 = vpack.c.bf16 %v3439_v46, %v3439_v46 }
 0x128   : > { %v3516_v58 = vadd.f32 %v3515_v48, %v3514_v63  ;;  %v5774_v20 = vunpack.c.l.b16 %v4539_v19  ;;  %v5772_v18 = vunpack.c.l.b16 %v4537_v9  ;;  %v5775_v34 = vunpack.c.l.b16 %v4540_v7 }
 0x129   : > { %v3510_v51 = vrot.slane %v3509_v17, 1  ;;  %853 = vbcast.lane.b32.xlu1 %v7974_v55, 264  ;;  %849 = vbcast.lane.b32.xlu0 %v7974_v55, 256  ;;  %v4536_v10 = vpack.c.bf16 %v3448_v8, %v3448_v8  ;;  %v5893_v16 = vsel %vm5892_vm3, %v8121_v54, %v8100_v28  ;;  %v5768_v45 = vunpack.c.l.b16 %v4533_v23 }
 0x12a   : > { %v3517_v59 = vrot.slane %v3516_v58, 2  ;;  %v5776_v63 = vunpack.c.l.b16 %v4541_v24  ;;  %v877_v43 = vrot.slane %v7873_v1, %v7707_v22  ;;  %v5769_v57 = vunpack.c.l.b16 %v4534_v29 }
 0x12b   : > { %v3511_v61 = vadd.f32 %v3510_v51, %v3509_v17  ;;  %v573_v26 = vpop.permute.xlu1 %572  ;;  %v569_v52 = vpop.permute.xlu0 %568  ;;  %v5777_v21 = vunpack.c.l.b16 %v4542_v32  ;;  %v5770_v31 = vunpack.c.l.b16 %v4535_v14  ;;  %v5895_v54 = vsel %vm5894_vm4, %v5766_v50, %v5893_v16 }
 0x12c   : > { %v3518_v33 = vadd.f32 %v3517_v59, %v3516_v58  ;;  %v5771_v0 = vunpack.c.l.b16 %v4536_v10  ;;  %v5897_v56 = vsel %vm5896_vm5, %v5767_v11, %v5895_v54  ;;  %vm11088_vm10 = vcmask 1047559  }
 0x12d   : > { %v4543_v25 = vpack.c.bf16 %v3511_v61, %v3511_v61  ;;  %864 = vbcast.lane.b32.xlu1 %v8108_v39, 256  ;;  %857 = vbcast.lane.b32.xlu0 %v7974_v55, 272  ;;  %v5906_v55 = vsel %vm5892_vm3, %v5773_v13, %v5772_v18  ;;  %v5899_v62 = vsel %vm5898_vm7, %v5768_v45, %v5897_v56  ;;  %v8252_v61 = vld [vmem:[%s7688_s23 + $0x28] sm:$0xff] }
 0x12e   : > { %v3519_v40 = vrot.slane %v3518_v33, 1  ;;  %v5907_v48 = vsel %vm5894_vm4, %v5774_v20, %v5906_v55  ;;  %v892_v58 = vrot.slane %v7873_v1, %v7710_v27  ;;  %v5901_v46 = vsel %vm11090_vm8, %v5769_v57, %v5899_v62 }
 0x12f   : > { %v8209_v42 = vpop.permute.xlu1 %583  ;;  %v8211_v53 = vpop.permute.xlu0 %579  ;;  %v5778_v28 = vunpack.c.l.b16 %v4543_v25  ;;  %v5908_v17 = vsel %vm5896_vm5, %v5775_v34, %v5907_v48  ;;  %vm2276_vm11 = vcmp.eq.s32.totalorder %v569_v52, %v7772_v44  ;;  %v5903_v51 = vsel %vm11089_vm9, %v5770_v31, %v5901_v46 }
 0x130   : > { %v3520_v36 = vadd.f32 %v3519_v40, %v3518_v33  ;;  %vm2277_vm12 = vcmp.eq.s32.totalorder %v573_v26, %v7772_v44  ;;  %v5905_v7 = vsel %vm11088_vm10, %v5771_v0, %v5903_v51  ;;  %vm2275_vm13 = vcmp.eq.s32.totalorder %v8195_v47, %v7772_v44 }
 0x131   : > { %872 = vbcast.lane.b32.xlu1 %v8108_v39, 272  ;;  %868 = vbcast.lane.b32.xlu0 %v8108_v39, 264  ;;  %v5909_v39 = vsel %vm5898_vm7, %v5776_v63, %v5908_v17  ;;  %v6495_v23 = vsel %vm2276_vm11, 1.0, %v11091_v49  ;;  %vm2274_vm14 = vcmp.eq.s32.totalorder %v8197_v35, %v7772_v44  ;;  %v6496_v24 = vsel %vm2277_vm12, 1.0, %v11091_v49 }
 0x132   : > { %v4544_v60 = vpack.c.bf16 %v3520_v36, %v3520_v36  ;;  %v5910_v19 = vsel %vm11090_vm8, %v5777_v21, %v5909_v39  ;;  %vm2273_vm15 = vcmp.eq.s32.totalorder %v8184_v38, %v7772_v44  ;;  %vm2272_vm0 = vcmp.eq.s32.totalorder %v8186_v30, %v7772_v44 }
 0x133   : > { %v8222_v41 = vpop.permute.xlu1 %594  ;;  %v588_v4 = vpop.permute.xlu0 %587  ;;  %v5911_v9 = vsel %vm11089_vm9, %v5778_v28, %v5910_v19  ;;  %v6494_v47 = vsel %vm2275_vm13, 1.0, %v11091_v49  ;;  %v6493_v35 = vsel %vm2274_vm14, 1.0, %v11091_v49  ;;  %v3531_v13 = vsel %vm3377_vm6, %v6496_v24, 0.0 }
 0x134   : > { %v5779_v37 = vunpack.c.l.b16 %v4544_v60  ;;  %v3530_v26 = vadd.f32 %v6495_v23, %v6494_v47  ;;  %v6492_v32 = vsel %vm2273_vm15, 1.0, %v11091_v49  ;;  %v6491_v38 = vsel %vm2272_vm0, 1.0, %v11091_v49 }
 0x135   : > { %883 = vbcast.lane.b32.xlu1 %v877_v43, 264  ;;  %879 = vbcast.lane.b32.xlu0 %v877_v43, 256  ;;  %v907_v30 = vrot.slane %v8252_v61, %v7680_v2  ;;  %v3522_v33 = vsel %vm3377_vm6, %v6493_v35, 0.0  ;;  %v3521_v25 = vadd.f32 %v6492_v32, %v6491_v38  ;;  %v922_v18 = vrot.slane %v8252_v61, %v7690_v3 }
 0x136   : > { %v5912_v1 = vsel %vm11088_vm10, %v5779_v37, %v5911_v9  ;;  %v3532_v11 = vadd.f32 %v3531_v13, %v3530_v26  ;;  %vm2280_vm1 = vcmp.eq.s32.totalorder %v588_v4, %v7772_v44  ;;  %vm2279_vm2 = vcmp.eq.s32.totalorder %v8209_v42, %v7772_v44 }
 0x137   : > { %v8238_v59 = vpop.permute.xlu1 %602  ;;  %v8240_v8 = vpop.permute.xlu0 %598  ;;  %v6011_v50 = vpack.c.b16 %v5912_v1, %v5905_v7  ;;  %v3523_v34 = vadd.f32 %v3522_v33, %v3521_v25  ;;  %vm2278_vm11 = vcmp.eq.s32.totalorder %v8211_v53, %v7772_v44  ;;  %v6499_v63 = vsel %vm2280_vm1, 1.0, %v11091_v49 }
 0x138   : > { %v3533_v40 = vrot.slane %v3532_v11, 4  ;;  %v6498_v57 = vsel %vm2279_vm2, 1.0, %v11091_v49  ;;  %v6497_v55 = vsel %vm2278_vm11, 1.0, %v11091_v49  ;;  %v3540_v31 = vsel %vm3377_vm6, %v6499_v63, 0.0 }
 0x139   : > { %894 = vbcast.lane.b32.xlu1 %v892_v58, 256  ;;  %887 = vbcast.lane.b32.xlu0 %v877_v43, 272  ;;  %v3524_v45 = vrot.slane %v3523_v34, 4  ;;  %v937_v42 = vrot.slane %v8252_v61, %v7693_v5  ;;  %v3539_v28 = vadd.f32 %v6498_v57, %v6497_v55  ;;  %vm2281_vm12 = vcmp.eq.s32.totalorder %v8222_v41, %v7772_v44 }
 0x13a   : > { %7158 = vmatprep.mubr.bf16.mxu1 %v6011_v50  ;;  %v3534_v43 = vadd.f32 %v3533_v40, %v3532_v11  ;;  %vm2282_vm13 = vcmp.eq.s32.totalorder %v8240_v8, %v7772_v44  ;;  %vm2283_vm14 = vcmp.eq.s32.totalorder %v8238_v59, %v7772_v44  ;;  %v952_v56 = vrot.slane %v8252_v61, %v7695_v6 }
 0x13b   : > { %v8254_v52 = vpop.permute.xlu1 %613  ;;  %v8256_v29 = vpop.permute.xlu0 %609  ;;  %v3525_v53 = vadd.f32 %v3524_v45, %v3523_v34  ;;  %v3541_v0 = vadd.f32 %v3540_v31, %v3539_v28  ;;  %v6500_v4 = vsel %vm2281_vm12, 1.0, %v11091_v49  ;;  %v6501_v41 = vsel %vm2282_vm13, 1.0, %v11091_v49 }
 0x13c   : > { %v3535_v54 = vrot.slane %v3534_v43, 2  ;;  %v6502_v39 = vsel %vm2283_vm14, 1.0, %v11091_v49  ;;  %vm2285_vm1 = vcmp.eq.s32.totalorder %v8254_v52, %v7772_v44  ;;  %vm2284_vm2 = vcmp.eq.s32.totalorder %v8256_v29, %v7772_v44 }
 0x13d   : > { %902 = vbcast.lane.b32.xlu1 %v892_v58, 272  ;;  %898 = vbcast.lane.b32.xlu0 %v892_v58, 264  ;;  %v3526_v17 = vrot.slane %v3525_v53, 2  ;;  %v3542_v46 = vrot.slane %v3541_v0, 4  ;;  %v3548_v19 = vadd.f32 %v6501_v41, %v6500_v4  ;;  %v3549_v9 = vsel %vm3377_vm6, %v6502_v39, 0.0 }
 0x13e   : > { %v3536_v62 = vadd.f32 %v3535_v54, %v3534_v43  ;;  %v6504_v8 = vsel %vm2285_vm1, 1.0, %v11091_v49  ;;  %v6503_v50 = vsel %vm2284_vm2, 1.0, %v11091_v49  ;;  %v967_v32 = vrot.slane %v8252_v61, %v7701_v12 }
 0x13f   : > { %v8265_v14 = vpop.permute.xlu1 %624  ;;  %v618_v20 = vpop.permute.xlu0 %617  ;;  %v3527_v51 = vadd.f32 %v3526_v17, %v3525_v53  ;;  %v3543_v26 = vadd.f32 %v3542_v46, %v3541_v0  ;;  %v3550_v29 = vadd.f32 %v3549_v9, %v3548_v19  ;;  %v3557_v38 = vadd.f32 %v6504_v8, %v6503_v50 }
 0x140   : > { %vm2286_vm15 = vcmp.eq.s32.totalorder %v618_v20, %v7772_v44  ;;  %vm2287_vm12 = vcmp.eq.s32.totalorder %v8265_v14, %v7772_v44  ;;  %v3537_v59 = vrot.slane %v3536_v62, 1  ;;  %v8338_v45 = vrot.slane %v8252_v61, %v7707_v22 }
 0x141   : > { %913 = vbcast.lane.b32.xlu1 %v907_v30, 264  ;;  %909 = vbcast.lane.b32.xlu0 %v907_v30, 256  ;;  %v6505_v7 = vsel %vm2286_vm15, 1.0, %v11091_v49  ;;  %v6506_v52 = vsel %vm2287_vm12, 1.0, %v11091_v49  ;;  %v3528_v33 = vrot.slane %v3527_v51, 1  ;;  %v3544_v25 = vrot.slane %v3543_v26, 2 }
 0x142   : > { %v3558_v35 = vsel %vm3377_vm6, %v6505_v7, 0.0  ;;  %v3538_v11 = vadd.f32 %v3537_v59, %v3536_v62  ;;  %v3551_v34 = vrot.slane %v3550_v29, 4  ;;  %v8350_v53 = vrot.slane %v8252_v61, %v7710_v27 }
 0x143   : > { %v633_v10 = vpop.permute.xlu1 %632  ;;  %v629_v16 = vpop.permute.xlu0 %628  ;;  %v8340_v63 = vadd.f32 %v3528_v33, %v3527_v51  ;;  %v8346_v31 = vadd.f32 %v3544_v25, %v3543_v26 }
 0x144   : > { %vm2288_vm0 = vcmp.eq.s32.totalorder %v629_v16, %v7772_v44  ;;  %vm2289_vm11 = vcmp.eq.s32.totalorder %v633_v10, %v7772_v44  ;;  %v982_v10 = vrot.slane %v8252_v61, %v7703_v15  ;;  %v8334_v16 = vld [vmem:[%s7688_s23 + $0x30] sm:$0xff]  ;;  %v4546_v43 = vpack.c.bf16 %v3538_v11, %v3538_v11 }
 0x145   : > { %924 = vbcast.lane.b32.xlu1 %v922_v18, 256  ;;  %917 = vbcast.lane.b32.xlu0 %v907_v30, 272  ;;  %v6507_v1 = vsel %vm2288_vm0, 1.0, %v11091_v49  ;;  %v6508_v23 = vsel %vm2289_vm11, 1.0, %v11091_v49  ;;  %v8354_v28 = vrot.slane %v8334_v16, %v7680_v2  ;;  %v8356_v54 = vadd.f32 %v3551_v34, %v3550_v29 }
 0x146   : > { %v3566_v13 = vadd.f32 %v6507_v1, %v6506_v52  ;;  %v3567_v30 = vsel %vm3377_vm6, %v6508_v23, 0.0  ;;  %v8370_v17 = vrot.slane %v8334_v16, %v7695_v6  ;;  %v8374_v4 = vrot.slane %v8334_v16, %v7701_v12 }
 0x147   : > { %v8277_v21 = vpop.permute.xlu1 %643  ;;  %v8279_v36 = vpop.permute.xlu0 %639  ;;  %v4545_v41 = vpack.c.bf16 %v8340_v63, %v8340_v63  ;;  %v8378_v62 = vunpack.c.l.b16 %v4546_v43  ;;  %v8384_v19 = vrot.slane %v8334_v16, %v7703_v15  ;;  %v3546_v51 = vrot.slane %v8346_v31, 1 }
 0x148   : > { %v3568_v40 = vadd.f32 %v3567_v30, %v3566_v13  ;;  %vm2291_vm13 = vcmp.eq.s32.totalorder %v8277_v21, %v7772_v44  ;;  %vm2290_vm14 = vcmp.eq.s32.totalorder %v8279_v36, %v7772_v44  ;;  %v8360_v21 = vrot.slane %v8334_v16, %v7690_v3 }
 0x149   : > { %932 = vbcast.lane.b32.xlu1 %v922_v18, 272  ;;  %928 = vbcast.lane.b32.xlu0 %v922_v18, 264  ;;  %v3559_v18 = vadd.f32 %v3558_v35, %v3557_v38  ;;  %v8364_v36 = vrot.slane %v8334_v16, %v7693_v5  ;;  %v6510_v61 = vsel %vm2291_vm13, 1.0, %v11091_v49  ;;  %v3553_v7 = vrot.slane %v8356_v54, 2 }
 0x14a   : > { %v3569_v0 = vrot.slane %v3568_v40, 4 }
 0x14b   : > { %v8288_v48 = vpop.permute.xlu1 %654  ;;  %v8290_v60 = vpop.permute.xlu0 %647 }
 0x14c   : > { %vm2292_vm15 = vcmp.eq.s32.totalorder %v8290_v60, %v7772_v44  ;;  %v8394_v1 = vadd.f32 %v3569_v0, %v3568_v40  ;;  %vm2293_vm11 = vcmp.eq.s32.totalorder %v8288_v48, %v7772_v44  ;;  %v5780_v48 = vunpack.c.l.b16 %v4545_v41 }
 0x14d   : > { %943 = vbcast.lane.b32.xlu1 %v937_v42, 264  ;;  %939 = vbcast.lane.b32.xlu0 %v937_v42, 256  ;;  %v6511_v59 = vsel %vm2292_vm15, 1.0, %v11091_v49  ;;  %v6512_v43 = vsel %vm2293_vm11, 1.0, %v11091_v49 }
 0x14e   : > { %v3576_v26 = vsel %vm3377_vm6, %v6511_v59, 0.0  ;;  %v8463_v63 = vsel %vm5892_vm3, %v8378_v62, %v5780_v48 }
 0x14f   : > { %v8301_v58 = vpop.permute.xlu1 %662  ;;  %v8303_v37 = vpop.permute.xlu0 %658 }
 0x151   : > { %954 = vbcast.lane.b32.xlu1 %v952_v56, 256  ;;  %947 = vbcast.lane.b32.xlu0 %v937_v42, 272  ;;  %v3560_v42 = vrot.slane %v3559_v18, 4 }
 0x153   : > { %v8318_v24 = vpop.permute.xlu1 %673  ;;  %v8320_v47 = vpop.permute.xlu0 %669  ;;  %v8387_v9 = vadd.f32 %v3560_v42, %v3559_v18 }
 0x154   : > { %vm2297_vm0 = vcmp.eq.s32.totalorder %v8318_v24, %v7772_v44  ;;  %vm2296_vm1 = vcmp.eq.s32.totalorder %v8320_v47, %v7772_v44 }
 0x155   : > { %962 = vbcast.lane.b32.xlu1 %v952_v56, 272  ;;  %958 = vbcast.lane.b32.xlu0 %v952_v56, 264  ;;  %v6509_v56 = vsel %vm2290_vm14, 1.0, %v11091_v49  ;;  %vm2294_vm14 = vcmp.eq.s32.totalorder %v8303_v37, %v7772_v44  ;;  %v6516_v8 = vsel %vm2297_vm0, 1.0, %v11091_v49  ;;  %v6515_v50 = vsel %vm2296_vm1, 1.0, %v11091_v49 }
 0x156   : > { %v3575_v60 = vadd.f32 %v6510_v61, %v6509_v56  ;;  %vm2295_vm0 = vcmp.eq.s32.totalorder %v8301_v58, %v7772_v44  ;;  %v6513_v35 = vsel %vm2294_vm14, 1.0, %v11091_v49  ;;  %v3593_v38 = vadd.f32 %v6516_v8, %v6515_v50 }
 0x157   : > { %v8327_v14 = vpop.permute.xlu1 %684  ;;  %v8329_v20 = vpop.permute.xlu0 %677  ;;  %v3554_v58 = vadd.f32 %v3553_v7, %v8356_v54 }
 0x158   : > { %vm2298_vm12 = vcmp.eq.s32.totalorder %v8329_v20, %v7772_v44  ;;  %vm2299_vm10 = vcmp.eq.s32.totalorder %v8327_v14, %v7772_v44  ;;  %v3577_v0 = vadd.f32 %v3576_v26, %v3575_v60  ;;  %v3562_v60 = vrot.slane %v8387_v9, 2 }
 0x159   : > { %973 = vbcast.lane.b32.xlu1 %v967_v32, 264  ;;  %969 = vbcast.lane.b32.xlu0 %v967_v32, 256  ;;  %v6517_v52 = vsel %vm2298_vm12, 1.0, %v11091_v49  ;;  %v6518_v13 = vsel %vm2299_vm10, 1.0, %v11091_v49 }
 0x15a   : > { %v3594_v25 = vsel %vm3377_vm6, %v6517_v52, 0.0  ;;  %v3578_v54 = vrot.slane %v3577_v0, 4 }
 0x15b   : > { %v693_v57 = vpop.permute.xlu1 %692  ;;  %v689_v55 = vpop.permute.xlu0 %688  ;;  %v3595_v61 = vadd.f32 %v3594_v25, %v3593_v38  ;;  %v3563_v38 = vadd.f32 %v3562_v60, %v8387_v9 }
 0x15c   : > { %vm2300_vm2 = vcmp.eq.s32.totalorder %v689_v55, %v7772_v44  ;;  %vm2301_vm13 = vcmp.eq.s32.totalorder %v693_v57, %v7772_v44  ;;  %v6514_v57 = vsel %vm2295_vm0, 1.0, %v11091_v49 }
 0x15d   : > { %984 = vbcast.lane.b32.xlu1 %v982_v10, 256  ;;  %977 = vbcast.lane.b32.xlu0 %v967_v32, 272  ;;  %v6519_v47 = vsel %vm2300_vm2, 1.0, %v11091_v49  ;;  %v6520_v29 = vsel %vm2301_vm13, 1.0, %v11091_v49  ;;  %v3585_v50 = vsel %vm3377_vm6, %v6514_v57, 0.0  ;;  %v3596_v41 = vrot.slane %v3595_v61, 4 }
 0x15e   : > { %v3602_v30 = vadd.f32 %v6519_v47, %v6518_v13  ;;  %v3603_v18 = vsel %vm3377_vm6, %v6520_v29, 0.0  ;;  %v3564_v57 = vrot.slane %v3563_v38, 1 }
 0x15f   : > { %v704_v39 = vpop.permute.xlu1 %703  ;;  %v700_v46 = vpop.permute.xlu0 %699 }
 0x160   : > { %vm2303_vm15 = vcmp.eq.s32.totalorder %v704_v39, %v7772_v44  ;;  %vm2302_vm9 = vcmp.eq.s32.totalorder %v700_v46, %v7772_v44  ;;  %v3604_v56 = vadd.f32 %v3603_v18, %v3602_v30 }
 0x161   : > { %992 = vbcast.lane.b32.xlu1 %v982_v10, 272  ;;  %988 = vbcast.lane.b32.xlu0 %v982_v10, 264  ;;  %v6522_v33 = vsel %vm2303_vm15, 1.0, %v11091_v49  ;;  %v6521_v11 = vsel %vm2302_vm9, 1.0, %v11091_v49 }
 0x162   : > { %v3611_v55 = vadd.f32 %v6522_v33, %v6521_v11  ;;  %v3605_v7 = vrot.slane %v3604_v56, 4 }
 0x163   : > { %v715_v23 = vpop.permute.xlu1 %714  ;;  %v708_v24 = vpop.permute.xlu0 %707 }
 0x164   : > { %vm2304_vm8 = vcmp.eq.s32.totalorder %v708_v24, %v7772_v44  ;;  %vm2305_vm1 = vcmp.eq.s32.totalorder %v715_v23, %v7772_v44  ;;  %v3571_v23 = vrot.slane %v8394_v1, 2 }
 0x165   : > { %1003 = vbcast.lane.b32.xlu1 %v8338_v45, 264  ;;  %999 = vbcast.lane.b32.xlu0 %v8338_v45, 256  ;;  %v6523_v32 = vsel %vm2304_vm8, 1.0, %v11091_v49  ;;  %v6524_v37 = vsel %vm2305_vm1, 1.0, %v11091_v49 }
 0x166   : > { %v3612_v34 = vsel %vm3377_vm6, %v6523_v32, 0.0  ;;  %v3555_v32 = vrot.slane %v3554_v58, 1  ;;  %v3572_v33 = vadd.f32 %v3571_v23, %v8394_v1 }
 0x167   : > { %v723_v14 = vpop.permute.xlu1 %722  ;;  %v719_v20 = vpop.permute.xlu0 %718  ;;  %v3613_v8 = vadd.f32 %v3612_v34, %v3611_v55 }
 0x168   : > { %vm2307_vm2 = vcmp.eq.s32.totalorder %v723_v14, %v7772_v44  ;;  %vm2306_vm10 = vcmp.eq.s32.totalorder %v719_v20, %v7772_v44  ;;  %v3597_v14 = vadd.f32 %v3596_v41, %v3595_v61  ;;  %v3606_v20 = vadd.f32 %v3605_v7, %v3604_v56 }
 0x169   : > { %v6526_v40 = vsel %vm2307_vm2, 1.0, %v11091_v49  ;;  %v6525_v10 = vsel %vm2306_vm10, 1.0, %v11091_v49  ;;  %1014 = vbcast.lane.b32.xlu1 %v8350_v53, 256  ;;  %1007 = vbcast.lane.b32.xlu0 %v8338_v45, 272  ;;  %v3584_v45 = vadd.f32 %v6513_v35, %v6512_v43  ;;  %v3614_v13 = vrot.slane %v3613_v8, 4 }
 0x16a   : > { %v3620_v42 = vadd.f32 %v6525_v10, %v6524_v37  ;;  %v3621_v39 = vsel %vm3377_vm6, %v6526_v40, 0.0  ;;  %v3573_v61 = vrot.slane %v3572_v33, 1  ;;  %v3598_v56 = vrot.slane %v3597_v14, 2 }
 0x16b   : > { %v734_v46 = vpop.permute.xlu1 %733  ;;  %v730_v59 = vpop.permute.xlu0 %729  ;;  %v3586_v35 = vadd.f32 %v3585_v50, %v3584_v45  ;;  %v3615_v34 = vadd.f32 %v3614_v13, %v3613_v8  ;;  %v8490_v60 = vadd.f32 %v3555_v32, %v3554_v58  ;;  %v8496_v41 = vadd.f32 %v3564_v57, %v3563_v38 }
 0x16c   : > { %vm2309_vm8 = vcmp.eq.s32.totalorder %v734_v46, %v7772_v44  ;;  %vm2308_vm9 = vcmp.eq.s32.totalorder %v730_v59, %v7772_v44  ;;  %v3622_v24 = vadd.f32 %v3621_v39, %v3620_v42  ;;  %v3607_v39 = vrot.slane %v3606_v20, 2 }
 0x16d   : > { %1022 = vbcast.lane.b32.xlu1 %v8350_v53, 272  ;;  %1018 = vbcast.lane.b32.xlu0 %v8350_v53, 264  ;;  %v6528_v47 = vsel %vm2309_vm8, 1.0, %v11091_v49  ;;  %v6527_v26 = vsel %vm2308_vm9, 1.0, %v11091_v49  ;;  %v8468_v53 = vadd.f32 %v3546_v51, %v8346_v31  ;;  %v3579_v51 = vadd.f32 %v3578_v54, %v3577_v0 }
 0x16e   : > { %v3629_v30 = vadd.f32 %v6528_v47, %v6527_v26  ;;  %v3623_v11 = vrot.slane %v3622_v24, 4  ;;  %v3587_v37 = vrot.slane %v3586_v35, 4  ;;  %v3616_v8 = vrot.slane %v3615_v34, 2 }
 0x16f   : > { %v745_v52 = vpop.permute.xlu1 %744  ;;  %v738_v29 = vpop.permute.xlu0 %737  ;;  %v3580_v50 = vrot.slane %v3579_v51, 2  ;;  %v3599_v7 = vadd.f32 %v3598_v56, %v3597_v14  ;;  %v8498_v13 = vadd.f32 %v3573_v61, %v3572_v33  ;;  %vm11118_vm9 = vcmask 1045509  }
 0x170   : > { %vm2310_vm11 = vcmp.eq.s32.totalorder %v738_v29, %v7772_v44  ;;  %vm2311_vm12 = vcmp.eq.s32.totalorder %v745_v52, %v7772_v44  ;;  %v3624_v55 = vadd.f32 %v3623_v11, %v3622_v24  ;;  %v3588_v23 = vadd.f32 %v3587_v37, %v3586_v35 }
 0x171   : > { %v6529_v62 = vsel %vm2310_vm11, 1.0, %v11091_v49  ;;  %1033 = vbcast.lane.b32.xlu1 %v8354_v28, 264  ;;  %1029 = vbcast.lane.b32.xlu0 %v8354_v28, 256  ;;  %v6530_v40 = vsel %vm2311_vm12, 1.0, %v11091_v49  ;;  %v3608_v52 = vadd.f32 %v3607_v39, %v3606_v20  ;;  %v3617_v35 = vadd.f32 %v3616_v8, %v3615_v34 }
 0x172   : > { %v3630_v31 = vsel %vm3377_vm6, %v6529_v62, 0.0  ;;  %v3625_v24 = vrot.slane %v3624_v55, 2  ;;  %v3600_v14 = vrot.slane %v3599_v7, 1 }
 0x173   : > { %v3631_v25 = vadd.f32 %v3630_v31, %v3629_v30  ;;  %v753_v18 = vpop.permute.xlu1 %752  ;;  %v749_v9 = vpop.permute.xlu0 %748  ;;  %v3589_v30 = vrot.slane %v3588_v23, 2  ;;  %v3609_v20 = vrot.slane %v3608_v52, 1  ;;  %v3618_v37 = vrot.slane %v3617_v35, 1 }
 0x174   : > { %vm2313_vm13 = vcmp.eq.s32.totalorder %v753_v18, %v7772_v44  ;;  %vm2312_vm14 = vcmp.eq.s32.totalorder %v749_v9, %v7772_v44  ;;  %v3626_v38 = vadd.f32 %v3625_v24, %v3624_v55 }
 0x175   : > { %v3632_v1 = vrot.slane %v3631_v25, 4  ;;  %v6532_v10 = vsel %vm2313_vm13, 1.0, %v11091_v49  ;;  %v6531_v43 = vsel %vm2312_vm14, 1.0, %v11091_v49  ;;  %1044 = vbcast.lane.b32.xlu1 %v8360_v21, 256  ;;  %1037 = vbcast.lane.b32.xlu0 %v8354_v28, 272  ;;  %v4547_v28 = vpack.c.bf16 %v8468_v53, %v8468_v53 }
 0x176   : > { %v3639_v42 = vsel %vm3377_vm6, %v6532_v10, 0.0  ;;  %v3638_v0 = vadd.f32 %v6531_v43, %v6530_v40  ;;  %v3590_v57 = vadd.f32 %v3589_v30, %v3588_v23  ;;  %v3627_v55 = vrot.slane %v3626_v38, 1 }
 0x177   : > { %v3633_v46 = vadd.f32 %v3632_v1, %v3631_v25  ;;  %v764_v59 = vpop.permute.xlu1 %763  ;;  %v760_v45 = vpop.permute.xlu0 %759  ;;  %v3610_v56 = vadd.f32 %v3609_v20, %v3608_v52  ;;  %v5782_v8 = vunpack.c.l.b16 %v4547_v28  ;;  %v3601_v23 = vadd.f32 %v3600_v14, %v3599_v7 }
 0x178   : > { %v3640_v48 = vadd.f32 %v3639_v42, %v3638_v0  ;;  %vm2315_vm15 = vcmp.eq.s32.totalorder %v764_v59, %v7772_v44  ;;  %vm2314_vm0 = vcmp.eq.s32.totalorder %v760_v45, %v7772_v44  ;;  %v3591_v52 = vrot.slane %v3590_v57, 1 }
 0x179   : > { %1052 = vbcast.lane.b32.xlu1 %v8360_v21, 272  ;;  %1048 = vbcast.lane.b32.xlu0 %v8360_v21, 264  ;;  %v6534_v26 = vsel %vm2315_vm15, 1.0, %v11091_v49  ;;  %v6533_v54 = vsel %vm2314_vm0, 1.0, %v11091_v49  ;;  %v3634_v29 = vrot.slane %v3633_v46, 2  ;;  %v3581_v21 = vadd.f32 %v3580_v50, %v3579_v51 }
 0x17a   : > { %v3641_v47 = vrot.slane %v3640_v48, 4  ;;  %v3647_v62 = vadd.f32 %v6534_v26, %v6533_v54  ;;  %v4550_v54 = vpack.c.bf16 %v8498_v13, %v8498_v13  ;;  %v3628_v28 = vadd.f32 %v3627_v55, %v3626_v38 }
 0x17b   : > { %v775_v53 = vpop.permute.xlu1 %774  ;;  %v768_v58 = vpop.permute.xlu0 %767  ;;  %v3635_v25 = vadd.f32 %v3634_v29, %v3633_v46  ;;  %v3582_v61 = vrot.slane %v3581_v21, 1  ;;  %v5914_v7 = vsel %vm5894_vm4, %v5782_v8, %v8463_v63  ;;  %v3592_v38 = vadd.f32 %v3591_v52, %v3590_v57 }
 0x17c   : > { %v3642_v32 = vadd.f32 %v3641_v47, %v3640_v48  ;;  %vm2316_vm1 = vcmp.eq.s32.totalorder %v768_v58, %v7772_v44  ;;  %vm2317_vm2 = vcmp.eq.s32.totalorder %v775_v53, %v7772_v44  ;;  %v4548_v48 = vpack.c.bf16 %v8490_v60, %v8490_v60 }
 0x17d   : > { %v6535_v11 = vsel %vm2316_vm1, 1.0, %v11091_v49  ;;  %1063 = vbcast.lane.b32.xlu1 %v8364_v36, 264  ;;  %1059 = vbcast.lane.b32.xlu0 %v8364_v36, 256  ;;  %v6536_v40 = vsel %vm2317_vm2, 1.0, %v11091_v49  ;;  %v3636_v39 = vrot.slane %v3635_v25, 1  ;;  %v3619_v47 = vadd.f32 %v3618_v37, %v3617_v35  ;;  %vm11119_vm1 = vmmov %vm11118_vm9 }
 0x17e   : > { %v3643_v31 = vrot.slane %v3642_v32, 2  ;;  %v3648_v33 = vsel %vm3377_vm6, %v6535_v11, 0.0  ;;  %v3583_v53 = vadd.f32 %v3582_v61, %v3581_v21  ;;  %v4554_v60 = vpack.c.bf16 %v3610_v56, %v3610_v56 }
 0x17f   : > { %v3649_v18 = vadd.f32 %v3648_v33, %v3647_v62  ;;  %v783_v9 = vpop.permute.xlu1 %782  ;;  %v779_v51 = vpop.permute.xlu0 %778  ;;  %v3637_v58 = vadd.f32 %v3636_v39, %v3635_v25  ;;  %v5783_v35 = vunpack.c.l.b16 %v4548_v48  ;;  %v4555_v33 = vpack.c.bf16 %v3619_v47, %v3619_v47 }
 0x180   : > { %v3644_v34 = vadd.f32 %v3643_v31, %v3642_v32  ;;  %vm2319_vm10 = vcmp.eq.s32.totalorder %v783_v9, %v7772_v44  ;;  %vm2318_vm8 = vcmp.eq.s32.totalorder %v779_v51, %v7772_v44  ;;  %v4553_v31 = vpack.c.bf16 %v3601_v23, %v3601_v23 }
 0x181   : > { %v3650_v1 = vrot.slane %v3649_v18, 4  ;;  %v6538_v10 = vsel %vm2319_vm10, 1.0, %v11091_v49  ;;  %v6537_v43 = vsel %vm2318_vm8, 1.0, %v11091_v49  ;;  %1074 = vbcast.lane.b32.xlu1 %v8370_v17, 256  ;;  %1067 = vbcast.lane.b32.xlu0 %v8364_v36, 272  ;;  %v4549_v36 = vpack.c.bf16 %v8496_v41, %v8496_v41 }
 0x182   : > { %v3657_v42 = vsel %vm3377_vm6, %v6538_v10, 0.0  ;;  %v3656_v0 = vadd.f32 %v6537_v43, %v6536_v40  ;;  %v3645_v50 = vrot.slane %v3644_v34, 1  ;;  %v5785_v21 = vunpack.c.l.b16 %v4550_v54 }
 0x183   : > { %v3651_v46 = vadd.f32 %v3650_v1, %v3649_v18  ;;  %v8514_v59 = vpop.permute.xlu1 %793  ;;  %v8516_v45 = vpop.permute.xlu0 %789  ;;  %v4556_v14 = vpack.c.bf16 %v3628_v28, %v3628_v28  ;;  %v4551_v25 = vpack.c.bf16 %v3583_v53, %v3583_v53  ;;  %v5789_v18 = vunpack.c.l.b16 %v4554_v60 }
 0x184   : > { %v3658_v24 = vadd.f32 %v3657_v42, %v3656_v0  ;;  %v3646_v62 = vadd.f32 %v3645_v50, %v3644_v34  ;;  %v4557_v9 = vpack.c.bf16 %v3637_v58, %v3637_v58  ;;  %v5915_v34 = vsel %vm5896_vm5, %v5783_v35, %v5914_v7 }
 0x185   : > { %v3652_v26 = vrot.slane %v3651_v46, 2  ;;  %1082 = vbcast.lane.b32.xlu1 %v8370_v17, 272  ;;  %1078 = vbcast.lane.b32.xlu0 %v8370_v17, 264  ;;  %v5784_v17 = vunpack.c.l.b16 %v4549_v36  ;;  %v8535_v10 = vrot.slane %v8334_v16, %v7707_v22  ;;  %v5788_v55 = vunpack.c.l.b16 %v4553_v31 }
 0x186   : > { %v3659_v29 = vrot.slane %v3658_v24, 4  ;;  %v4558_v40 = vpack.c.bf16 %v3646_v62, %v3646_v62  ;;  %v5790_v57 = vunpack.c.l.b16 %v4555_v33  ;;  %v4552_v61 = vpack.c.bf16 %v3592_v38, %v3592_v38 }
 0x187   : > { %v3653_v32 = vadd.f32 %v3652_v26, %v3651_v46  ;;  %v8526_v30 = vpop.permute.xlu1 %804  ;;  %v798_v41 = vpop.permute.xlu0 %797  ;;  %v5916_v43 = vsel %vm5898_vm7, %v5784_v17, %v5915_v34  ;;  %v5791_v56 = vunpack.c.l.b16 %v4556_v14  ;;  %v5786_v8 = vunpack.c.l.b16 %v4551_v25  ;;  %v8595_v34 = vld [vmem:[%s7688_s23 + $0x38] sm:$0xff] }
 0x188   : > { %v3660_v11 = vadd.f32 %v3659_v29, %v3658_v24  ;;  %v5917_v0 = vsel %vm11118_vm9, %v5785_v21, %v5916_v43  ;;  %v8541_v46 = vpop.f32.mrf.mxu0  ;;  %v5920_v48 = vsel %vm5892_vm3, %v5789_v18, %v5788_v55  ;;  %v5792_v50 = vunpack.c.l.b16 %v4557_v9  ;;  %v8599_v43 = vpop.f32.mrf.mxu1 }
 0x189   : > { %v3654_v13 = vrot.slane %v3653_v32, 1  ;;  %1093 = vbcast.lane.b32.xlu1 %v8374_v4, 264  ;;  %1089 = vbcast.lane.b32.xlu0 %v8374_v4, 256  ;;  %vm2321_vm11 = vcmp.eq.s32.totalorder %v8514_v59, %v7772_v44  ;;  %v5793_v23 = vunpack.c.l.b16 %v4558_v40  ;;  %vm2322_vm12 = vcmp.eq.s32.totalorder %v798_v41, %v7772_v44  ;;  %11124 = vst [vmem:[#allocation11_spill] sm:$0xff] %v8599_v43 }
 0x18a   : > { %v3661_v20 = vrot.slane %v3660_v11, 2  ;;  %v6951_v47 = vpop.f32.mrf.mxu0  ;;  %v5921_v26 = vsel %vm5894_vm4, %v5790_v57, %v5920_v48  ;;  %vm2320_vm14 = vcmp.eq.s32.totalorder %v8516_v45, %v7772_v44  ;;  %v5787_v52 = vunpack.c.l.b16 %v4552_v61 }
 0x18b   : > { %v3655_v51 = vadd.f32 %v3654_v13, %v3653_v32  ;;  %v813_v63 = vpop.permute.xlu1 %812  ;;  %v809_v37 = vpop.permute.xlu0 %808  ;;  %v5922_v28 = vsel %vm5896_vm5, %v5791_v56, %v5921_v26  ;;  %vm2323_vm0 = vcmp.eq.s32.totalorder %v8526_v30, %v7772_v44  ;;  %v6540_v58 = vsel %vm2321_vm11, 1.0, %v11091_v49 }
 0x18c   : > { %v3662_v1 = vadd.f32 %v3661_v20, %v3660_v11  ;;  %vm2324_vm13 = vcmp.eq.s32.totalorder %v809_v37, %v7772_v44  ;;  %vm2325_vm15 = vcmp.eq.s32.totalorder %v813_v63, %v7772_v44  ;;  %v6953_v53 = vpop.f32.mrf.mxu0  ;;  %v5923_v60 = vsel %vm5898_vm7, %v5792_v50, %v5922_v28 }
 0x18d   : > { %v4559_v42 = vpack.c.bf16 %v3655_v51, %v3655_v51  ;;  %1104 = vbcast.lane.b32.xlu1 %v8384_v19, 256  ;;  %1097 = vbcast.lane.b32.xlu0 %v8374_v4, 272  ;;  %v6541_v32 = vsel %vm2322_vm12, 1.0, %v11091_v49  ;;  %v5924_v30 = vsel %vm11119_vm1, %v5793_v23, %v5923_v60  ;;  %v6539_v59 = vsel %vm2320_vm14, 1.0, %v11091_v49 }
 0x18e   : > { %v3663_v39 = vrot.slane %v3662_v1, 1  ;;  %v6544_v41 = vsel %vm2325_vm15, 1.0, %v11091_v49  ;;  %v6954_v11 = vpop.f32.mrf.mxu0  ;;  %v6542_v17 = vsel %vm2323_vm0, 1.0, %v11091_v49  ;;  %v1132_v31 = vrot.slane %v8334_v16, %v7710_v27 }
 0x18f   : > { %v8546_v24 = vpop.permute.xlu1 %823  ;;  %v8548_v36 = vpop.permute.xlu0 %819  ;;  %v5794_v54 = vunpack.c.l.b16 %v4559_v42  ;;  %vm11120_vm2 = vcmask 1046534   ;;  %v3666_v13 = vsel %vm3377_vm6, %v6541_v32, 0.0  ;;  %vm11122_vm8 = vcmask 1047559  }
 0x190   : > { %v3664_v4 = vadd.f32 %v3663_v39, %v3662_v1  ;;  %v5918_v33 = vsel %vm11120_vm2, %v5786_v8, %v5917_v0  ;;  %vm11121_vm10 = vmmov %vm11120_vm2  ;;  %v6956_v20 = vpop.f32.mrf.mxu0  ;;  %v3665_v25 = vadd.f32 %v6540_v58, %v6539_v59  ;;  %v3675_v18 = vsel %vm3377_vm6, %v6544_v41, 0.0 }
 0x191   : > { %1112 = vbcast.lane.b32.xlu1 %v8384_v19, 272  ;;  %1108 = vbcast.lane.b32.xlu0 %v8384_v19, 264  ;;  %v6543_v19 = vsel %vm2324_vm13, 1.0, %v11091_v49  ;;  %v5925_v45 = vsel %vm11121_vm10, %v5794_v54, %v5924_v30  ;;  %v5919_v38 = vsel %vm11122_vm8, %v5787_v52, %v5918_v33  ;;  %vm11123_vm9 = vmmov %vm11122_vm8  ;;  %v1147_v42 = vrot.slane %v8595_v34, %v7680_v2 }
 0x192   : > { %v4560_v29 = vpack.c.bf16 %v3664_v4, %v3664_v4  ;;  %v3674_v21 = vadd.f32 %v6543_v19, %v6542_v17  ;;  %v6957_v16 = vpop.f32.mrf.mxu0  ;;  %v3667_v37 = vadd.f32 %v3666_v13, %v3665_v25  ;;  %vm2327_vm12 = vcmp.eq.s32.totalorder %v8546_v24, %v7772_v44 }
 0x193   : > { %v8572_v7 = vpop.permute.xlu1 %834  ;;  %v828_v35 = vpop.permute.xlu0 %827  ;;  %vm2326_vm13 = vcmp.eq.s32.totalorder %v8548_v36, %v7772_v44  ;;  %v8617_v56 = vadd.f32 %v6951_v47, %v8541_v46  ;;  %v8619_v8 = vadd.f32 %v6954_v11, %v6953_v53  ;;  %v8630_v26 = vadd.f32 %v6957_v16, %v6956_v20 }
 0x194   : > { %v5795_v62 = vunpack.c.l.b16 %v4560_v29  ;;  %v3676_v40 = vadd.f32 %v3675_v18, %v3674_v21  ;;  %v8597_v1 = vpop.f32.mrf.mxu0  ;;  %vm2328_vm11 = vcmp.eq.s32.totalorder %v828_v35, %v7772_v44  ;;  %v3668_v61 = vrot.slane %v3667_v37, 4 }
 0x195   : > { %1123 = vbcast.lane.b32.xlu1 %v8535_v10, 264  ;;  %1119 = vbcast.lane.b32.xlu0 %v8535_v10, 256  ;;  %11126 = vst [vmem:[#allocation13_spill] sm:$0xff] %v8617_v56  ;;  %11127 = vst [vmem:[#allocation14_spill] sm:$0xff] %v8619_v8  ;;  %v6547_v23 = vsel %vm2328_vm11, 1.0, %v11091_v49  ;;  %v6546_v36 = vsel %vm2327_vm12, 1.0, %v11091_v49  ;;  %v1162_v28 = vrot.slane %v8595_v34, %v7690_v3 }
 0x196   : > { %v5926_v14 = vsel %vm11123_vm9, %v5795_v62, %v5925_v45  ;;  %v8608_v0 = vpop.f32.mrf.mxu0  ;;  %v3677_v39 = vrot.slane %v3676_v40, 4  ;;  %11129 = vst [vmem:[#allocation16_spill] sm:$0xff] %v8630_v26  ;;  %v6545_v46 = vsel %vm2326_vm13, 1.0, %v11091_v49  ;;  %v3669_v52 = vadd.f32 %v3668_v61, %v3667_v37 }
 0x197   : > { %v843_v9 = vpop.permute.xlu1 %842  ;;  %v839_v51 = vpop.permute.xlu0 %838  ;;  %v6012_v63 = vpack.c.b16 %v5926_v14, %v5919_v38  ;;  %v3684_v53 = vsel %vm3377_vm6, %v6547_v23, 0.0  ;;  %v3683_v32 = vadd.f32 %v6546_v36, %v6545_v46  ;;  %vm2329_vm0 = vcmp.eq.s32.totalorder %v8572_v7, %v7772_v44 }
 0x198   : > { %v8621_v48 = vpop.f32.mrf.mxu0  ;;  %vm2330_vm14 = vcmp.eq.s32.totalorder %v839_v51, %v7772_v44  ;;  %v3678_v29 = vadd.f32 %v3677_v39, %v3676_v40  ;;  %vm2331_vm15 = vcmp.eq.s32.totalorder %v843_v9, %v7772_v44  ;;  %v3670_v41 = vrot.slane %v3669_v52, 2 }
 0x199   : > { %1134 = vbcast.lane.b32.xlu1 %v1132_v31, 256  ;;  %1127 = vbcast.lane.b32.xlu0 %v8535_v10, 272  ;;  %v8610_v10 = vpop.f32.mrf.mxu1  ;;  %v6549_v30 = vsel %vm2330_vm14, 1.0, %v11091_v49  ;;  %v3685_v11 = vadd.f32 %v3684_v53, %v3683_v32  ;;  %v6550_v17 = vsel %vm2331_vm15, 1.0, %v11091_v49  ;;  %v6548_v33 = vsel %vm2329_vm0, 1.0, %v11091_v49 }
 0x19a   : > { %7159 = vmatmul.mubr.bf16.vlgmr.msra.gmra.mxu1 %v6012_v63  ;;  %11125 = vst [vmem:[#allocation12_spill] sm:$0xff] %v8610_v10  ;;  %v8634_v47 = vpop.f32.mrf.mxu0  ;;  %v3692_v13 = vadd.f32 %v6549_v30, %v6548_v33  ;;  %v3693_v14 = vsel %vm3377_vm6, %v6550_v17, 0.0  ;;  %v3671_v18 = vadd.f32 %v3670_v41, %v3669_v52  ;;  %v1177_v51 = vrot.slane %v8595_v34, %v7693_v5  ;;  %v7342_v10 = vld [vmem:[%s7665_s9 + $0x74] ss:$24 sps:$4 sm:$0xff]  }
 0x19b   : > { %v8601_v55 = vpop.permute.xlu1 %853  ;;  %v8603_v57 = vpop.permute.xlu0 %849  ;;  %v3686_v9 = vrot.slane %v3685_v11, 4  ;;  %v8683_v39 = vadd.f32 %v8608_v0, %v8597_v1  ;;  %5587 = vmatprep.mubr.bf16.mxu0 %v7342_v10 }
 0x19c   : > { %v8623_v50 = vpop.f32.mrf.mxu1  ;;  %v8643_v60 = vpop.f32.mrf.mxu0  ;;  %v3694_v40 = vadd.f32 %v3693_v14, %v3692_v13  ;;  %v3672_v46 = vrot.slane %v3671_v18, 1  ;;  %vm2333_vm1 = vcmp.eq.s32.totalorder %v8601_v55, %v7772_v44  ;;  %vm2332_vm10 = vcmp.eq.s32.totalorder %v8603_v57, %v7772_v44 }
 0x19d   : > { %1142 = vbcast.lane.b32.xlu1 %v1132_v31, 272  ;;  %1138 = vbcast.lane.b32.xlu0 %v1132_v31, 264  ;;  %11128 = vst [vmem:[#allocation15_spill] sm:$0xff] %v8623_v50  ;;  %v3679_v31 = vrot.slane %v3678_v29, 2  ;;  %11139 = vst [vmem:[#allocation26_spill] sm:$0xff] %v8683_v39  ;;  %v3687_v52 = vadd.f32 %v3686_v9, %v3685_v11  ;;  %v6552_v55 = vsel %vm2333_vm1, 1.0, %v11091_v49 }
 0x19e   : > { %v8636_v54 = vpop.f32.mrf.mxu1  ;;  %v6966_v62 = vpop.f32.mrf.mxu0  ;;  %v3695_v30 = vrot.slane %v3694_v40, 4  ;;  %v3673_v17 = vadd.f32 %v3672_v46, %v3671_v18  ;;  %v8713_v13 = vadd.f32 %v8634_v47, %v8621_v48  ;;  %v6551_v18 = vsel %vm2332_vm10, 1.0, %v11091_v49 }
 0x19f   : > { %v8626_v4 = vpop.permute.xlu1 %864  ;;  %v8628_v24 = vpop.permute.xlu0 %857  ;;  %11130 = vst [vmem:[#allocation17_spill] sm:$0xff] %v8636_v54  ;;  %v3680_v63 = vadd.f32 %v3679_v31, %v3678_v29  ;;  %v3688_v31 = vrot.slane %v3687_v52, 2  ;;  %v8727_v46 = vadd.f32 %v6966_v62, %v8643_v60  ;;  %v1207_v48 = vrot.slane %v8595_v34, %v7701_v12 }
 0x1a0   : > { %v8645_v58 = vpop.f32.mrf.mxu1  ;;  %v8658_v45 = vpop.f32.mrf.mxu0  ;;  %vm2334_vm2 = vcmp.eq.s32.totalorder %v8628_v24, %v7772_v44  ;;  %11144 = vst [vmem:[#allocation31_spill] sm:$0xff] %v8713_v13  ;;  %v3696_v9 = vadd.f32 %v3695_v30, %v3694_v40  ;;  %v8735_v47 = vrot.slane %v8595_v34, %v7703_v15  ;;  %v8739_v40 = vrot.slane %v8595_v34, %v7707_v22 }
 0x1a1   : > { %1153 = vbcast.lane.b32.xlu1 %v1147_v42, 264  ;;  %1149 = vbcast.lane.b32.xlu0 %v1147_v42, 256  ;;  %11131 = vst [vmem:[#allocation18_spill] sm:$0xff] %v8645_v58  ;;  %11133 = vst [vmem:[#allocation20_spill] sm:$0xff] %v8658_v45  ;;  %v3681_v29 = vrot.slane %v3680_v63, 1  ;;  %v6553_v24 = vsel %vm2334_vm2, 1.0, %v11091_v49  ;;  %v3689_v62 = vadd.f32 %v3688_v31, %v3687_v52 }
 0x1a2   : > { %v8654_v59 = vpop.f32.mrf.mxu1  ;;  %v8667_v20 = vpop.f32.mrf.mxu0  ;;  %11146 = vst [vmem:[#allocation33_spill] sm:$0xff] %v8727_v46  ;;  %vm2335_vm11 = vcmp.eq.s32.totalorder %v8626_v4, %v7772_v44  ;;  %v3702_v49 = vsel %vm3377_vm6, %v6553_v24, 0.0  ;;  %v8753_v46 = vrot.slane %v8595_v34, %v7710_v27  ;;  %v4561_v13 = vpack.c.bf16 %v3673_v17, %v3673_v17  ;;  %v8760_v52 = vld [vmem:[%s7688_s23 + $0x48] sm:$0xff] }
 0x1a3   : > { %v8649_v19 = vpop.permute.xlu1 %872  ;;  %v8651_v35 = vpop.permute.xlu0 %868  ;;  %11132 = vst [vmem:[#allocation19_spill] sm:$0xff] %v8654_v59  ;;  %11135 = vst [vmem:[#allocation22_spill] sm:$0xff] %v8667_v20  ;;  %v3682_v33 = vadd.f32 %v3681_v29, %v3680_v63  ;;  %v8742_v29 = vld [vmem:[%s7688_s23 + $0x40] sm:$0xff]  ;;  %v11149_v39 = vmov 0.0   ;;  %v3697_v24 = vrot.slane %v3696_v9, 2  ;;  %v8798_v4 = vrot.slane %v8760_v52, %v7680_v2 }
 0x1a4   : > { %v8660_v7 = vpop.f32.mrf.mxu1  ;;  %v8673_v16 = vpop.f32.mrf.mxu0  ;;  %vm2336_vm8 = vcmp.eq.s32.totalorder %v8651_v35, %v7772_v44  ;;  %vm2337_vm9 = vcmp.eq.s32.totalorder %v8649_v19, %v7772_v44  ;;  %11147 = vst [vmem:[#allocation34_spill] sm:$0xff] %v8742_v29  ;;  %v8778_v35 = vrot.slane %v8742_v29, %v7690_v3  ;;  %v8786_v19 = vrot.slane %v8742_v29, %v7693_v5 }
 0x1a5   : > { %1164 = vbcast.lane.b32.xlu1 %v1162_v28, 256  ;;  %1157 = vbcast.lane.b32.xlu0 %v1147_v42, 272  ;;  %11134 = vst [vmem:[#allocation21_spill] sm:$0xff] %v8660_v7  ;;  %11137 = vst [vmem:[#allocation24_spill] sm:$0xff] %v8673_v16  ;;  %v3701_v16 = vadd.f32 %v6552_v55, %v6551_v18  ;;  %v6555_v26 = vsel %vm2336_vm8, 1.0, %v11149_v39  ;;  %v6554_v55 = vsel %vm2335_vm11, 1.0, %v11149_v39 }
 0x1a6   : > { %v8669_v25 = vpop.f32.mrf.mxu1  ;;  %v8685_v23 = vpop.f32.mrf.mxu0 }
 0x1a7   : > { %v8662_v21 = vpop.permute.xlu1 %883  ;;  %v8664_v38 = vpop.permute.xlu0 %879  ;;  %11136 = vst [vmem:[#allocation23_spill] sm:$0xff] %v8669_v25  ;;  %11140 = vst [vmem:[#allocation27_spill] sm:$0xff] %v8685_v23  ;;  %v4562_v23 = vpack.c.bf16 %v3682_v33, %v3682_v33  ;;  %v8774_v33 = vrot.slane %v8742_v29, %v7680_v2  ;;  %v3703_v18 = vadd.f32 %v3702_v49, %v3701_v16  ;;  %v8804_v16 = vunpack.c.l.b16 %v4561_v13 }
 0x1a8   : > { %v8675_v37 = vpop.f32.mrf.mxu1  ;;  %v8691_v53 = vpop.f32.mrf.mxu0  ;;  %v8802_v49 = vrot.slane %v8760_v52, %v7690_v3  ;;  %vm2339_vm13 = vcmp.eq.s32.totalorder %v8662_v21, %v7772_v44  ;;  %vm2338_vm0 = vcmp.eq.s32.totalorder %v8664_v38, %v7772_v44 }
 0x1a9   : > { %1172 = vbcast.lane.b32.xlu1 %v1162_v28, 272  ;;  %1168 = vbcast.lane.b32.xlu0 %v1162_v28, 264  ;;  %11138 = vst [vmem:[#allocation25_spill] sm:$0xff] %v8675_v37  ;;  %v1192_v28 = vrot.slane %v8595_v34, %v7695_v6  ;;  %v6556_v34 = vsel %vm2337_vm9, 1.0, %v11149_v39  ;;  %v6558_v25 = vsel %vm2339_vm13, 1.0, %v11149_v39  ;;  %v6557_v21 = vsel %vm2338_vm0, 1.0, %v11149_v39 }
 0x1aa   : > { %v8687_v36 = vpop.f32.mrf.mxu1  ;;  %v8705_v41 = vpop.f32.mrf.mxu0  ;;  %v3711_v37 = vsel %vm3377_vm6, %v6556_v34, 0.0  ;;  %v3704_v34 = vrot.slane %v3703_v18, 4 }
 0x1ab   : > { %v8677_v42 = vpop.permute.xlu1 %894  ;;  %v8679_v61 = vpop.permute.xlu0 %887  ;;  %11141 = vst [vmem:[#allocation28_spill] sm:$0xff] %v8687_v36  ;;  %v8806_v36 = vunpack.c.l.b16 %v4562_v23  ;;  %v8872_v7 = vadd.f32 %v8705_v41, %v8691_v53 }
 0x1ac   : > { %v8693_v32 = vpop.f32.mrf.mxu1  ;;  %v8715_v14 = vpop.f32.mrf.mxu0  ;;  %vm2340_vm1 = vcmp.eq.s32.totalorder %v8679_v61, %v7772_v44  ;;  %vm2341_vm8 = vcmp.eq.s32.totalorder %v8677_v42, %v7772_v44  ;;  %v8875_v38 = vadd.f32 %v3704_v34, %v3703_v18  ;;  %v3719_v18 = vadd.f32 %v6558_v25, %v6557_v21 }
 0x1ad   : > { %1183 = vbcast.lane.b32.xlu1 %v1177_v51, 264  ;;  %1179 = vbcast.lane.b32.xlu0 %v1177_v51, 256  ;;  %11142 = vst [vmem:[#allocation29_spill] sm:$0xff] %v8693_v32  ;;  %v3710_v32 = vadd.f32 %v6555_v26, %v6554_v55  ;;  %v8814_v55 = vadd.f32 %v3697_v24, %v3696_v9  ;;  %v6560_v53 = vsel %vm2341_vm8, 1.0, %v11149_v39 }
 0x1ae   : > { %v8707_v11 = vpop.f32.mrf.mxu1  ;;  %v8744_v30 = vpop.f32.mrf.mxu0 }
 0x1af   : > { %v8699_v1 = vpop.permute.xlu1 %902  ;;  %v8701_v0 = vpop.permute.xlu0 %898  ;;  %11143 = vst [vmem:[#allocation30_spill] sm:$0xff] %v8707_v11  ;;  %v3690_v11 = vrot.slane %v3689_v62, 1  ;;  %v3712_v45 = vadd.f32 %v3711_v37, %v3710_v32  ;;  %v8902_v25 = vadd.f32 %v8744_v30, %v8715_v14 }
 0x1b0   : > { %v8717_v57 = vpop.f32.mrf.mxu1  ;;  %v8762_v31 = vpop.f32.mrf.mxu0  ;;  %vm2342_vm2 = vcmp.eq.s32.totalorder %v8701_v0, %v7772_v44  ;;  %vm2343_vm10 = vcmp.eq.s32.totalorder %v8699_v1, %v7772_v44 }
 0x1b1   : > { %1194 = vbcast.lane.b32.xlu1 %v1192_v28, 256  ;;  %1187 = vbcast.lane.b32.xlu0 %v1177_v51, 272  ;;  %11145 = vst [vmem:[#allocation32_spill] sm:$0xff] %v8717_v57  ;;  %v8832_v20 = vadd.f32 %v3690_v11, %v3689_v62  ;;  %v6562_v61 = vsel %vm2343_vm10, 1.0, %v11149_v39  ;;  %v3713_v0 = vrot.slane %v3712_v45, 4 }
 0x1b2   : > { %v8746_v60 = vpop.f32.mrf.mxu1  ;;  %v3729_v42 = vsel %vm3377_vm6, %v6562_v61, 0.0 }
 0x1b3   : > { %v8722_v51 = vpop.permute.xlu1 %913  ;;  %v8724_v63 = vpop.permute.xlu0 %909  ;;  %11148 = vst [vmem:[#allocation35_spill] sm:$0xff] %v8746_v60 }
 0x1b4   : > { %v8764_v8 = vpop.f32.mrf.mxu1  ;;  %v8792_v60 = vpop.f32.mrf.mxu0  ;;  %vm2345_vm14 = vcmp.eq.s32.totalorder %v8722_v51, %v7772_v44  ;;  %vm2344_vm15 = vcmp.eq.s32.totalorder %v8724_v63, %v7772_v44  ;;  %v6559_v51 = vsel %vm2340_vm1, 1.0, %v11149_v39  ;;  %v6561_v63 = vsel %vm2342_vm2, 1.0, %v11149_v39 }
 0x1b5   : > { %1202 = vbcast.lane.b32.xlu1 %v1192_v28, 272  ;;  %1198 = vbcast.lane.b32.xlu0 %v1192_v28, 264  ;;  %11150 = vst [vmem:[#allocation36_spill] sm:$0xff] %v8764_v8  ;;  %v8790_v8 = vrot.slane %v8742_v29, %v7695_v6  ;;  %v6564_v37 = vsel %vm2345_vm14, 1.0, %v11149_v39  ;;  %v6563_v32 = vsel %vm2344_vm15, 1.0, %v11149_v39  ;;  %v3720_v1 = vsel %vm3377_vm6, %v6559_v51, 0.0 }
 0x1b6   : > { %v8794_v57 = vpop.f32.mrf.mxu1  ;;  %v3737_v41 = vadd.f32 %v6564_v37, %v6563_v32  ;;  %v3728_v34 = vadd.f32 %v6561_v63, %v6560_v53  ;;  %v3706_v51 = vrot.slane %v8875_v38, 2  ;;  %v8911_v63 = vadd.f32 %v3713_v0, %v3712_v45 }
 0x1b7   : > { %v8770_v28 = vpop.permute.xlu1 %924  ;;  %v918_v17 = vpop.permute.xlu0 %917  ;;  %11151 = vst [vmem:[#allocation37_spill] sm:$0xff] %v8794_v57 }
 0x1b8   : > { %vm2346_vm12 = vcmp.eq.s32.totalorder %v918_v17, %v7772_v44  ;;  %v8810_v57 = vpop.f32.mrf.mxu0  ;;  %v8812_v26 = vpop.f32.mrf.mxu1  ;;  %v3730_v30 = vadd.f32 %v3729_v42, %v3728_v34 }
 0x1b9   : > { %1213 = vbcast.lane.b32.xlu1 %v1207_v48, 264  ;;  %1209 = vbcast.lane.b32.xlu0 %v1207_v48, 256  ;;  %v6565_v56 = vsel %vm2346_vm12, 1.0, %v11149_v39  ;;  %vm2347_vm12 = vcmp.eq.s32.totalorder %v8770_v28, %v7772_v44 }
 0x1ba   : > { %v8828_v9 = vpop.f32.mrf.mxu0  ;;  %v8830_v24 = vpop.f32.mrf.mxu1  ;;  %v3738_v58 = vsel %vm3377_vm6, %v6565_v56, 0.0  ;;  %v6566_v61 = vsel %vm2347_vm12, 1.0, %v11149_v39  ;;  %v3731_v29 = vrot.slane %v3730_v30, 4 }
 0x1bb   : > { %v933_v23 = vpop.permute.xlu1 %932  ;;  %v929_v13 = vpop.permute.xlu0 %928 }
 0x1bc   : > { %v8854_v11 = vpop.f32.mrf.mxu0  ;;  %vm2348_vm9 = vcmp.eq.s32.totalorder %v929_v13, %v7772_v44  ;;  %vm2349_vm11 = vcmp.eq.s32.totalorder %v933_v23, %v7772_v44  ;;  %v3739_v13 = vadd.f32 %v3738_v58, %v3737_v41  ;;  %v8913_v58 = vadd.f32 %v3720_v1, %v3719_v18 }
 0x1bd   : > { %1224 = vbcast.lane.b32.xlu1 %v8735_v47, 256  ;;  %1217 = vbcast.lane.b32.xlu0 %v1207_v48, 272  ;;  %v8856_v48 = vpop.f32.mrf.mxu1  ;;  %v6568_v14 = vsel %vm2349_vm11, 1.0, %v11149_v39 }
 0x1be   : > { %v8893_v56 = vpop.f32.mrf.mxu0  ;;  %v3740_v41 = vrot.slane %v3739_v13, 4  ;;  %v3747_v42 = vsel %vm3377_vm6, %v6568_v14, 0.0 }
 0x1bf   : > { %v944_v62 = vpop.permute.xlu1 %943  ;;  %v940_v17 = vpop.permute.xlu0 %939 }
 0x1c0   : > { %v8882_v54 = vpop.f32.mrf.mxu1  ;;  %vm2351_vm13 = vcmp.eq.s32.totalorder %v944_v62, %v7772_v44  ;;  %vm2350_vm14 = vcmp.eq.s32.totalorder %v940_v17, %v7772_v44  ;;  %v6989_v0 = vpop.f32.mrf.mxu0 }
 0x1c1   : > { %1232 = vbcast.lane.b32.xlu1 %v8735_v47, 272  ;;  %1228 = vbcast.lane.b32.xlu0 %v8735_v47, 264  ;;  %v6567_v47 = vsel %vm2348_vm9, 1.0, %v11149_v39  ;;  %v6570_v18 = vsel %vm2351_vm13, 1.0, %v11149_v39  ;;  %v6569_v1 = vsel %vm2350_vm14, 1.0, %v11149_v39 }
 0x1c2   : > { %v8895_v59 = vpop.f32.mrf.mxu1  ;;  %v3746_v23 = vadd.f32 %v6567_v47, %v6566_v61  ;;  %v7040_v61 = vadd.f32 %v8830_v24, %v8812_v26 }
 0x1c3   : > { %v955_v37 = vpop.permute.xlu1 %954  ;;  %v948_v32 = vpop.permute.xlu0 %947 }
 0x1c4   : > { %vm2352_vm15 = vcmp.eq.s32.totalorder %v948_v32, %v7772_v44  ;;  %v8908_v21 = vpop.f32.mrf.mxu1  ;;  %vm2353_vm0 = vcmp.eq.s32.totalorder %v955_v37, %v7772_v44  ;;  %v8939_v37 = vadd.f32 %v8792_v60, %v8762_v31  ;;  %v3722_v60 = vrot.slane %v8913_v58, 4 }
 0x1c5   : > { %1243 = vbcast.lane.b32.xlu1 %v8739_v40, 264  ;;  %1239 = vbcast.lane.b32.xlu0 %v8739_v40, 256  ;;  %v6571_v45 = vsel %vm2352_vm15, 1.0, %v11149_v39  ;;  %v6572_v32 = vsel %vm2353_vm0, 1.0, %v11149_v39  ;;  %v3755_v31 = vadd.f32 %v6570_v18, %v6569_v1  ;;  %v3748_v43 = vadd.f32 %v3747_v42, %v3746_v23 }
 0x1c6   : > { %v8926_v53 = vpop.f32.mrf.mxu1  ;;  %v3756_v17 = vsel %vm3377_vm6, %v6571_v45, 0.0  ;;  %v7344_v45 = vld [vmem:[%s7665_s9 + $0x70] ss:$24 sps:$4 sm:$0xff]   ;;  %v11152_v23 = vrot.slane %v8814_v55, 1  ;;  %v8971_v42 = vadd.f32 %v3706_v51, %v8875_v38  ;;  %v8981_v26 = vadd.f32 %v7040_v61, %v8872_v7  ;;  %v7347_v61 = vld [vmem:[%s7665_s9 + $0xa0] ss:$24 sps:$4 sm:$0xff]  }
 0x1c7   : > { %v963_v34 = vpop.permute.xlu1 %962  ;;  %v959_v28 = vpop.permute.xlu0 %958  ;;  %v3757_v18 = vadd.f32 %v3756_v17, %v3755_v31  ;;  %5588 = vmatmul.mubr.bf16.gmra.mxu0 %v7344_v45  ;;  %v3749_v38 = vrot.slane %v3748_v43, 4  ;;  %v8996_v7 = vadd.f32 %v3731_v29, %v3730_v30 }
 0x1c8   : > { %vm2355_vm1 = vcmp.eq.s32.totalorder %v963_v34, %v7772_v44  ;;  %vm2354_vm2 = vcmp.eq.s32.totalorder %v959_v28, %v7772_v44  ;;  %v8941_v62 = vpop.f32.mrf.mxu1  ;;  %v6990_v28 = vpop.f32.mrf.mxu0  ;;  %v8968_v1 = vadd.f32 %v11152_v23, %v8814_v55  ;;  %11153 = vst [vmem:[#allocation38_spill] sm:$0xff] %v8981_v26 }
 0x1c9   : > { %v6574_v47 = vsel %vm2355_vm1, 1.0, %v11149_v39  ;;  %v6573_v14 = vsel %vm2354_vm2, 1.0, %v11149_v39  ;;  %1254 = vbcast.lane.b32.xlu1 %v8753_v46, 256  ;;  %1247 = vbcast.lane.b32.xlu0 %v8739_v40, 272  ;;  %v8959_v40 = vadd.f32 %v8828_v9, %v8810_v57  ;;  %v3715_v57 = vrot.slane %v8911_v63, 2 }
 0x1ca   : > { %v3764_v34 = vadd.f32 %v6573_v14, %v6572_v32  ;;  %v8952_v50 = vpop.f32.mrf.mxu1  ;;  %v3765_v27 = vsel %vm3377_vm6, %v6574_v47, 0.0  ;;  %v8974_v9 = vadd.f32 %v3740_v41, %v3739_v13  ;;  %v6992_v55 = vpop.f32.mrf.mxu0  ;;  %v8987_v41 = vadd.f32 %v8893_v56, %v8854_v11 }
 0x1cb   : > { %v974_v22 = vpop.permute.xlu1 %973  ;;  %v970_v15 = vpop.permute.xlu0 %969  ;;  %v8994_v32 = vadd.f32 %v3722_v60, %v8913_v58  ;;  %v3758_v17 = vrot.slane %v3757_v18, 4  ;;  %v7046_v56 = vadd.f32 %v8908_v21, %v8895_v59  ;;  %v3750_v60 = vadd.f32 %v3749_v38, %v3748_v43 }
 0x1cc   : > { %vm2357_vm10 = vcmp.eq.s32.totalorder %v974_v22, %v7772_v44  ;;  %vm2356_vm8 = vcmp.eq.s32.totalorder %v970_v15, %v7772_v44  ;;  %v3766_v22 = vadd.f32 %v3765_v27, %v3764_v34  ;;  %v8983_v24 = vpop.f32.mrf.mxu1  ;;  %v7043_v27 = vadd.f32 %v8882_v54, %v8856_v48  ;;  %v6993_v58 = vpop.f32.mrf.mxu0 }
 0x1cd   : > { %1262 = vbcast.lane.b32.xlu1 %v8753_v46, 272  ;;  %1258 = vbcast.lane.b32.xlu0 %v8753_v46, 264  ;;  %v6576_v15 = vsel %vm2357_vm10, 1.0, %v11149_v39  ;;  %v6575_v10 = vsel %vm2356_vm8, 1.0, %v11149_v39  ;;  %v8991_v46 = vadd.f32 %v6990_v28, %v6989_v0  ;;  %v3742_v47 = vrot.slane %v8974_v9, 2 }
 0x1ce   : > { %v3773_v14 = vadd.f32 %v6576_v15, %v6575_v10  ;;  %v9004_v54 = vadd.f32 %v7043_v27, %v8902_v25  ;;  %v3767_v48 = vrot.slane %v3766_v22, 4  ;;  %v9010_v30 = vpop.f32.mrf.mxu1  ;;  %v7345_v0 = vld [vmem:[%s7665_s9 + $0xa4] ss:$24 sps:$4 sm:$0xff]   ;;  %v9014_v45 = vadd.f32 %v6993_v58, %v6992_v55 }
 0x1cf   : > { %v985_v51 = vpop.permute.xlu1 %984  ;;  %v978_v13 = vpop.permute.xlu0 %977  ;;  %v7049_v25 = vadd.f32 %v8941_v62, %v8926_v53  ;;  %v3759_v23 = vadd.f32 %v3758_v17, %v3757_v18  ;;  %v9021_v59 = vadd.f32 %v7046_v56, %v8939_v37  ;;  %5595 = vmatprep.mubr.bf16.mxu0 %v7345_v0  ;;  %v3751_v27 = vrot.slane %v3750_v60, 2 }
 0x1d0   : > { %vm2358_vm9 = vcmp.eq.s32.totalorder %v978_v13, %v7772_v44  ;;  %11154 = vst [vmem:[#allocation39_spill] sm:$0xff] %v9004_v54  ;;  %vm2359_vm11 = vcmp.eq.s32.totalorder %v985_v51, %v7772_v44  ;;  %v3768_v53 = vadd.f32 %v3767_v48, %v3766_v22  ;;  %v6995_v37 = vpop.f32.mrf.mxu0  ;;  %v9034_v38 = vpop.f32.mrf.mxu1  ;;  %5596 = vmatmul.mubr.bf16.gmra.mxu0 %v7347_v61  ;;  %v3724_v13 = vrot.slane %v8994_v32, 2 }
 0x1d1   : > { %v6577_v11 = vsel %vm2358_vm9, 1.0, %v11149_v39  ;;  %1273 = vbcast.lane.b32.xlu1 %v8774_v33, 264  ;;  %1269 = vbcast.lane.b32.xlu0 %v8774_v33, 256  ;;  %11155 = vst [vmem:[#allocation40_spill] sm:$0xff] %v9021_v59  ;;  %v6578_v43 = vsel %vm2359_vm11, 1.0, %v11149_v39  ;;  %v9032_v55 = vadd.f32 %v7049_v25, %v8959_v40  ;;  %v4564_v51 = vpack.c.bf16 %v8968_v1, %v8968_v1 }
 0x1d2   : > { %v3774_v29 = vsel %vm3377_vm6, %v6577_v11, 0.0  ;;  %v3760_v22 = vrot.slane %v3759_v23, 2  ;;  %v3708_v40 = vrot.slane %v8971_v42, 1  ;;  %v9045_v48 = vadd.f32 %v3715_v57, %v8911_v63 }
 0x1d3   : > { %v3775_v31 = vadd.f32 %v3774_v29, %v3773_v14  ;;  %v993_v34 = vpop.permute.xlu1 %992  ;;  %v989_v28 = vpop.permute.xlu0 %988  ;;  %11156 = vst [vmem:[#allocation41_spill] sm:$0xff] %v9032_v55  ;;  %v3733_v29 = vrot.slane %v8996_v7, 2  ;;  %v9049_v56 = vadd.f32 %v3742_v47, %v8974_v9  ;;  %v3769_v58 = vrot.slane %v3768_v53, 2 }
 0x1d4   : > { %vm2361_vm12 = vcmp.eq.s32.totalorder %v993_v34, %v7772_v44  ;;  %vm2360_vm13 = vcmp.eq.s32.totalorder %v989_v28, %v7772_v44  ;;  %v6996_v34 = vpop.f32.mrf.mxu0  ;;  %v7056_v28 = vpop.f32.mrf.mxu1  ;;  %v3752_v25 = vadd.f32 %v3751_v27, %v3750_v60  ;;  %v7052_v9 = vadd.f32 %v8983_v24, %v8952_v50 }
 0x1d5   : > { %v3776_v21 = vrot.slane %v3775_v31, 4  ;;  %v6580_v15 = vsel %vm2361_vm12, 1.0, %v11149_v39  ;;  %v6579_v10 = vsel %vm2360_vm13, 1.0, %v11149_v39  ;;  %1284 = vbcast.lane.b32.xlu1 %v8778_v35, 256  ;;  %1277 = vbcast.lane.b32.xlu0 %v8774_v33, 272  ;;  %v9060_v47 = vadd.f32 %v3724_v13, %v8994_v32 }
 0x1d6   : > { %v3783_v62 = vsel %vm3377_vm6, %v6580_v15, 0.0  ;;  %v3782_v18 = vadd.f32 %v6579_v10, %v6578_v43  ;;  %v9064_v10 = vadd.f32 %v3733_v29, %v8996_v7  ;;  %v3770_v50 = vadd.f32 %v3769_v58, %v3768_v53 }
 0x1d7   : > { %v3777_v17 = vadd.f32 %v3776_v21, %v3775_v31  ;;  %v1004_v14 = vpop.permute.xlu1 %1003  ;;  %v1000_v33 = vpop.permute.xlu0 %999  ;;  %v9055_v21 = vadd.f32 %v6996_v34, %v6995_v37  ;;  %v3744_v7 = vrot.slane %v9049_v56, 1  ;;  %v3753_v37 = vrot.slane %v3752_v25, 1 }
 0x1d8   : > { %v3784_v11 = vadd.f32 %v3783_v62, %v3782_v18  ;;  %vm2363_vm14 = vcmp.eq.s32.totalorder %v1004_v14, %v7772_v44  ;;  %vm2362_vm15 = vcmp.eq.s32.totalorder %v1000_v33, %v7772_v44  ;;  %v9070_v18 = vadd.f32 %v7052_v9, %v8987_v41 }
 0x1d9   : > { %1292 = vbcast.lane.b32.xlu1 %v8778_v35, 272  ;;  %1288 = vbcast.lane.b32.xlu0 %v8778_v35, 264  ;;  %v6582_v61 = vsel %vm2363_vm14, 1.0, %v11149_v39  ;;  %v6581_v31 = vsel %vm2362_vm15, 1.0, %v11149_v39  ;;  %v3778_v63 = vrot.slane %v3777_v17, 2  ;;  %v3761_v35 = vadd.f32 %v3760_v22, %v3759_v23  ;;  %v7057_v23 = vpop.f32.mrf.mxu1 }
 0x1da   : > { %v3785_v0 = vrot.slane %v3784_v11, 4  ;;  %v3791_v62 = vadd.f32 %v6582_v61, %v6581_v31  ;;  %11157 = vst [vmem:[#allocation42_spill] sm:$0xff] %v9070_v18  ;;  %v7055_v31 = vadd.f32 %v9034_v38, %v9010_v30  ;;  %v3735_v30 = vrot.slane %v9064_v10, 1 }
 0x1db   : > { %v1015_v57 = vpop.permute.xlu1 %1014  ;;  %v1008_v43 = vpop.permute.xlu0 %1007  ;;  %v3779_v13 = vadd.f32 %v3778_v63, %v3777_v17  ;;  %v3762_v22 = vrot.slane %v3761_v35, 1  ;;  %v3771_v17 = vrot.slane %v3770_v50, 1  ;;  %v9086_v63 = vadd.f32 %v3708_v40, %v8971_v42 }
 0x1dc   : > { %v3786_v15 = vadd.f32 %v3785_v0, %v3784_v11  ;;  %vm2364_vm0 = vcmp.eq.s32.totalorder %v1008_v43, %v7772_v44  ;;  %vm2365_vm1 = vcmp.eq.s32.totalorder %v1015_v57, %v7772_v44  ;;  %v7059_v34 = vpop.f32.mrf.mxu1  ;;  %v3745_v42 = vadd.f32 %v3744_v7, %v9049_v56 }
 0x1dd   : > { %v6583_v60 = vsel %vm2364_vm0, 1.0, %v11149_v39  ;;  %1303 = vbcast.lane.b32.xlu1 %v8786_v19, 264  ;;  %1299 = vbcast.lane.b32.xlu0 %v8786_v19, 256  ;;  %v6584_v41 = vsel %vm2365_vm1, 1.0, %v11149_v39  ;;  %v3780_v57 = vrot.slane %v3779_v13, 1  ;;  %v3763_v38 = vadd.f32 %v3762_v22, %v3761_v35 }
 0x1de   : > { %v3787_v24 = vrot.slane %v3786_v15, 2  ;;  %v3792_v32 = vsel %vm3377_vm6, %v6583_v60, 0.0  ;;  %v3754_v60 = vadd.f32 %v3753_v37, %v3752_v25  ;;  %v3772_v40 = vadd.f32 %v3771_v17, %v3770_v50  ;;  %v7060_v25 = vpop.f32.mrf.mxu1 }
 0x1df   : > { %v3793_v27 = vadd.f32 %v3792_v32, %v3791_v62  ;;  %v1023_v14 = vpop.permute.xlu1 %1022  ;;  %v1019_v33 = vpop.permute.xlu0 %1018  ;;  %v7058_v62 = vadd.f32 %v7057_v23, %v7056_v28  ;;  %v9099_v28 = vadd.f32 %v7055_v31, %v8991_v46  ;;  %v3781_v23 = vadd.f32 %v3780_v57, %v3779_v13 }
 0x1e0   : > { %v3788_v11 = vadd.f32 %v3787_v24, %v3786_v15  ;;  %vm2367_vm2 = vcmp.eq.s32.totalorder %v1023_v14, %v7772_v44  ;;  %vm2366_vm10 = vcmp.eq.s32.totalorder %v1019_v33, %v7772_v44  ;;  %v3726_v14 = vrot.slane %v9060_v47, 1 }
 0x1e1   : > { %v3794_v53 = vrot.slane %v3793_v27, 4  ;;  %v6586_v29 = vsel %vm2367_vm2, 1.0, %v11149_v39  ;;  %v6585_v58 = vsel %vm2366_vm10, 1.0, %v11149_v39  ;;  %1314 = vbcast.lane.b32.xlu1 %v8790_v8, 256  ;;  %1307 = vbcast.lane.b32.xlu0 %v8786_v19, 272  ;;  %v3717_v19 = vrot.slane %v9045_v48, 1 }
 0x1e2   : > { %v3801_v0 = vsel %vm3377_vm6, %v6586_v29, 0.0  ;;  %v3800_v61 = vadd.f32 %v6585_v58, %v6584_v41  ;;  %v3789_v24 = vrot.slane %v3788_v11, 1  ;;  %11158 = vst [vmem:[#allocation43_spill] sm:$0xff] %v9099_v28  ;;  %v9106_v35 = vadd.f32 %v7058_v62, %v9014_v45 }
 0x1e3   : > { %v3795_v43 = vadd.f32 %v3794_v53, %v3793_v27  ;;  %v9088_v9 = vpop.permute.xlu1 %1033  ;;  %v9090_v15 = vpop.permute.xlu0 %1029  ;;  %v7061_v22 = vadd.f32 %v7060_v25, %v7059_v34  ;;  %v4570_v29 = vpack.c.bf16 %v3754_v60, %v3754_v60  ;;  %v3727_v7 = vadd.f32 %v3726_v14, %v9060_v47 }
 0x1e4   : > { %v3802_v32 = vadd.f32 %v3801_v0, %v3800_v61  ;;  %11159 = vst [vmem:[#allocation44_spill] sm:$0xff] %v9106_v35  ;;  %v3790_v56 = vadd.f32 %v3789_v24, %v3788_v11  ;;  %v4571_v46 = vpack.c.bf16 %v3763_v38, %v3763_v38  ;;  %v4569_v17 = vpack.c.bf16 %v3745_v42, %v3745_v42 }
 0x1e5   : > { %v3796_v33 = vrot.slane %v3795_v43, 2  ;;  %1322 = vbcast.lane.b32.xlu1 %v8790_v8, 272  ;;  %1318 = vbcast.lane.b32.xlu0 %v8790_v8, 264  ;;  %v3718_v8 = vadd.f32 %v3717_v19, %v9045_v48  ;;  %v9113_v13 = vadd.f32 %v7061_v22, %v9055_v21  ;;  %v4572_v45 = vpack.c.bf16 %v3772_v40, %v3772_v40 }
 0x1e6   : > { %v3803_v27 = vrot.slane %v3802_v32, 4  ;;  %v3736_v61 = vadd.f32 %v3735_v30, %v9064_v10  ;;  %v11161_v48 = vpack.c.bf16 %v8832_v20, %v8832_v20  ;;  %v4565_v47 = vpack.c.bf16 %v9086_v63, %v9086_v63 }
 0x1e7   : > { %v3797_v37 = vadd.f32 %v3796_v33, %v3795_v43  ;;  %v9101_v41 = vpop.permute.xlu1 %1044  ;;  %v9103_v53 = vpop.permute.xlu0 %1037  ;;  %11160 = vst [vmem:[#allocation45_spill] sm:$0xff] %v9113_v13  ;;  %v4573_v31 = vpack.c.bf16 %v3781_v23, %v3781_v23  ;;  %v4566_v21 = vpack.c.bf16 %v3718_v8, %v3718_v8  ;;  %v5805_v62 = vunpack.c.l.b16 %v4570_v29 }
 0x1e8   : > { %v3804_v50 = vadd.f32 %v3803_v27, %v3802_v32  ;;  %v5798_v11 = vunpack.c.l.b16 %v11161_v48  ;;  %v4574_v19 = vpack.c.bf16 %v3790_v56, %v3790_v56  ;;  %v5799_v10 = vunpack.c.l.b16 %v4564_v51  ;;  %v9147_v56 = vld [vmem:[%s7688_s23 + $0x50] sm:$0xff] }
 0x1e9   : > { %v3798_v58 = vrot.slane %v3797_v37, 1  ;;  %1393 = vbcast.lane.b32.xlu1 %v8798_v4, 264  ;;  %1389 = vbcast.lane.b32.xlu0 %v8798_v4, 256  ;;  %v4567_v24 = vpack.c.bf16 %v3727_v7, %v3727_v7  ;;  %v5806_v20 = vunpack.c.l.b16 %v4571_v46  ;;  %v5804_v63 = vunpack.c.l.b16 %v4569_v17 }
 0x1ea   : > { %v3805_v0 = vrot.slane %v3804_v50, 2  ;;  %v5807_v14 = vunpack.c.l.b16 %v4572_v45  ;;  %v4568_v38 = vpack.c.bf16 %v3736_v61, %v3736_v61  ;;  %v5927_v33 = vsel %vm5892_vm3, %v8806_v36, %v8804_v16 }
 0x1eb   : > { %v3799_v34 = vadd.f32 %v3798_v58, %v3797_v37  ;;  %v9121_v57 = vpop.permute.xlu1 %1052  ;;  %v9123_v43 = vpop.permute.xlu0 %1048  ;;  %v5800_v42 = vunpack.c.l.b16 %v4565_v47  ;;  %v5808_v40 = vunpack.c.l.b16 %v4573_v31  ;;  %v9139_v27 = vrot.slane %v8760_v52, %v7693_v5 }
 0x1ec   : > { %v3806_v60 = vadd.f32 %v3805_v0, %v3804_v50  ;;  %v5801_v25 = vunpack.c.l.b16 %v4566_v21  ;;  %v5934_v23 = vsel %vm5892_vm3, %v5805_v62, %v5804_v63  ;;  %v5809_v37 = vunpack.c.l.b16 %v4574_v19 }
 0x1ed   : > { %v4575_v32 = vpack.c.bf16 %v3799_v34, %v3799_v34  ;;  %1408 = vbcast.lane.b32.xlu1 %v8802_v49, 264  ;;  %1404 = vbcast.lane.b32.xlu0 %v8802_v49, 256  ;;  %v5802_v36 = vunpack.c.l.b16 %v4567_v24  ;;  %v5928_v8 = vsel %vm5894_vm4, %v5798_v11, %v5927_v33  ;;  %v5935_v29 = vsel %vm5894_vm4, %v5806_v20, %v5934_v23  ;;  %v9188_v24 = vld [vmem:[%s7688_s23 + $0x58] sm:$0xff] }
 0x1ee   : > { %v3807_v30 = vrot.slane %v3806_v60, 1  ;;  %v5803_v7 = vunpack.c.l.b16 %v4568_v38  ;;  %v5929_v46 = vsel %vm5896_vm5, %v5799_v10, %v5928_v8  ;;  %v5936_v58 = vsel %vm5896_vm5, %v5807_v14, %v5935_v29 }
 0x1ef   : > { %v9133_v1 = vpop.permute.xlu1 %1063  ;;  %v9135_v51 = vpop.permute.xlu0 %1059  ;;  %v5810_v16 = vunpack.c.l.b16 %v4575_v32  ;;  %vm11162_vm8 = vcmask 1045509   ;;  %v9163_v11 = vrot.slane %v9147_v56, %v7680_v2  ;;  %vm11164_vm11 = vcmask 1046534  }
 0x1f0   : > { %v3808_v22 = vadd.f32 %v3807_v30, %v3806_v60  ;;  %vm11163_vm9 = vmmov %vm11162_vm8  ;;  %vm11166_vm13 = vcmask 1047559   ;;  %vm2370_vm15 = vcmp.eq.s32.totalorder %v9103_v53, %v7772_v44  ;;  %vm2369_vm0 = vcmp.eq.s32.totalorder %v9088_v9, %v7772_v44 }
 0x1f1   : > { %1412 = vbcast.lane.b32.xlu1 %v8802_v49, 272  ;;  %1397 = vbcast.lane.b32.xlu0 %v8798_v4, 272  ;;  %v5930_v4 = vsel %vm5898_vm7, %v5800_v42, %v5929_v46  ;;  %v5937_v49 = vsel %vm5898_vm7, %v5808_v40, %v5936_v58  ;;  %vm11165_vm12 = vmmov %vm11164_vm11  ;;  %vm2368_vm1 = vcmp.eq.s32.totalorder %v9090_v15, %v7772_v44  ;;  %v6589_v53 = vsel %vm2370_vm15, 1.0, %v11149_v39 }
 0x1f2   : > { %v4576_v50 = vpack.c.bf16 %v3808_v22, %v3808_v22  ;;  %v5931_v61 = vsel %vm11162_vm8, %v5801_v25, %v5930_v4  ;;  %v5938_v48 = vsel %vm11163_vm9, %v5809_v37, %v5937_v49  ;;  %vm11167_vm14 = vmmov %vm11166_vm13  ;;  %v9183_v10 = vrot.slane %v9147_v56, %v7690_v3 }
 0x1f3   : > { %v9151_v17 = vpop.permute.xlu1 %1074  ;;  %v9153_v45 = vpop.permute.xlu0 %1067  ;;  %v5932_v47 = vsel %vm11164_vm11, %v5802_v36, %v5931_v61  ;;  %v5939_v31 = vsel %vm11165_vm12, %v5810_v16, %v5938_v48  ;;  %vm2372_vm2 = vcmp.eq.s32.totalorder %v9123_v43, %v7772_v44  ;;  %vm2373_vm10 = vcmp.eq.s32.totalorder %v9121_v57, %v7772_v44 }
 0x1f4   : > { %v5811_v0 = vunpack.c.l.b16 %v4576_v50  ;;  %v5933_v34 = vsel %vm11166_vm13, %v5803_v7, %v5932_v47  ;;  %v6588_v20 = vsel %vm2369_vm0, 1.0, %v11149_v39  ;;  %v6587_v32 = vsel %vm2368_vm1, 1.0, %v11149_v39 }
 0x1f5   : > { %1423 = vbcast.lane.b32.xlu1 %v9139_v27, 264  ;;  %1419 = vbcast.lane.b32.xlu0 %v9139_v27, 256  ;;  %vm2371_vm8 = vcmp.eq.s32.totalorder %v9101_v41, %v7772_v44  ;;  %v6591_v43 = vsel %vm2372_vm2, 1.0, %v11149_v39  ;;  %v1627_v57 = vrot.slane %v9188_v24, %v7680_v2  ;;  %v3810_v63 = vsel %vm3377_vm6, %v6589_v53, 0.0 }
 0x1f6   : > { %v5940_v21 = vsel %vm11167_vm14, %v5811_v0, %v5939_v31  ;;  %v6592_v14 = vsel %vm2373_vm10, 1.0, %v11149_v39  ;;  %v3809_v30 = vadd.f32 %v6588_v20, %v6587_v32  ;;  %v6590_v38 = vsel %vm2371_vm8, 1.0, %v11149_v39 }
 0x1f7   : > { %v9169_v62 = vpop.permute.xlu1 %1082  ;;  %v9171_v19 = vpop.permute.xlu0 %1078  ;;  %v6013_v60 = vpack.c.b16 %v5940_v21, %v5933_v34  ;;  %v3818_v41 = vadd.f32 %v6591_v43, %v6590_v38  ;;  %v3819_v25 = vsel %vm3377_vm6, %v6592_v14, 0.0  ;;  %v9216_v23 = vrot.slane %v9188_v24, %v7690_v3 }
 0x1f8   : > { %v3811_v40 = vadd.f32 %v3810_v63, %v3809_v30  ;;  %v9226_v8 = vrot.slane %v8760_v52, %v7695_v6  ;;  %vm2376_vm9 = vcmp.eq.s32.totalorder %v9153_v45, %v7772_v44  ;;  %vm2375_vm11 = vcmp.eq.s32.totalorder %v9133_v1, %v7772_v44  ;;  %v11168_v30 = vld [vmem:[#allocation34_spill] sm:$0xff] }
 0x1f9   : > { %1513 = vbcast.lane.b32.xlu1 %v9163_v11, 264  ;;  %1509 = vbcast.lane.b32.xlu0 %v9163_v11, 256  ;;  %v3820_v36 = vadd.f32 %v3819_v25, %v3818_v41  ;;  %vm2374_vm12 = vcmp.eq.s32.totalorder %v9135_v51, %v7772_v44  ;;  %v6595_v0 = vsel %vm2376_vm9, 1.0, %v11149_v39  ;;  %v6594_v45 = vsel %vm2375_vm11, 1.0, %v11149_v39 }
 0x1fa   : > { %7162 = vmatprep.mubr.bf16.mxu1 %v6013_v60  ;;  %v3812_v16 = vrot.slane %v3811_v40, 4  ;;  %v6593_v48 = vsel %vm2374_vm12, 1.0, %v11149_v39  ;;  %v9251_v1 = vrot.slane %v9147_v56, %v7693_v5  ;;  %vm2378_vm13 = vcmp.eq.s32.totalorder %v9171_v19, %v7772_v44 }
 0x1fb   : > { %v9193_v9 = vpop.permute.xlu1 %1093  ;;  %v9195_v15 = vpop.permute.xlu0 %1089  ;;  %v3821_v7 = vrot.slane %v3820_v36, 4  ;;  %v3828_v51 = vsel %vm3377_vm6, %v6595_v0, 0.0  ;;  %vm2379_vm14 = vcmp.eq.s32.totalorder %v9169_v62, %v7772_v44  ;;  %vm2377_vm15 = vcmp.eq.s32.totalorder %v9151_v17, %v7772_v44 }
 0x1fc   : > { %v3813_v46 = vadd.f32 %v3812_v16, %v3811_v40  ;;  %v6597_v21 = vsel %vm2378_vm13, 1.0, %v11149_v39  ;;  %v6598_v60 = vsel %vm2379_vm14, 1.0, %v11149_v39  ;;  %v6596_v62 = vsel %vm2377_vm15, 1.0, %v11149_v39 }
 0x1fd   : > { %1528 = vbcast.lane.b32.xlu1 %v9183_v10, 264  ;;  %1524 = vbcast.lane.b32.xlu0 %v9183_v10, 256  ;;  %v3822_v49 = vadd.f32 %v3821_v7, %v3820_v36  ;;  %v3836_v43 = vadd.f32 %v6597_v21, %v6596_v62  ;;  %v3837_v17 = vsel %vm3377_vm6, %v6598_v60, 0.0  ;;  %v9281_v38 = vrot.slane %v11168_v30, %v7701_v12 }
 0x1fe   : > { %v3814_v61 = vrot.slane %v3813_v46, 2  ;;  %v9285_v41 = vrot.slane %v8760_v52, %v7701_v12  ;;  %v9289_v40 = vrot.slane %v9147_v56, %v7695_v6  ;;  %vm2381_vm0 = vcmp.eq.s32.totalorder %v9193_v9, %v7772_v44 }
 0x1ff   : > { %v9209_v33 = vpop.permute.xlu1 %1104  ;;  %v9211_v42 = vpop.permute.xlu0 %1097  ;;  %v3823_v31 = vrot.slane %v3822_v49, 2  ;;  %vm2380_vm1 = vcmp.eq.s32.totalorder %v9195_v15, %v7772_v44  ;;  %v3838_v16 = vadd.f32 %v3837_v17, %v3836_v43  ;;  %v9307_v9 = vrot.slane %v9188_v24, %v7695_v6 }
 0x200   : > { %v3815_v34 = vadd.f32 %v3814_v61, %v3813_v46  ;;  %vm2382_vm2 = vcmp.eq.s32.totalorder %v9211_v42, %v7772_v44  ;;  %vm2383_vm9 = vcmp.eq.s32.totalorder %v9209_v33, %v7772_v44  ;;  %v11169_v42 = vld [vmem:[#allocation8_spill] sm:$0xff]  ;;  %v6600_v7 = vsel %vm2381_vm0, 1.0, %v11149_v39 }
 0x201   : > { %1633 = vbcast.lane.b32.xlu1 %v1627_v57, 264  ;;  %1629 = vbcast.lane.b32.xlu0 %v1627_v57, 256  ;;  %v3824_v32 = vadd.f32 %v3823_v31, %v3822_v49  ;;  %v6601_v46 = vsel %vm2382_vm2, 1.0, %v11149_v39  ;;  %v6602_v31 = vsel %vm2383_vm9, 1.0, %v11149_v39  ;;  %v9355_v43 = vrot.slane %v9147_v56, %v7701_v12 }
 0x202   : > { %v3816_v63 = vrot.slane %v3815_v34, 1 }
 0x203   : > { %v9218_v37 = vpop.permute.xlu1 %1112  ;;  %v9220_v22 = vpop.permute.xlu0 %1108  ;;  %v3825_v36 = vrot.slane %v3824_v32, 1 }
 0x204   : > { %vm2384_vm10 = vcmp.eq.s32.totalorder %v9220_v22, %v7772_v44  ;;  %vm2385_vm8 = vcmp.eq.s32.totalorder %v9218_v37, %v7772_v44  ;;  %v9309_v15 = vadd.f32 %v3816_v63, %v3815_v34  ;;  %v9317_v22 = vrot.slane %v11168_v30, %v11169_v42 }
 0x205   : > { %1648 = vbcast.lane.b32.xlu1 %v9216_v23, 264  ;;  %1644 = vbcast.lane.b32.xlu0 %v9216_v23, 256  ;;  %v6599_v37 = vsel %vm2380_vm1, 1.0, %v11149_v39  ;;  %v6603_v49 = vsel %vm2384_vm10, 1.0, %v11149_v39  ;;  %v6604_v61 = vsel %vm2385_vm8, 1.0, %v11149_v39  ;;  %v9359_v63 = vrot.slane %v9188_v24, %v7701_v12 }
 0x206   : > { %v3845_v34 = vadd.f32 %v6600_v7, %v6599_v37  ;;  %v3854_v21 = vadd.f32 %v6603_v49, %v6602_v31 }
 0x207   : > { %v9228_v29 = vpop.permute.xlu1 %1123  ;;  %v9230_v50 = vpop.permute.xlu0 %1119 }
 0x208   : > { %vm2387_vm11 = vcmp.eq.s32.totalorder %v9228_v29, %v7772_v44  ;;  %vm2386_vm12 = vcmp.eq.s32.totalorder %v9230_v50, %v7772_v44  ;;  %v3846_v29 = vsel %vm3377_vm6, %v6601_v46, 0.0  ;;  %v3855_v50 = vsel %vm3377_vm6, %v6604_v61, 0.0 }
 0x209   : > { %1434 = vbcast.lane.b32.xlu1 %v9226_v8, 256  ;;  %1427 = vbcast.lane.b32.xlu0 %v9139_v27, 272  ;;  %v6606_v33 = vsel %vm2387_vm11, 1.0, %v11149_v39 }
 0x20b   : > { %v9240_v58 = vpop.permute.xlu1 %1134  ;;  %v9242_v4 = vpop.permute.xlu0 %1127 }
 0x20c   : > { %vm2388_vm13 = vcmp.eq.s32.totalorder %v9242_v4, %v7772_v44  ;;  %vm2389_vm14 = vcmp.eq.s32.totalorder %v9240_v58, %v7772_v44  ;;  %v9365_v58 = vadd.f32 %v3846_v29, %v3845_v34 }
 0x20d   : > { %1517 = vbcast.lane.b32.xlu1 %v9163_v11, 272  ;;  %1438 = vbcast.lane.b32.xlu0 %v9226_v8, 264  ;;  %v3827_v11 = vadd.f32 %v6594_v45, %v6593_v48  ;;  %v9330_v48 = vadd.f32 %v3825_v36, %v3824_v32  ;;  %v6607_v30 = vsel %vm2388_vm13, 1.0, %v11149_v39  ;;  %v9371_v36 = vadd.f32 %v3855_v50, %v3854_v21 }
 0x20e   : > { %v6608_v37 = vsel %vm2389_vm14, 1.0, %v11149_v39  ;;  %v3864_v4 = vsel %vm3377_vm6, %v6607_v30, 0.0 }
 0x20f   : > { %v9258_v27 = vpop.permute.xlu1 %1142  ;;  %v9260_v47 = vpop.permute.xlu0 %1138  ;;  %v3829_v19 = vadd.f32 %v3828_v51, %v3827_v11  ;;  %v3839_v51 = vrot.slane %v3838_v16, 4  ;;  %v9338_v11 = vrot.slane %v8760_v52, %v11169_v42  ;;  %v4577_v52 = vpack.c.bf16 %v9309_v15, %v9309_v15 }
 0x210   : > { %vm2391_vm0 = vcmp.eq.s32.totalorder %v9258_v27, %v7772_v44  ;;  %vm2390_vm1 = vcmp.eq.s32.totalorder %v9260_v47, %v7772_v44 }
 0x211   : > { %1539 = vbcast.lane.b32.xlu1 %v9251_v1, 256  ;;  %1532 = vbcast.lane.b32.xlu0 %v9183_v10, 272  ;;  %v9277_v10 = vrot.slane %v9188_v24, %v7693_v5  ;;  %v3830_v14 = vrot.slane %v3829_v19, 4 }
 0x213   : > { %v9269_v53 = vpop.permute.xlu1 %1153  ;;  %v9271_v20 = vpop.permute.xlu0 %1149  ;;  %v9323_v0 = vadd.f32 %v3830_v14, %v3829_v19  ;;  %v6605_v19 = vsel %vm2386_vm12, 1.0, %v11149_v39  ;;  %v9363_v14 = vadd.f32 %v3839_v51, %v3838_v16 }
 0x214   : > { %v3863_v7 = vadd.f32 %v6606_v33, %v6605_v19  ;;  %vm2393_vm8 = vcmp.eq.s32.totalorder %v9269_v53, %v7772_v44  ;;  %vm2392_vm9 = vcmp.eq.s32.totalorder %v9271_v20, %v7772_v44  ;;  %v6609_v53 = vsel %vm2390_vm1, 1.0, %v11149_v39 }
 0x215   : > { %1637 = vbcast.lane.b32.xlu1 %v1627_v57, 272  ;;  %1543 = vbcast.lane.b32.xlu0 %v9251_v1, 264  ;;  %v3832_v60 = vrot.slane %v9323_v0, 2 }
 0x217   : > { %v9299_v57 = vpop.permute.xlu1 %1164  ;;  %v9301_v25 = vpop.permute.xlu0 %1157 }
 0x218   : > { %vm2394_vm2 = vcmp.eq.s32.totalorder %v9301_v25, %v7772_v44  ;;  %vm2395_vm11 = vcmp.eq.s32.totalorder %v9299_v57, %v7772_v44  ;;  %v6610_v25 = vsel %vm2391_vm0, 1.0, %v11149_v39  ;;  %v6612_v57 = vsel %vm2393_vm8, 1.0, %v11149_v39 }
 0x219   : > { %1659 = vbcast.lane.b32.xlu1 %v9277_v10, 256  ;;  %1652 = vbcast.lane.b32.xlu0 %v9216_v23, 272  ;;  %v6613_v16 = vsel %vm2394_vm2, 1.0, %v11149_v39  ;;  %v6614_v49 = vsel %vm2395_vm11, 1.0, %v11149_v39 }
 0x21a   : > { %v3882_v21 = vsel %vm3377_vm6, %v6613_v16, 0.0  ;;  %v3872_v16 = vadd.f32 %v6609_v53, %v6608_v37  ;;  %v3848_v37 = vrot.slane %v9365_v58, 4 }
 0x21b   : > { %v1173_v23 = vpop.permute.xlu1 %1172  ;;  %v1169_v45 = vpop.permute.xlu0 %1168 }
 0x21c   : > { %vm2396_vm15 = vcmp.eq.s32.totalorder %v1169_v45, %v7772_v44  ;;  %vm2397_vm10 = vcmp.eq.s32.totalorder %v1173_v23, %v7772_v44  ;;  %v6611_v23 = vsel %vm2392_vm9, 1.0, %v11149_v39 }
 0x21d   : > { %1329 = vbcast.lane.b32.xlu1 %v9281_v38, 256  ;;  %1663 = vbcast.lane.b32.xlu0 %v9277_v10, 264  ;;  %v6615_v47 = vsel %vm2396_vm15, 1.0, %v11149_v39  ;;  %v6616_v46 = vsel %vm2397_vm10, 1.0, %v11149_v39  ;;  %v3881_v30 = vadd.f32 %v6612_v57, %v6611_v23  ;;  %v3857_v57 = vrot.slane %v9371_v36, 4 }
 0x21e   : > { %v3890_v45 = vadd.f32 %v6615_v47, %v6614_v49  ;;  %v3891_v50 = vsel %vm3377_vm6, %v6616_v46, 0.0  ;;  %v3873_v47 = vsel %vm3377_vm6, %v6610_v25, 0.0  ;;  %v11170_v25 = vld [vmem:[#allocation9_spill] sm:$0xff] }
 0x21f   : > { %v1184_v62 = vpop.permute.xlu1 %1183  ;;  %v1180_v32 = vpop.permute.xlu0 %1179 }
 0x220   : > { %vm2399_vm12 = vcmp.eq.s32.totalorder %v1184_v62, %v7772_v44  ;;  %vm2398_vm13 = vcmp.eq.s32.totalorder %v1180_v32, %v7772_v44  ;;  %v3865_v32 = vadd.f32 %v3864_v4, %v3863_v7  ;;  %v3892_v46 = vadd.f32 %v3891_v50, %v3890_v45  ;;  %v9435_v4 = vld [vmem:[%s7688_s23 + $0x40] sm:$0xff] }
 0x221   : > { %1442 = vbcast.lane.b32.xlu1 %v9226_v8, 272  ;;  %1333 = vbcast.lane.b32.xlu0 %v9281_v38, 264  ;;  %v6618_v51 = vsel %vm2399_vm12, 1.0, %v11149_v39  ;;  %v6617_v31 = vsel %vm2398_vm13, 1.0, %v11149_v39  ;;  %v3841_v7 = vrot.slane %v9363_v14, 2  ;;  %v9439_v53 = vrot.slane %v9435_v4, %v11170_v25 }
 0x222   : > { %v9447_v45 = vadd.f32 %v3832_v60, %v9323_v0  ;;  %v3849_v0 = vadd.f32 %v3848_v37, %v9365_v58 }
 0x223   : > { %v1195_v8 = vpop.permute.xlu1 %1194  ;;  %v1188_v27 = vpop.permute.xlu0 %1187 }
 0x224   : > { %vm2400_vm14 = vcmp.eq.s32.totalorder %v1188_v27, %v7772_v44  ;;  %vm2401_vm15 = vcmp.eq.s32.totalorder %v1195_v8, %v7772_v44  ;;  %v3899_v8 = vadd.f32 %v6618_v51, %v6617_v31  ;;  %v3874_v51 = vadd.f32 %v3873_v47, %v3872_v16 }
 0x225   : > { %1453 = vbcast.lane.b32.xlu1 %v9285_v41, 264  ;;  %1449 = vbcast.lane.b32.xlu0 %v9285_v41, 256  ;;  %v6619_v61 = vsel %vm2400_vm14, 1.0, %v11149_v39  ;;  %v6620_v33 = vsel %vm2401_vm15, 1.0, %v11149_v39  ;;  %v3893_v31 = vrot.slane %v3892_v46, 4 }
 0x226   : > { %v3900_v20 = vsel %vm3377_vm6, %v6619_v61, 0.0 }
 0x227   : > { %v1203_v34 = vpop.permute.xlu1 %1202  ;;  %v1199_v29 = vpop.permute.xlu0 %1198  ;;  %v3901_v17 = vadd.f32 %v3900_v20, %v3899_v8 }
 0x228   : > { %vm2403_vm0 = vcmp.eq.s32.totalorder %v1203_v34, %v7772_v44  ;;  %vm2402_vm1 = vcmp.eq.s32.totalorder %v1199_v29, %v7772_v44  ;;  %v3883_v29 = vadd.f32 %v3882_v21, %v3881_v30  ;;  %v9456_v30 = vadd.f32 %v3841_v7, %v9363_v14 }
 0x229   : > { %v6622_v19 = vsel %vm2403_vm0, 1.0, %v11149_v39  ;;  %v6621_v62 = vsel %vm2402_vm1, 1.0, %v11149_v39  ;;  %1554 = vbcast.lane.b32.xlu1 %v9289_v40, 256  ;;  %1547 = vbcast.lane.b32.xlu0 %v9251_v1, 272  ;;  %v9428_v1 = vunpack.c.l.b16 %v4577_v52  ;;  %v3894_v14 = vadd.f32 %v3893_v31, %v3892_v46 }
 0x22a   : > { %v3908_v27 = vadd.f32 %v6621_v62, %v6620_v33  ;;  %v3909_v49 = vsel %vm3377_vm6, %v6622_v19, 0.0  ;;  %v11171_v33 = vpack.c.bf16 %v9330_v48, %v9330_v48  ;;  %v3884_v19 = vrot.slane %v3883_v29, 4 }
 0x22b   : > { %v1214_v61 = vpop.permute.xlu1 %1213  ;;  %v1210_v34 = vpop.permute.xlu0 %1209  ;;  %v3902_v62 = vrot.slane %v3901_v17, 4  ;;  %v3858_v48 = vadd.f32 %v3857_v57, %v9371_v36 }
 0x22c   : > { %vm2405_vm2 = vcmp.eq.s32.totalorder %v1214_v61, %v7772_v44  ;;  %vm2404_vm10 = vcmp.eq.s32.totalorder %v1210_v34, %v7772_v44  ;;  %v3910_v23 = vadd.f32 %v3909_v49, %v3908_v27  ;;  %v9452_v20 = vunpack.c.l.b16 %v11171_v33 }
 0x22d   : > { %1667 = vbcast.lane.b32.xlu1 %v9277_v10, 272  ;;  %1558 = vbcast.lane.b32.xlu0 %v9289_v40, 264  ;;  %v6624_v15 = vsel %vm2405_vm2, 1.0, %v11149_v39  ;;  %v6623_v52 = vsel %vm2404_vm10, 1.0, %v11149_v39  ;;  %v3866_v10 = vrot.slane %v3865_v32, 4  ;;  %v3875_v49 = vrot.slane %v3874_v51, 4 }
 0x22e   : > { %v3917_v60 = vadd.f32 %v6624_v15, %v6623_v52  ;;  %v3911_v27 = vrot.slane %v3910_v23, 4  ;;  %v3885_v7 = vadd.f32 %v3884_v19, %v3883_v29  ;;  %v3903_v37 = vadd.f32 %v3902_v62, %v3901_v17 }
 0x22f   : > { %v1225_v21 = vpop.permute.xlu1 %1224  ;;  %v1218_v50 = vpop.permute.xlu0 %1217  ;;  %v3867_v16 = vadd.f32 %v3866_v10, %v3865_v32  ;;  %v3850_v32 = vrot.slane %v3849_v0, 2  ;;  %v3859_v10 = vrot.slane %v3858_v48, 2  ;;  %v3876_v31 = vadd.f32 %v3875_v49, %v3874_v51 }
 0x230   : > { %vm2406_vm8 = vcmp.eq.s32.totalorder %v1218_v50, %v7772_v44  ;;  %vm2407_vm9 = vcmp.eq.s32.totalorder %v1225_v21, %v7772_v44  ;;  %v3912_v46 = vadd.f32 %v3911_v27, %v3910_v23  ;;  %v3895_v21 = vrot.slane %v3894_v14, 2 }
 0x231   : > { %v6625_v8 = vsel %vm2406_vm8, 1.0, %v11149_v39  ;;  %1678 = vbcast.lane.b32.xlu1 %v9307_v9, 264  ;;  %1674 = vbcast.lane.b32.xlu0 %v9307_v9, 256  ;;  %v6626_v15 = vsel %vm2407_vm9, 1.0, %v11149_v39  ;;  %v3904_v62 = vrot.slane %v3903_v37, 2  ;;  %v3868_v23 = vrot.slane %v3867_v16, 2 }
 0x232   : > { %v3918_v47 = vsel %vm3377_vm6, %v6625_v8, 0.0  ;;  %v3834_v8 = vrot.slane %v9447_v45, 1  ;;  %v3886_v27 = vrot.slane %v3885_v7, 2  ;;  %v3913_v51 = vrot.slane %v3912_v46, 2 }
 0x233   : > { %v3919_v61 = vadd.f32 %v3918_v47, %v3917_v60  ;;  %v1233_v34 = vpop.permute.xlu1 %1232  ;;  %v1229_v58 = vpop.permute.xlu0 %1228  ;;  %vm11172_vm10 = vcmask 1045509   ;;  %vm11174_vm9 = vcmask 1046534  }
 0x234   : > { %vm2409_vm11 = vcmp.eq.s32.totalorder %v1233_v34, %v7772_v44  ;;  %vm2408_vm12 = vcmp.eq.s32.totalorder %v1229_v58, %v7772_v44  ;;  %v3851_v34 = vadd.f32 %v3850_v32, %v3849_v0  ;;  %v3877_v58 = vrot.slane %v3876_v31, 2  ;;  %vm11173_vm8 = vmmov %vm11172_vm10 }
 0x235   : > { %v3920_v36 = vrot.slane %v3919_v61, 4  ;;  %v6628_v57 = vsel %vm2409_vm11, 1.0, %v11149_v39  ;;  %v6627_v52 = vsel %vm2408_vm12, 1.0, %v11149_v39  ;;  %1344 = vbcast.lane.b32.xlu1 %v9317_v22, 256  ;;  %1337 = vbcast.lane.b32.xlu0 %v9281_v38, 272  ;;  %v3843_v38 = vrot.slane %v9456_v30, 1  ;;  %vm11175_vm11 = vmmov %vm11174_vm9 }
 0x236   : > { %v3927_v29 = vsel %vm3377_vm6, %v6628_v57, 0.0  ;;  %v3926_v17 = vadd.f32 %v6627_v52, %v6626_v15  ;;  %v3896_v15 = vadd.f32 %v3895_v21, %v3894_v14  ;;  %v3914_v0 = vadd.f32 %v3913_v51, %v3912_v46 }
 0x237   : > { %v3921_v50 = vadd.f32 %v3920_v36, %v3919_v61  ;;  %v1244_v33 = vpop.permute.xlu1 %1243  ;;  %v1240_v19 = vpop.permute.xlu0 %1239  ;;  %vm11176_vm12 = vcmask 1047559  }
 0x238   : > { %v3928_v60 = vadd.f32 %v3927_v29, %v3926_v17  ;;  %vm2411_vm13 = vcmp.eq.s32.totalorder %v1244_v33, %v7772_v44  ;;  %vm2410_vm14 = vcmp.eq.s32.totalorder %v1240_v19, %v7772_v44  ;;  %v3860_v29 = vadd.f32 %v3859_v10, %v3858_v48 }
 0x239   : > { %1457 = vbcast.lane.b32.xlu1 %v9285_v41, 272  ;;  %1348 = vbcast.lane.b32.xlu0 %v9317_v22, 264  ;;  %v6630_v49 = vsel %vm2411_vm13, 1.0, %v11149_v39  ;;  %v6629_v61 = vsel %vm2410_vm14, 1.0, %v11149_v39  ;;  %v3922_v36 = vrot.slane %v3921_v50, 2  ;;  %v3905_v17 = vadd.f32 %v3904_v62, %v3903_v37  ;;  %vm11177_vm13 = vmmov %vm11176_vm12 }
 0x23a   : > { %v3929_v47 = vrot.slane %v3928_v60, 4  ;;  %v3869_v41 = vadd.f32 %v3868_v23, %v3867_v16  ;;  %v3887_v19 = vadd.f32 %v3886_v27, %v3885_v7  ;;  %v3935_v28 = vadd.f32 %v6630_v49, %v6629_v61 }
 0x23b   : > { %v1255_v57 = vpop.permute.xlu1 %1254  ;;  %v1248_v52 = vpop.permute.xlu0 %1247  ;;  %v3878_v48 = vadd.f32 %v3877_v58, %v3876_v31  ;;  %v3897_v37 = vrot.slane %v3896_v15, 1  ;;  %v3923_v10 = vadd.f32 %v3922_v36, %v3921_v50  ;;  %v3906_v7 = vrot.slane %v3905_v17, 1 }
 0x23c   : > { %v3930_v33 = vadd.f32 %v3929_v47, %v3928_v60  ;;  %vm2412_vm15 = vcmp.eq.s32.totalorder %v1248_v52, %v7772_v44  ;;  %vm2413_vm0 = vcmp.eq.s32.totalorder %v1255_v57, %v7772_v44  ;;  %v3835_v47 = vadd.f32 %v3834_v8, %v9447_v45 }
 0x23d   : > { %v6631_v13 = vsel %vm2412_vm15, 1.0, %v11149_v39  ;;  %1468 = vbcast.lane.b32.xlu1 %v9338_v11, 264  ;;  %1464 = vbcast.lane.b32.xlu0 %v9338_v11, 256  ;;  %v6632_v23 = vsel %vm2413_vm0, 1.0, %v11149_v39  ;;  %v3852_v49 = vrot.slane %v3851_v34, 1  ;;  %v3924_v61 = vrot.slane %v3923_v10, 1 }
 0x23e   : > { %v3931_v32 = vrot.slane %v3930_v33, 2  ;;  %v3936_v14 = vsel %vm3377_vm6, %v6631_v13, 0.0  ;;  %v3915_v13 = vrot.slane %v3914_v0, 1  ;;  %v3861_v52 = vrot.slane %v3860_v29, 1 }
 0x23f   : > { %v3937_v21 = vadd.f32 %v3936_v14, %v3935_v28  ;;  %v1263_v62 = vpop.permute.xlu1 %1262  ;;  %v1259_v16 = vpop.permute.xlu0 %1258  ;;  %v3888_v28 = vrot.slane %v3887_v19, 1  ;;  %v3879_v45 = vrot.slane %v3878_v48, 1 }
 0x240   : > { %v3932_v60 = vadd.f32 %v3931_v32, %v3930_v33  ;;  %vm2415_vm1 = vcmp.eq.s32.totalorder %v1263_v62, %v7772_v44  ;;  %vm2414_vm2 = vcmp.eq.s32.totalorder %v1259_v16, %v7772_v44  ;;  %v3898_v33 = vadd.f32 %v3897_v37, %v3896_v15 }
 0x241   : > { %v3938_v46 = vrot.slane %v3937_v21, 4  ;;  %v6634_v27 = vsel %vm2415_vm1, 1.0, %v11149_v39  ;;  %v6633_v51 = vsel %vm2414_vm2, 1.0, %v11149_v39  ;;  %1569 = vbcast.lane.b32.xlu1 %v9355_v43, 256  ;;  %1562 = vbcast.lane.b32.xlu0 %v9289_v40, 272  ;;  %v3844_v40 = vadd.f32 %v3843_v38, %v9456_v30 }
 0x242   : > { %v3945_v31 = vsel %vm3377_vm6, %v6634_v27, 0.0  ;;  %v3944_v50 = vadd.f32 %v6633_v51, %v6632_v23  ;;  %v3933_v32 = vrot.slane %v3932_v60, 1  ;;  %v3870_v62 = vrot.slane %v3869_v41, 1 }
 0x243   : > { %v3939_v58 = vadd.f32 %v3938_v46, %v3937_v21  ;;  %v9496_v36 = vpop.permute.xlu1 %1273  ;;  %v9498_v57 = vpop.permute.xlu0 %1269  ;;  %v3907_v16 = vadd.f32 %v3906_v7, %v3905_v17  ;;  %v3889_v8 = vadd.f32 %v3888_v28, %v3887_v19  ;;  %v3916_v21 = vadd.f32 %v3915_v13, %v3914_v0 }
 0x244   : > { %v3946_v14 = vadd.f32 %v3945_v31, %v3944_v50  ;;  %v4579_v46 = vpack.c.bf16 %v3835_v47, %v3835_v47  ;;  %v3853_v27 = vadd.f32 %v3852_v49, %v3851_v34  ;;  %v3925_v51 = vadd.f32 %v3924_v61, %v3923_v10 }
 0x245   : > { %v3940_v18 = vrot.slane %v3939_v58, 2  ;;  %1682 = vbcast.lane.b32.xlu1 %v9307_v9, 272  ;;  %1573 = vbcast.lane.b32.xlu0 %v9355_v43, 264  ;;  %v3862_v30 = vadd.f32 %v3861_v52, %v3860_v29  ;;  %v4586_v38 = vpack.c.bf16 %v3898_v33, %v3898_v33  ;;  %v3934_v17 = vadd.f32 %v3933_v32, %v3932_v60 }
 0x246   : > { %v3947_v23 = vrot.slane %v3946_v14, 4  ;;  %v4580_v31 = vpack.c.bf16 %v3844_v40, %v3844_v40  ;;  %v3871_v9 = vadd.f32 %v3870_v62, %v3869_v41  ;;  %v4587_v50 = vpack.c.bf16 %v3907_v16, %v3907_v16 }
 0x247   : > { %v3941_v35 = vadd.f32 %v3940_v18, %v3939_v58  ;;  %v9503_v15 = vpop.permute.xlu1 %1284  ;;  %v9505_v37 = vpop.permute.xlu0 %1277  ;;  %v4585_v19 = vpack.c.bf16 %v3889_v8, %v3889_v8  ;;  %v4588_v34 = vpack.c.bf16 %v3916_v21, %v3916_v21  ;;  %v3880_v18 = vadd.f32 %v3879_v45, %v3878_v48 }
 0x248   : > { %v3948_v7 = vadd.f32 %v3947_v23, %v3946_v14  ;;  %v5814_v10 = vunpack.c.l.b16 %v4579_v46  ;;  %v4581_v28 = vpack.c.bf16 %v3853_v27, %v3853_v27  ;;  %v4589_v13 = vpack.c.bf16 %v3925_v51, %v3925_v51  ;;  %v7425_v23 = vld [vmem:[%s7688_s23 + $0x48] sm:$0xff] }
 0x249   : > { %v3942_v54 = vrot.slane %v3941_v35, 1  ;;  %1693 = vbcast.lane.b32.xlu1 %v9359_v63, 264  ;;  %1689 = vbcast.lane.b32.xlu0 %v9359_v63, 256  ;;  %v4582_v49 = vpack.c.bf16 %v3862_v30, %v3862_v30  ;;  %v5821_v41 = vunpack.c.l.b16 %v4586_v38  ;;  %v4590_v61 = vpack.c.bf16 %v3934_v17, %v3934_v17 }
 0x24a   : > { %v3949_v0 = vrot.slane %v3948_v7, 2  ;;  %v5815_v52 = vunpack.c.l.b16 %v4580_v31  ;;  %v4583_v33 = vpack.c.bf16 %v3871_v9, %v3871_v9  ;;  %v5822_v32 = vunpack.c.l.b16 %v4587_v50 }
 0x24b   : > { %v3943_v47 = vadd.f32 %v3942_v54, %v3941_v35  ;;  %v9509_v29 = vpop.permute.xlu1 %1292  ;;  %v9511_v60 = vpop.permute.xlu0 %1288  ;;  %v5820_v48 = vunpack.c.l.b16 %v4585_v19  ;;  %v5823_v40 = vunpack.c.l.b16 %v4588_v34  ;;  %v4584_v35 = vpack.c.bf16 %v3880_v18, %v3880_v18 }
 0x24c   : > { %v3950_v58 = vadd.f32 %v3949_v0, %v3948_v7  ;;  %v5941_v62 = vsel %vm5892_vm3, %v9452_v20, %v9428_v1  ;;  %v5816_v16 = vunpack.c.l.b16 %v4581_v28  ;;  %v5824_v45 = vunpack.c.l.b16 %v4589_v13 }
 0x24d   : > { %v4591_v14 = vpack.c.bf16 %v3943_v47, %v3943_v47  ;;  %1359 = vbcast.lane.b32.xlu1 %v9439_v53, 256  ;;  %1352 = vbcast.lane.b32.xlu0 %v9317_v22, 272  ;;  %v1477_v46 = vrot.slane %v7425_v23, %v11170_v25  ;;  %v5817_v27 = vunpack.c.l.b16 %v4582_v49  ;;  %v5948_v22 = vsel %vm5892_vm3, %v5821_v41, %v5820_v48 }
 0x24e   : > { %v3951_v54 = vrot.slane %v3950_v58, 1  ;;  %v5825_v51 = vunpack.c.l.b16 %v4590_v61  ;;  %v5818_v38 = vunpack.c.l.b16 %v4583_v33  ;;  %v5942_v20 = vsel %vm5894_vm4, %v5814_v10, %v5941_v62 }
 0x24f   : > { %v9518_v8 = vpop.permute.xlu1 %1303  ;;  %v9520_v21 = vpop.permute.xlu0 %1299  ;;  %v5826_v1 = vunpack.c.l.b16 %v4591_v14  ;;  %v5949_v17 = vsel %vm5894_vm4, %v5822_v32, %v5948_v22  ;;  %v5819_v31 = vunpack.c.l.b16 %v4584_v35  ;;  %v5943_v9 = vsel %vm5896_vm5, %v5815_v52, %v5942_v20  ;;  %v11178_v35 = vld [vmem:[#allocation10_spill] sm:$0xff] }
 0x250   : > { %v3952_v30 = vadd.f32 %v3951_v54, %v3950_v58  ;;  %v5950_v50 = vsel %vm5896_vm5, %v5823_v40, %v5949_v17  ;;  %v1582_v13 = vrot.slane %v9147_v56, %v11169_v42  ;;  %v1702_v48 = vrot.slane %v9188_v24, %v11169_v42 }
 0x251   : > { %1472 = vbcast.lane.b32.xlu1 %v9338_v11, 272  ;;  %1363 = vbcast.lane.b32.xlu0 %v9439_v53, 264  ;;  %v5944_v11 = vsel %vm5898_vm7, %v5816_v16, %v5943_v9  ;;  %v5951_v0 = vsel %vm5898_vm7, %v5824_v45, %v5950_v50  ;;  %vm2420_vm14 = vcmp.eq.s32.totalorder %v9511_v60, %v7772_v44 }
 0x252   : > { %v4592_v7 = vpack.c.bf16 %v3952_v30, %v3952_v30  ;;  %v5945_v28 = vsel %vm11172_vm10, %v5817_v27, %v5944_v11  ;;  %v5952_v10 = vsel %vm11173_vm8, %v5825_v51, %v5951_v0  ;;  %v1492_v27 = vrot.slane %v7425_v23, %v11178_v35 }
 0x253   : > { %v9531_v19 = vpop.permute.xlu1 %1314  ;;  %v9533_v34 = vpop.permute.xlu0 %1307  ;;  %v5946_v47 = vsel %vm11174_vm9, %v5818_v38, %v5945_v28  ;;  %v5953_v49 = vsel %vm11175_vm11, %v5826_v1, %v5952_v10  ;;  %vm2421_vm15 = vcmp.eq.s32.totalorder %v9509_v29, %v7772_v44  ;;  %v1717_v23 = vrot.slane %v9188_v24, %v11170_v25 }
 0x254   : > { %v5827_v18 = vunpack.c.l.b16 %v4592_v7  ;;  %v5947_v41 = vsel %vm11176_vm12, %v5819_v31, %v5946_v47  ;;  %vm2419_vm0 = vcmp.eq.s32.totalorder %v9503_v15, %v7772_v44  ;;  %v6639_v1 = vsel %vm2420_vm14, 1.0, %v11149_v39 }
 0x255   : > { %1483 = vbcast.lane.b32.xlu1 %v1477_v46, 264  ;;  %1479 = vbcast.lane.b32.xlu0 %v1477_v46, 256  ;;  %vm2417_vm1 = vcmp.eq.s32.totalorder %v9496_v36, %v7772_v44  ;;  %vm2418_vm2 = vcmp.eq.s32.totalorder %v9505_v37, %v7772_v44  ;;  %v6640_v29 = vsel %vm2421_vm15, 1.0, %v11149_v39  ;;  %vm2416_vm10 = vcmp.eq.s32.totalorder %v9498_v57, %v7772_v44 }
 0x256   : > { %v5954_v61 = vsel %vm11177_vm13, %v5827_v18, %v5953_v49  ;;  %v6638_v60 = vsel %vm2419_vm0, 1.0, %v11149_v39  ;;  %v6636_v7 = vsel %vm2417_vm1, 1.0, %v11149_v39  ;;  %v6637_v31 = vsel %vm2418_vm2, 1.0, %v11149_v39 }
 0x257   : > { %v9545_v58 = vpop.permute.xlu1 %1322  ;;  %v9547_v52 = vpop.permute.xlu0 %1318  ;;  %v6014_v33 = vpack.c.b16 %v5954_v61, %v5947_v41  ;;  %v3962_v15 = vadd.f32 %v6639_v1, %v6638_v60  ;;  %v3963_v9 = vsel %vm3377_vm6, %v6640_v29, 0.0  ;;  %vm2424_vm8 = vcmp.eq.s32.totalorder %v9533_v34, %v7772_v44 }
 0x258   : > { %v6635_v57 = vsel %vm2416_vm10, 1.0, %v11149_v39  ;;  %vm2423_vm9 = vcmp.eq.s32.totalorder %v9518_v8, %v7772_v44  ;;  %vm2422_vm11 = vcmp.eq.s32.totalorder %v9520_v21, %v7772_v44  ;;  %vm2426_vm12 = vcmp.eq.s32.totalorder %v9547_v52, %v7772_v44 }
 0x259   : > { %1584 = vbcast.lane.b32.xlu1 %v1582_v13, 256  ;;  %1577 = vbcast.lane.b32.xlu0 %v9355_v43, 272  ;;  %v1372_v43 = vrot.slane %v9435_v4, %v11178_v35  ;;  %v1597_v4 = vrot.slane %v9147_v56, %v11170_v25  ;;  %vm2427_vm13 = vcmp.eq.s32.totalorder %v9545_v58, %v7772_v44  ;;  %v3954_v34 = vsel %vm3377_vm6, %v6637_v31, 0.0 }
 0x25a   : > { %7163 = vmatmul.mubr.bf16.gmra.mxu1 %v6014_v33  ;;  %v9628_v50 = vrot.slane %v9147_v56, %v11178_v35  ;;  %v3964_v11 = vadd.f32 %v3963_v9, %v3962_v15  ;;  %vm2425_vm14 = vcmp.eq.s32.totalorder %v9531_v19, %v7772_v44  ;;  %v6643_v8 = vsel %vm2424_vm8, 1.0, %v11149_v39 }
 0x25b   : > { %v9550_v32 = vpop.permute.xlu1 %1393  ;;  %v9552_v14 = vpop.permute.xlu0 %1389  ;;  %v3953_v21 = vadd.f32 %v6636_v7, %v6635_v57  ;;  %v6642_v0 = vsel %vm2423_vm9, 1.0, %v11149_v39  ;;  %v6641_v18 = vsel %vm2422_vm11, 1.0, %v11149_v39  ;;  %v6645_v28 = vsel %vm2426_vm12, 1.0, %v11149_v39 }
 0x25c   : > { %v6646_v56 = vsel %vm2427_vm13, 1.0, %v11149_v39  ;;  %v6644_v49 = vsel %vm2425_vm14, 1.0, %v11149_v39  ;;  %v3972_v19 = vsel %vm3377_vm6, %v6643_v8, 0.0  ;;  %v3965_v41 = vrot.slane %v3964_v11, 4  ;;  %v7348_v8 = vld [vmem:[%s7665_s9 + $0xd4] ss:$24 sps:$4 sm:$0xff]  }
 0x25d   : > { %1697 = vbcast.lane.b32.xlu1 %v9359_v63, 272  ;;  %1588 = vbcast.lane.b32.xlu0 %v1582_v13, 264  ;;  %v3955_v47 = vadd.f32 %v3954_v34, %v3953_v21  ;;  %v3971_v61 = vadd.f32 %v6642_v0, %v6641_v18  ;;  %v3980_v58 = vadd.f32 %v6645_v28, %v6644_v49  ;;  %v3981_v52 = vsel %vm3377_vm6, %v6646_v56, 0.0  ;;  %v7350_v21 = vld [vmem:[%s7665_s9 + $0xd0] ss:$24 sps:$4 sm:$0xff]  }
 0x25e   : > { %vm2441_vm10 = vcmp.eq.s32.totalorder %v9550_v32, %v7772_v44  ;;  %vm2440_vm8 = vcmp.eq.s32.totalorder %v9552_v14, %v7772_v44  ;;  %v3966_v1 = vadd.f32 %v3965_v41, %v3964_v11  ;;  %v9678_v11 = vld [vmem:[%s7688_s23 + $0x60] sm:$0xff]  ;;  %5603 = vmatprep.mubr.bf16.mxu0 %v7348_v8  ;;  %v9692_v41 = vld [vmem:[%s7688_s23 + $0x68] sm:$0xff] }
 0x25f   : > { %v9557_v40 = vpop.permute.xlu1 %1408  ;;  %v9559_v54 = vpop.permute.xlu0 %1404  ;;  %v6660_v14 = vsel %vm2441_vm10, 1.0, %v11149_v39  ;;  %5604 = vmatmul.mubr.bf16.gmra.mxu0 %v7350_v21 }
 0x260   : > { %vm2444_vm0 = vcmp.eq.s32.totalorder %v9557_v40, %v7772_v44  ;;  %vm2443_vm1 = vcmp.eq.s32.totalorder %v9559_v54, %v7772_v44  ;;  %v1732_v54 = vrot.slane %v9188_v24, %v11178_v35  ;;  %v3967_v0 = vrot.slane %v3966_v1, 2 }
 0x261   : > { %1708 = vbcast.lane.b32.xlu1 %v1702_v48, 264  ;;  %1704 = vbcast.lane.b32.xlu0 %v1702_v48, 256 }
 0x263   : > { %v9563_v62 = vpop.permute.xlu1 %1412  ;;  %v9565_v16 = vpop.permute.xlu0 %1397 }
 0x264   : > { %vm2445_vm15 = vcmp.eq.s32.totalorder %v9563_v62, %v7772_v44  ;;  %vm2442_vm2 = vcmp.eq.s32.totalorder %v9565_v16, %v7772_v44  ;;  %v3956_v62 = vrot.slane %v3955_v47, 4  ;;  %v3982_v16 = vadd.f32 %v3981_v52, %v3980_v58 }
 0x265   : > { %1374 = vbcast.lane.b32.xlu1 %v1372_v43, 256  ;;  %1367 = vbcast.lane.b32.xlu0 %v9439_v53, 272  ;;  %v6664_v40 = vsel %vm2445_vm15, 1.0, %v11149_v39  ;;  %v6661_v32 = vsel %vm2442_vm2, 1.0, %v11149_v39  ;;  %v3968_v52 = vadd.f32 %v3967_v0, %v3966_v1  ;;  %v9724_v1 = vrot.slane %v9678_v11, %v7693_v5 }
 0x266   : > { %v4035_v15 = vsel %vm3377_vm6, %v6664_v40, 0.0  ;;  %v4026_v31 = vsel %vm3377_vm6, %v6661_v32, 0.0  ;;  %v3957_v9 = vadd.f32 %v3956_v62, %v3955_v47  ;;  %v3983_v57 = vrot.slane %v3982_v16, 4 }
 0x267   : > { %v9568_v63 = vpop.permute.xlu1 %1423  ;;  %v9570_v45 = vpop.permute.xlu0 %1419  ;;  %v9689_v47 = vrot.slane %v9678_v11, %v7680_v2  ;;  %v9720_v32 = vrot.slane %v9692_v41, %v7690_v3 }
 0x268   : > { %v3984_v58 = vadd.f32 %v3983_v57, %v3982_v16  ;;  %vm2447_vm11 = vcmp.eq.s32.totalorder %v9568_v63, %v7772_v44  ;;  %vm2446_vm12 = vcmp.eq.s32.totalorder %v9570_v45, %v7772_v44  ;;  %v9710_v16 = vrot.slane %v9692_v41, %v7680_v2  ;;  %v7353_v57 = vld [vmem:[%s7665_s9 + $0x100] ss:$24 sps:$4 sm:$0xff]  }
 0x269   : > { %1487 = vbcast.lane.b32.xlu1 %v1477_v46, 272  ;;  %1378 = vbcast.lane.b32.xlu0 %v1372_v43, 264 }
 0x26b   : > { %v9573_v22 = vpop.permute.xlu1 %1513  ;;  %v9575_v51 = vpop.permute.xlu0 %1509 }
 0x26c   : > { %vm2465_vm14 = vcmp.eq.s32.totalorder %v9573_v22, %v7772_v44  ;;  %vm2464_vm15 = vcmp.eq.s32.totalorder %v9575_v51, %v7772_v44  ;;  %v9795_v22 = vrot.slane %v9678_v11, %v7695_v6 }
 0x26d   : > { %1498 = vbcast.lane.b32.xlu1 %v1492_v27, 264  ;;  %1494 = vbcast.lane.b32.xlu0 %v1492_v27, 256 }
 0x26f   : > { %v9579_v30 = vpop.permute.xlu1 %1528  ;;  %v9581_v53 = vpop.permute.xlu0 %1524 }
 0x270   : > { %vm2467_vm2 = vcmp.eq.s32.totalorder %v9581_v53, %v7772_v44 }
 0x271   : > { %1599 = vbcast.lane.b32.xlu1 %v1597_v4, 256  ;;  %1592 = vbcast.lane.b32.xlu0 %v1582_v13, 272 }
 0x273   : > { %v9583_v38 = vpop.permute.xlu1 %1633  ;;  %v9585_v46 = vpop.permute.xlu0 %1629 }
 0x275   : > { %1712 = vbcast.lane.b32.xlu1 %v1702_v48, 272  ;;  %1603 = vbcast.lane.b32.xlu0 %v1597_v4, 264 }
 0x277   : > { %v9596_v20 = vpop.permute.xlu1 %1648  ;;  %v9598_v17 = vpop.permute.xlu0 %1644 }
 0x279   : > { %1723 = vbcast.lane.b32.xlu1 %v1717_v23, 264  ;;  %1719 = vbcast.lane.b32.xlu0 %v1717_v23, 256 }
 0x27b   : > { %v9613_v36 = vpop.permute.xlu1 %1434  ;;  %v9615_v37 = vpop.permute.xlu0 %1427 }
 0x27c   : > { %vm2448_vm9 = vcmp.eq.s32.totalorder %v9615_v37, %v7772_v44  ;;  %v9706_v37 = vrot.slane %v9678_v11, %v7690_v3 }
 0x27d   : > { %1502 = vbcast.lane.b32.xlu1 %v1492_v27, 272  ;;  %1382 = vbcast.lane.b32.xlu0 %v1372_v43, 272  ;;  %v3973_v43 = vadd.f32 %v3972_v19, %v3971_v61  ;;  %v6663_v27 = vsel %vm2444_vm0, 1.0, %v11149_v39  ;;  %v3958_v61 = vrot.slane %v3957_v9, 2 }
 0x27f   : > { %v9637_v10 = vpop.permute.xlu1 %1517  ;;  %v9639_v13 = vpop.permute.xlu0 %1438  ;;  %v3974_v24 = vrot.slane %v3973_v43, 4 }
 0x280   : > { %vm2466_vm13 = vcmp.eq.s32.totalorder %v9637_v10, %v7772_v44 }
 0x281   : > { %1614 = vbcast.lane.b32.xlu1 %v9628_v50, 256  ;;  %1607 = vbcast.lane.b32.xlu0 %v1597_v4, 272  ;;  %v6662_v4 = vsel %vm2443_vm1, 1.0, %v11149_v39  ;;  %v3975_v49 = vadd.f32 %v3974_v24, %v3973_v43  ;;  %v3959_v24 = vadd.f32 %v3958_v61, %v3957_v9  ;;  %v9753_v61 = vld [vmem:[%s7688_s23 + $0x78] sm:$0xff]  ;;  %vm2468_vm1 = vcmp.eq.s32.totalorder %v9579_v30, %v7772_v44 }
 0x282   : > { %v4034_v7 = vadd.f32 %v6663_v27, %v6662_v4  ;;  %v9713_v27 = vld [vmem:[%s7688_s23 + $0x70] sm:$0xff]  ;;  %v6667_v4 = vsel %vm2448_vm9, 1.0, %v11149_v39  ;;  %v9770_v10 = vrot.slane %v9753_v61, %v7690_v3  ;;  %vm2488_vm9 = vcmp.eq.s32.totalorder %v9585_v46, %v7772_v44 }
 0x283   : > { %v9654_v33 = vpop.permute.xlu1 %1539  ;;  %v9656_v48 = vpop.permute.xlu0 %1532  ;;  %v3976_v40 = vrot.slane %v3975_v49, 2  ;;  %v9746_v9 = vrot.slane %v9713_v27, %v7680_v2  ;;  %v9750_v63 = vrot.slane %v9713_v27, %v7690_v3  ;;  %v4044_v26 = vsel %vm3377_vm6, %v6667_v4, 0.0 }
 0x284   : > { %v4036_v18 = vadd.f32 %v4035_v15, %v4034_v7  ;;  %v3985_v15 = vrot.slane %v3984_v58, 2  ;;  %v6666_v7 = vsel %vm2447_vm11, 1.0, %v11149_v39  ;;  %11180 = vst [vmem:[#allocation46_spill] sm:$0xff] %v9770_v10  ;;  %v6685_v4 = vsel %vm2466_vm13, 1.0, %v11149_v39 }
 0x285   : > { %1727 = vbcast.lane.b32.xlu1 %v1717_v23, 272  ;;  %1618 = vbcast.lane.b32.xlu0 %v9628_v50, 264  ;;  %v6659_v23 = vsel %vm2440_vm8, 1.0, %v11149_v39  ;;  %v3977_v45 = vadd.f32 %v3976_v40, %v3975_v49  ;;  %v9766_v49 = vrot.slane %v9753_v61, %v7680_v2  ;;  %v6684_v2 = vsel %vm2465_vm14, 1.0, %v11149_v39 }
 0x286   : > { %v4025_v34 = vadd.f32 %v6660_v14, %v6659_v23  ;;  %v4037_v43 = vrot.slane %v4036_v18, 4  ;;  %v9728_v14 = vrot.slane %v9692_v41, %v7693_v5  ;;  %v7351_v23 = vld [vmem:[%s7665_s9 + $0x104] ss:$24 sps:$4 sm:$0xff]   ;;  %v6683_v3 = vsel %vm2464_vm15, 1.0, %v11149_v39 }
 0x287   : > { %v9671_v29 = vpop.permute.xlu1 %1637  ;;  %v9673_v60 = vpop.permute.xlu0 %1543  ;;  %5611 = vmatprep.mubr.bf16.mxu0 %v7351_v23  ;;  %v3986_v23 = vadd.f32 %v3985_v15, %v3984_v58  ;;  %11179 = vst [vmem:[#allocation34_spill] sm:$0xff] %v9766_v49  ;;  %vm2469_vm0 = vcmp.eq.s32.totalorder %v9656_v48, %v7772_v44  ;;  %v9800_v48 = vrot.slane %v9692_v41, %v7695_v6 }
 0x288   : > { %v4027_v19 = vadd.f32 %v4026_v31, %v4025_v34  ;;  %v6665_v31 = vsel %vm2446_vm12, 1.0, %v11149_v39  ;;  %v3969_v34 = vrot.slane %v3968_v52, 1  ;;  %v4038_v8 = vadd.f32 %v4037_v43, %v4036_v18  ;;  %5612 = vmatmul.mubr.bf16.gmra.mxu0 %v7353_v57 }
 0x289   : > { %1738 = vbcast.lane.b32.xlu1 %v1732_v54, 264  ;;  %1734 = vbcast.lane.b32.xlu0 %v1732_v54, 256  ;;  %v4043_v18 = vadd.f32 %v6666_v7, %v6665_v31  ;;  %v3960_v43 = vrot.slane %v3959_v24, 1  ;;  %v3987_v58 = vrot.slane %v3986_v23, 1  ;;  %v4097_v57 = vadd.f32 %v6684_v2, %v6683_v3 }
 0x28a   : > { %v4039_v40 = vrot.slane %v4038_v8, 2  ;;  %vm2490_vm10 = vcmp.eq.s32.totalorder %v9671_v29, %v7772_v44  ;;  %vm2489_vm8 = vcmp.eq.s32.totalorder %v9583_v38, %v7772_v44  ;;  %v9830_v29 = vrot.slane %v9713_v27, %v7693_v5 }
 0x28b   : > { %v9682_v28 = vpop.permute.xlu1 %1659  ;;  %v9684_v56 = vpop.permute.xlu0 %1652  ;;  %v3961_v51 = vadd.f32 %v3960_v43, %v3959_v24  ;;  %v6687_v24 = vsel %vm2468_vm1, 1.0, %v11149_v39  ;;  %v6709_v38 = vsel %vm2490_vm10, 1.0, %v11149_v39  ;;  %v9835_v46 = vrot.slane %v9753_v61, %v7693_v5 }
 0x28c   : > { %v4040_v15 = vadd.f32 %v4039_v40, %v4038_v8  ;;  %v6686_v8 = vsel %vm2467_vm2, 1.0, %v11149_v39  ;;  %v6708_v3 = vsel %vm2489_vm8, 1.0, %v11149_v39  ;;  %vm2450_vm12 = vcmp.eq.s32.totalorder %v9639_v13, %v7772_v44 }
 0x28d   : > { %1742 = vbcast.lane.b32.xlu1 %v1732_v54, 272  ;;  %1622 = vbcast.lane.b32.xlu0 %v9628_v50, 272  ;;  %v4028_v54 = vrot.slane %v4027_v19, 4  ;;  %v4106_v53 = vadd.f32 %v6687_v24, %v6686_v8  ;;  %v4170_v5 = vsel %vm3377_vm6, %v6709_v38, 0.0  ;;  %vm2449_vm13 = vcmp.eq.s32.totalorder %v9613_v36, %v7772_v44 }
 0x28e   : > { %v4041_v30 = vrot.slane %v4040_v15, 1  ;;  %vm2492_vm14 = vcmp.eq.s32.totalorder %v9596_v20, %v7772_v44  ;;  %v6668_v13 = vsel %vm2449_vm13, 1.0, %v11149_v39  ;;  %vm2493_vm15 = vcmp.eq.s32.totalorder %v9684_v56, %v7772_v44 }
 0x28f   : > { %v9700_v50 = vpop.permute.xlu1 %1329  ;;  %v9702_v62 = vpop.permute.xlu0 %1663  ;;  %v4029_v55 = vadd.f32 %v4028_v54, %v4027_v19  ;;  %v3970_v19 = vadd.f32 %v3969_v34, %v3968_v52  ;;  %v4045_v54 = vadd.f32 %v4044_v26, %v4043_v18  ;;  %v3978_v26 = vrot.slane %v3977_v45, 1 }
 0x290   : > { %v4098_v52 = vsel %vm3377_vm6, %v6685_v4, 0.0  ;;  %v6688_v18 = vsel %vm2469_vm0, 1.0, %v11149_v39  ;;  %vm2491_vm0 = vcmp.eq.s32.totalorder %v9598_v17, %v7772_v44  ;;  %v9885_v36 = vrot.slane %v9713_v27, %v7695_v6 }
 0x291   : > { %1753 = vbcast.lane.b32.xlu1 %v9689_v47, 264  ;;  %1749 = vbcast.lane.b32.xlu0 %v9689_v47, 256  ;;  %v4030_v59 = vrot.slane %v4029_v55, 2  ;;  %v4046_v34 = vrot.slane %v4045_v54, 4  ;;  %v4594_v25 = vpack.c.bf16 %v3970_v19, %v3970_v19  ;;  %v3979_v43 = vadd.f32 %v3978_v26, %v3977_v45 }
 0x292   : > { %v4099_v40 = vadd.f32 %v4098_v52, %v4097_v57  ;;  %vm2470_vm1 = vcmp.eq.s32.totalorder %v9654_v33, %v7772_v44  ;;  %vm2471_vm2 = vcmp.eq.s32.totalorder %v9673_v60, %v7772_v44  ;;  %v9915_v20 = vrot.slane %v9678_v11, %v11169_v42 }
 0x293   : > { %v9740_v21 = vpop.permute.xlu1 %1442  ;;  %v9742_v0 = vpop.permute.xlu0 %1333  ;;  %v4031_v49 = vadd.f32 %v4030_v59, %v4029_v55  ;;  %v3988_v59 = vadd.f32 %v3987_v58, %v3986_v23  ;;  %v4107_v55 = vsel %vm3377_vm6, %v6688_v18, 0.0  ;;  %v4047_v45 = vadd.f32 %v4046_v34, %v4045_v54 }
 0x294   : > { %v4593_v23 = vpack.c.bf16 %v3961_v51, %v3961_v51  ;;  %v6707_v54 = vsel %vm2488_vm9, 1.0, %v11149_v39  ;;  %v4100_v26 = vrot.slane %v4099_v40, 4  ;;  %v4108_v58 = vadd.f32 %v4107_v55, %v4106_v53  ;;  %11181 = vst [vmem:[#allocation47_spill] sm:$0xff] %v9915_v20 }
 0x295   : > { %1768 = vbcast.lane.b32.xlu1 %v9706_v37, 264  ;;  %1764 = vbcast.lane.b32.xlu0 %v9706_v37, 256  ;;  %v4032_v2 = vrot.slane %v4031_v49, 1  ;;  %v5829_v52 = vunpack.c.l.b16 %v4594_v25  ;;  %v4595_v57 = vpack.c.bf16 %v3979_v43, %v3979_v43  ;;  %v4596_v51 = vpack.c.bf16 %v3988_v59, %v3988_v59 }
 0x296   : > { %vm2451_vm11 = vcmp.eq.s32.totalorder %v9740_v21, %v7772_v44  ;;  %v4042_v34 = vadd.f32 %v4041_v30, %v4040_v15  ;;  %v4048_v18 = vrot.slane %v4047_v45, 2  ;;  %v9852_v25 = vrot.slane %v9678_v11, %v7701_v12 }
 0x297   : > { %v9773_v7 = vpop.permute.xlu1 %1453  ;;  %v9775_v31 = vpop.permute.xlu0 %1449  ;;  %v4033_v55 = vadd.f32 %v4032_v2, %v4031_v49  ;;  %v4101_v21 = vadd.f32 %v4100_v26, %v4099_v40  ;;  %v4109_v15 = vrot.slane %v4108_v58, 4  ;;  %v6670_v43 = vsel %vm2451_vm11, 1.0, %v11149_v39 }
 0x298   : > { %v5830_v30 = vunpack.c.l.b16 %v4595_v57  ;;  %v6669_v49 = vsel %vm2450_vm12, 1.0, %v11149_v39  ;;  %v4602_v2 = vpack.c.bf16 %v4042_v34, %v4042_v34  ;;  %v4049_v38 = vadd.f32 %v4048_v18, %v4047_v45 }
 0x299   : > { %1873 = vbcast.lane.b32.xlu1 %v9710_v16, 264  ;;  %1869 = vbcast.lane.b32.xlu0 %v9710_v16, 256  ;;  %v4601_v26 = vpack.c.bf16 %v4033_v55, %v4033_v55  ;;  %v4102_v57 = vrot.slane %v4101_v21, 2  ;;  %v4052_v45 = vadd.f32 %v6669_v49, %v6668_v13  ;;  %vm2429_vm8 = vcmp.eq.s32.totalorder %v9742_v0, %v7772_v44 }
 0x29a   : > { %v5837_v17 = vunpack.c.l.b16 %v4602_v2  ;;  %vm2428_vm11 = vcmp.eq.s32.totalorder %v9700_v50, %v7772_v44  ;;  %v6690_v33 = vsel %vm2471_vm2, 1.0, %v11149_v39  ;;  %vm2453_vm13 = vcmp.eq.s32.totalorder %v9773_v7, %v7772_v44 }
 0x29b   : > { %v9803_v35 = vpop.permute.xlu1 %1554  ;;  %v9805_v10 = vpop.permute.xlu0 %1547 }
 0x29c   : > { %vm2472_vm9 = vcmp.eq.s32.totalorder %v9805_v10, %v7772_v44  ;;  %v6648_v10 = vsel %vm2429_vm8, 1.0, %v11149_v39 }
 0x29d   : > { %1888 = vbcast.lane.b32.xlu1 %v9720_v32, 264  ;;  %1884 = vbcast.lane.b32.xlu0 %v9720_v32, 256 }
 0x29f   : > { %v9824_v19 = vpop.permute.xlu1 %1667  ;;  %v9826_v4 = vpop.permute.xlu0 %1558 }
 0x2a1   : > { %1772 = vbcast.lane.b32.xlu1 %v9706_v37, 272  ;;  %1757 = vbcast.lane.b32.xlu0 %v9689_v47, 272  ;;  %v5828_v37 = vunpack.c.l.b16 %v4593_v23  ;;  %v4169_v47 = vadd.f32 %v6708_v3, %v6707_v54  ;;  %v5831_v23 = vunpack.c.l.b16 %v4596_v51  ;;  %v9868_v54 = vrot.slane %v9692_v41, %v7701_v12 }
 0x2a2   : > { %v4110_v51 = vadd.f32 %v4109_v15, %v4108_v58  ;;  %v6711_v15 = vsel %vm2492_vm14, 1.0, %v11149_v39  ;;  %vm2452_vm14 = vcmp.eq.s32.totalorder %v9775_v31, %v7772_v44  ;;  %v6672_v31 = vsel %vm2453_vm13, 1.0, %v11149_v39 }
 0x2a3   : > { %v9846_v24 = vpop.permute.xlu1 %1678  ;;  %v9848_v8 = vpop.permute.xlu0 %1674  ;;  %v5955_v59 = vsel %vm5892_vm3, %v5829_v52, %v5828_v37  ;;  %v4171_v53 = vadd.f32 %v4170_v5, %v4169_v47  ;;  %v4053_v52 = vsel %vm3377_vm6, %v6670_v43, 0.0  ;;  %v4050_v5 = vrot.slane %v4049_v38, 1 }
 0x2a4   : > { %v5956_v18 = vsel %vm5894_vm4, %v5830_v30, %v5955_v59  ;;  %v4054_v37 = vadd.f32 %v4053_v52, %v4052_v45  ;;  %v5836_v47 = vunpack.c.l.b16 %v4601_v26  ;;  %v6712_v43 = vsel %vm2493_vm15, 1.0, %v11149_v39 }
 0x2a5   : > { %1783 = vbcast.lane.b32.xlu1 %v9724_v1, 264  ;;  %1779 = vbcast.lane.b32.xlu0 %v9724_v1, 256  ;;  %v4172_v34 = vrot.slane %v4171_v53, 4  ;;  %v6710_v59 = vsel %vm2491_vm0, 1.0, %v11149_v39  ;;  %v4103_v30 = vadd.f32 %v4102_v57, %v4101_v21  ;;  %v4051_v56 = vadd.f32 %v4050_v5, %v4049_v38 }
 0x2a6   : > { %v4179_v21 = vsel %vm3377_vm6, %v6712_v43, 0.0  ;;  %v4178_v13 = vadd.f32 %v6711_v15, %v6710_v59  ;;  %vm2494_vm15 = vcmp.eq.s32.totalorder %v9682_v28, %v7772_v44  ;;  %vm2495_vm0 = vcmp.eq.s32.totalorder %v9702_v62, %v7772_v44 }
 0x2a7   : > { %v9864_v40 = vpop.permute.xlu1 %1344  ;;  %v1338_v3 = vpop.permute.xlu0 %1337  ;;  %v4173_v49 = vadd.f32 %v4172_v34, %v4171_v53  ;;  %v9925_v53 = vsel %vm5892_vm3, %v5837_v17, %v5836_v47  ;;  %v4104_v38 = vrot.slane %v4103_v30, 1  ;;  %v6647_v47 = vsel %vm2428_vm11, 1.0, %v11149_v39 }
 0x2a8   : > { %vm2430_vm10 = vcmp.eq.s32.totalorder %v1338_v3, %v7772_v44  ;;  %v6689_v3 = vsel %vm2470_vm1, 1.0, %v11149_v39  ;;  %v4180_v34 = vadd.f32 %v4179_v21, %v4178_v13  ;;  %v3989_v43 = vadd.f32 %v6648_v10, %v6647_v47  ;;  %v11182_v10 = vld [vmem:[#allocation34_spill] sm:$0xff] }
 0x2a9   : > { %1892 = vbcast.lane.b32.xlu1 %v9720_v32, 272  ;;  %1877 = vbcast.lane.b32.xlu0 %v9710_v16, 272  ;;  %v9892_v32 = vrot.slane %v9753_v61, %v7695_v6  ;;  %v9895_v16 = vsel %vm5896_vm5, %v5831_v23, %v5956_v18  ;;  %v4111_v6 = vrot.slane %v4110_v51, 2  ;;  %v4055_v23 = vrot.slane %v4054_v37, 4 }
 0x2aa   : > { %v6649_v57 = vsel %vm2430_vm10, 1.0, %v11149_v39  ;;  %v4174_v45 = vrot.slane %v4173_v49, 2  ;;  %v6691_v18 = vsel %vm2472_vm9, 1.0, %v11149_v39  ;;  %v4105_v0 = vadd.f32 %v4104_v38, %v4103_v30 }
 0x2ab   : > { %v1458_v58 = vpop.permute.xlu1 %1457  ;;  %v9888_v55 = vpop.permute.xlu0 %1348  ;;  %v4112_v52 = vadd.f32 %v4111_v6, %v4110_v51  ;;  %v4603_v51 = vpack.c.bf16 %v4051_v56, %v4051_v56  ;;  %v4056_v50 = vadd.f32 %v4055_v23, %v4054_v37  ;;  %v3990_v60 = vsel %vm3377_vm6, %v6649_v57, 0.0 }
 0x2ac   : > { %vm2454_vm12 = vcmp.eq.s32.totalorder %v1458_v58, %v7772_v44  ;;  %v4115_v15 = vadd.f32 %v6690_v33, %v6689_v3  ;;  %v4175_v59 = vadd.f32 %v4174_v45, %v4173_v49  ;;  %v4181_v6 = vrot.slane %v4180_v34, 4 }
 0x2ad   : > { %1903 = vbcast.lane.b32.xlu1 %v9728_v14, 264  ;;  %1899 = vbcast.lane.b32.xlu0 %v9728_v14, 256  ;;  %v4113_v37 = vrot.slane %v4112_v52, 1  ;;  %v4116_v56 = vsel %vm3377_vm6, %v6691_v18, 0.0  ;;  %v6673_v7 = vsel %vm2454_vm12, 1.0, %v11149_v39  ;;  %v4057_v21 = vrot.slane %v4056_v50, 2 }
 0x2ae   : > { %v6671_v30 = vsel %vm2452_vm14, 1.0, %v11149_v39  ;;  %v3991_v23 = vadd.f32 %v3990_v60, %v3989_v43  ;;  %v5838_v38 = vunpack.c.l.b16 %v4603_v51  ;;  %v9976_v58 = vrot.slane %v9692_v41, %v11169_v42 }
 0x2af   : > { %v9920_v2 = vpop.permute.xlu1 %1468  ;;  %v9922_v26 = vpop.permute.xlu0 %1464  ;;  %v4609_v49 = vpack.c.bf16 %v4105_v0, %v4105_v0  ;;  %v4114_v57 = vadd.f32 %v4113_v37, %v4112_v52  ;;  %v4117_v45 = vadd.f32 %v4116_v56, %v4115_v15  ;;  %v4062_v33 = vsel %vm3377_vm6, %v6673_v7, 0.0  ;;  %v11183_v37 = vld [vmem:[#allocation9_spill] sm:$0xff] }
 0x2b0   : > { %v4176_v51 = vrot.slane %v4175_v59, 1  ;;  %v4182_v18 = vadd.f32 %v4181_v6, %v4180_v34  ;;  %v4061_v47 = vadd.f32 %v6672_v31, %v6671_v30  ;;  %vm2496_vm1 = vcmp.eq.s32.totalorder %v9824_v19, %v7772_v44 }
 0x2b1   : > { %1993 = vbcast.lane.b32.xlu1 %v9746_v9, 264  ;;  %1989 = vbcast.lane.b32.xlu0 %v9746_v9, 256  ;;  %v4058_v60 = vadd.f32 %v4057_v21, %v4056_v50  ;;  %v3992_v43 = vrot.slane %v3991_v23, 4  ;;  %v9989_v52 = vrot.slane %v9713_v27, %v7701_v12  ;;  %v9993_v0 = vrot.slane %v9753_v61, %v7701_v12  ;;  %v11184_v61 = vld [vmem:[#allocation46_spill] sm:$0xff] }
 0x2b2   : > { %v6713_v34 = vsel %vm2494_vm15, 1.0, %v11149_v39  ;;  %v6714_v19 = vsel %vm2495_vm0, 1.0, %v11149_v39  ;;  %v4063_v50 = vadd.f32 %v4062_v33, %v4061_v47  ;;  %v10005_v15 = vrot.slane %v9678_v11, %v11183_v37 }
 0x2b3   : > { %v9948_v5 = vpop.permute.xlu1 %1569  ;;  %v9950_v17 = vpop.permute.xlu0 %1562  ;;  %v4610_v27 = vpack.c.bf16 %v4114_v57, %v4114_v57  ;;  %v4118_v6 = vrot.slane %v4117_v45, 4  ;;  %v6715_v12 = vsel %vm2496_vm1, 1.0, %v11149_v39  ;;  %v10012_v28 = vsel %vm5894_vm4, %v5838_v38, %v9925_v53 }
 0x2b4   : > { %v10014_v56 = vunpack.c.l.b16 %v4609_v49  ;;  %v10016_v62 = vadd.f32 %v4176_v51, %v4175_v59  ;;  %v4183_v7 = vrot.slane %v4182_v18, 2  ;;  %vm2432_vm2 = vcmp.eq.s32.totalorder %v9888_v55, %v7772_v44 }
 0x2b5   : > { %2008 = vbcast.lane.b32.xlu1 %v9750_v63, 264  ;;  %2004 = vbcast.lane.b32.xlu0 %v9750_v63, 256  ;;  %v4187_v11 = vadd.f32 %v6714_v19, %v6713_v34  ;;  %v4059_v21 = vrot.slane %v4058_v60, 1  ;;  %v3993_v31 = vadd.f32 %v3992_v43, %v3991_v23  ;;  %v10024_v33 = vrot.slane %v9692_v41, %v11183_v37 }
 0x2b6   : > { %v4188_v53 = vsel %vm3377_vm6, %v6715_v12, 0.0  ;;  %vm2431_vm10 = vcmp.eq.s32.totalorder %v9864_v40, %v7772_v44  ;;  %v4064_v59 = vrot.slane %v4063_v50, 4  ;;  %v10030_v38 = vunpack.c.l.b16 %v4610_v27 }
 0x2b7   : > { %v9966_v13 = vpop.permute.xlu1 %1682  ;;  %v9968_v3 = vpop.permute.xlu0 %1573  ;;  %v4119_v55 = vadd.f32 %v4118_v6, %v4117_v45  ;;  %v6651_v23 = vsel %vm2432_vm2, 1.0, %v11149_v39  ;;  %v4617_v41 = vpack.c.bf16 %v10016_v62, %v10016_v62  ;;  %v4184_v51 = vadd.f32 %v4183_v7, %v4182_v18 }
 0x2b8   : > { %vm2456_vm9 = vcmp.eq.s32.totalorder %v9920_v2, %v7772_v44  ;;  %vm2455_vm11 = vcmp.eq.s32.totalorder %v9922_v26, %v7772_v44  ;;  %v4189_v40 = vadd.f32 %v4188_v53, %v4187_v11  ;;  %v6650_v45 = vsel %vm2431_vm10, 1.0, %v11149_v39 }
 0x2b9   : > { %2113 = vbcast.lane.b32.xlu1 %v11182_v10, 264  ;;  %2109 = vbcast.lane.b32.xlu0 %v11182_v10, 256  ;;  %v3994_v47 = vrot.slane %v3993_v31, 2  ;;  %v4065_v27 = vadd.f32 %v4064_v59, %v4063_v50  ;;  %v3998_v6 = vadd.f32 %v6651_v23, %v6650_v45  ;;  %v4120_v18 = vrot.slane %v4119_v55, 2 }
 0x2ba   : > { %v6675_v2 = vsel %vm2456_vm9, 1.0, %v11149_v39  ;;  %v6674_v12 = vsel %vm2455_vm11, 1.0, %v11149_v39  ;;  %v4185_v7 = vrot.slane %v4184_v51, 1  ;;  %vm2474_vm13 = vcmp.eq.s32.totalorder %v9826_v4, %v7772_v44 }
 0x2bb   : > { %v9983_v20 = vpop.permute.xlu1 %1693  ;;  %v9985_v42 = vpop.permute.xlu0 %1689  ;;  %vm2475_vm14 = vcmp.eq.s32.totalorder %v9950_v17, %v7772_v44  ;;  %v4190_v50 = vrot.slane %v4189_v40, 4  ;;  %v3995_v11 = vadd.f32 %v3994_v47, %v3993_v31  ;;  %vm2499_vm15 = vcmp.eq.s32.totalorder %v9966_v13, %v7772_v44 }
 0x2bc   : > { %vm2498_vm0 = vcmp.eq.s32.totalorder %v9846_v24, %v7772_v44  ;;  %vm2497_vm1 = vcmp.eq.s32.totalorder %v9848_v8, %v7772_v44  ;;  %v4066_v53 = vrot.slane %v4065_v27, 2  ;;  %v4070_v17 = vadd.f32 %v6675_v2, %v6674_v12 }
 0x2bd   : > { %2128 = vbcast.lane.b32.xlu1 %v11184_v61, 264  ;;  %2124 = vbcast.lane.b32.xlu0 %v11184_v61, 256  ;;  %vm2473_vm2 = vcmp.eq.s32.totalorder %v9803_v35, %v7772_v44  ;;  %v4121_v31 = vadd.f32 %v4120_v18, %v4119_v55  ;;  %v6694_v13 = vsel %vm2475_vm14, 1.0, %v11149_v39  ;;  %v6693_v24 = vsel %vm2474_vm13, 1.0, %v11149_v39 }
 0x2be   : > { %v6718_v8 = vsel %vm2499_vm15, 1.0, %v11149_v39  ;;  %v4191_v45 = vadd.f32 %v4190_v50, %v4189_v40  ;;  %v6717_v47 = vsel %vm2498_vm0, 1.0, %v11149_v39  ;;  %v6716_v55 = vsel %vm2497_vm1, 1.0, %v11149_v39 }
 0x2bf   : > { %v10020_v30 = vpop.permute.xlu1 %1359  ;;  %v1353_v57 = vpop.permute.xlu0 %1352  ;;  %v6692_v4 = vsel %vm2473_vm2, 1.0, %v11149_v39  ;;  %v4067_v18 = vadd.f32 %v4066_v53, %v4065_v27  ;;  %v4125_v2 = vsel %vm3377_vm6, %v6694_v13, 0.0  ;;  %v4122_v40 = vrot.slane %v4121_v31, 1 }
 0x2c0   : > { %vm2433_vm8 = vcmp.eq.s32.totalorder %v1353_v57, %v7772_v44  ;;  %v4197_v50 = vsel %vm3377_vm6, %v6718_v8, 0.0  ;;  %vm2477_vm10 = vcmp.eq.s32.totalorder %v9968_v3, %v7772_v44  ;;  %v4192_v35 = vrot.slane %v4191_v45, 2 }
 0x2c1   : > { %v6652_v49 = vsel %vm2433_vm8, 1.0, %v11149_v39  ;;  %1794 = vbcast.lane.b32.xlu1 %v9795_v22, 256  ;;  %1787 = vbcast.lane.b32.xlu0 %v9724_v1, 272  ;;  %v4060_v1 = vadd.f32 %v4059_v21, %v4058_v60  ;;  %vm2476_vm9 = vcmp.eq.s32.totalorder %v9948_v5, %v7772_v44  ;;  %v6696_v13 = vsel %vm2477_vm10, 1.0, %v11149_v39 }
 0x2c2   : > { %v3999_v43 = vsel %vm3377_vm6, %v6652_v49, 0.0  ;;  %vm2500_vm13 = vcmp.eq.s32.totalorder %v9985_v42, %v7772_v44  ;;  %vm2434_vm14 = vcmp.eq.s32.totalorder %v10020_v30, %v7772_v44 }
 0x2c3   : > { %v1473_v34 = vpop.permute.xlu1 %1472  ;;  %v10044_v19 = vpop.permute.xlu0 %1363  ;;  %v4000_v60 = vadd.f32 %v3999_v43, %v3998_v6  ;;  %v4604_v59 = vpack.c.bf16 %v4060_v1, %v4060_v1  ;;  %v3996_v43 = vrot.slane %v3995_v11, 1  ;;  %v10081_v6 = vadd.f32 %v4185_v7, %v4184_v51 }
 0x2c4   : > { %vm2457_vm12 = vcmp.eq.s32.totalorder %v1473_v34, %v7772_v44  ;;  %vm2435_vm11 = vcmp.eq.s32.totalorder %v10044_v19, %v7772_v44 }
 0x2c5   : > { %v6676_v26 = vsel %vm2457_vm12, 1.0, %v11149_v39  ;;  %1907 = vbcast.lane.b32.xlu1 %v9728_v14, 272  ;;  %1798 = vbcast.lane.b32.xlu0 %v9795_v22, 264  ;;  %v4001_v23 = vrot.slane %v4000_v60, 4  ;;  %v5839_v12 = vunpack.c.l.b16 %v4604_v59  ;;  %vm2501_vm12 = vcmp.eq.s32.totalorder %v9983_v20, %v7772_v44 }
 0x2c6   : > { %v4071_v21 = vsel %vm3377_vm6, %v6676_v26, 0.0  ;;  %v4124_v26 = vadd.f32 %v6693_v24, %v6692_v4  ;;  %v6720_v20 = vsel %vm2501_vm12, 1.0, %v11149_v39 }
 0x2c7   : > { %v10059_v57 = vpop.permute.xlu1 %1483  ;;  %v10061_v14 = vpop.permute.xlu0 %1479  ;;  %v4072_v49 = vadd.f32 %v4071_v21, %v4070_v17  ;;  %v4196_v21 = vadd.f32 %v6717_v47, %v6716_v55  ;;  %v4002_v51 = vadd.f32 %v4001_v23, %v4000_v60  ;;  %v3997_v17 = vadd.f32 %v3996_v43, %v3995_v11 }
 0x2c8   : > { %v4126_v27 = vadd.f32 %v4125_v2, %v4124_v26  ;;  %v4618_v60 = vpack.c.bf16 %v10081_v6, %v10081_v6  ;;  %v10105_v11 = vadd.f32 %v4122_v40, %v4121_v31  ;;  %v10112_v62 = vsel %vm5896_vm5, %v5839_v12, %v10012_v28 }
 0x2c9   : > { %1918 = vbcast.lane.b32.xlu1 %v9800_v48, 264  ;;  %1914 = vbcast.lane.b32.xlu0 %v9800_v48, 256  ;;  %v4073_v7 = vrot.slane %v4072_v49, 4  ;;  %v4198_v3 = vadd.f32 %v4197_v50, %v4196_v21  ;;  %v10119_v31 = vadd.f32 %v4192_v35, %v4191_v45  ;;  %v4597_v8 = vpack.c.bf16 %v3997_v17, %v3997_v17 }
 0x2ca   : > { %v6695_v23 = vsel %vm2476_vm9, 1.0, %v11149_v39  ;;  %v4127_v47 = vrot.slane %v4126_v27, 4  ;;  %v6654_v45 = vsel %vm2435_vm11, 1.0, %v11149_v39  ;;  %vm2459_vm15 = vcmp.eq.s32.totalorder %v10059_v57, %v7772_v44 }
 0x2cb   : > { %v10079_v34 = vpop.permute.xlu1 %1584  ;;  %v1578_v1 = vpop.permute.xlu0 %1577  ;;  %v4074_v24 = vadd.f32 %v4073_v7, %v4072_v49  ;;  %v4199_v49 = vrot.slane %v4198_v3, 4  ;;  %v4133_v19 = vadd.f32 %v6696_v13, %v6695_v23  ;;  %vm2458_vm0 = vcmp.eq.s32.totalorder %v10061_v14, %v7772_v44 }
 0x2cc   : > { %vm2478_vm8 = vcmp.eq.s32.totalorder %v1578_v1, %v7772_v44  ;;  %v4128_v42 = vadd.f32 %v4127_v47, %v4126_v27  ;;  %v6719_v2 = vsel %vm2500_vm13, 1.0, %v11149_v39  ;;  %v6678_v26 = vsel %vm2459_vm15, 1.0, %v11149_v39 }
 0x2cd   : > { %2012 = vbcast.lane.b32.xlu1 %v9750_v63, 272  ;;  %1997 = vbcast.lane.b32.xlu0 %v9746_v9, 272  ;;  %v10099_v63 = vunpack.c.l.b16 %v4617_v41  ;;  %v4068_v9 = vrot.slane %v4067_v18, 1  ;;  %v4003_v41 = vrot.slane %v4002_v51, 2  ;;  %v6697_v5 = vsel %vm2478_vm8, 1.0, %v11149_v39 }
 0x2ce   : > { %v4134_v1 = vsel %vm3377_vm6, %v6697_v5, 0.0  ;;  %v4200_v40 = vadd.f32 %v4199_v49, %v4198_v3  ;;  %v6677_v50 = vsel %vm2458_vm0, 1.0, %v11149_v39  ;;  %v4194_v17 = vrot.slane %v10119_v31, 1 }
 0x2cf   : > { %v1698_v53 = vpop.permute.xlu1 %1697  ;;  %v10094_v59 = vpop.permute.xlu0 %1588  ;;  %v10126_v28 = vadd.f32 %v4068_v9, %v4067_v18  ;;  %v4004_v4 = vadd.f32 %v4003_v41, %v4002_v51  ;;  %v4075_v18 = vrot.slane %v4074_v24, 2  ;;  %v4135_v57 = vadd.f32 %v4134_v1, %v4133_v19 }
 0x2d0   : > { %vm2502_vm1 = vcmp.eq.s32.totalorder %v1698_v53, %v7772_v44  ;;  %v5832_v27 = vunpack.c.l.b16 %v4597_v8  ;;  %v4129_v41 = vrot.slane %v4128_v42, 2  ;;  %v4205_v5 = vadd.f32 %v6720_v20, %v6719_v2 }
 0x2d1   : > { %2023 = vbcast.lane.b32.xlu1 %v9830_v29, 264  ;;  %2019 = vbcast.lane.b32.xlu0 %v9830_v29, 256  ;;  %v4005_v51 = vrot.slane %v4004_v4, 1  ;;  %v4076_v7 = vadd.f32 %v4075_v18, %v4074_v24  ;;  %v6721_v35 = vsel %vm2502_vm1, 1.0, %v11149_v39  ;;  %v4605_v53 = vpack.c.bf16 %v10126_v28, %v10126_v28 }
 0x2d2   : > { %v4136_v23 = vrot.slane %v4135_v57, 4  ;;  %v4079_v24 = vadd.f32 %v6678_v26, %v6677_v50  ;;  %v4206_v47 = vsel %vm3377_vm6, %v6721_v35, 0.0  ;;  %v4201_v8 = vrot.slane %v4200_v40, 2 }
 0x2d3   : > { %v10122_v55 = vpop.permute.xlu1 %1708  ;;  %v10124_v43 = vpop.permute.xlu0 %1704  ;;  %v4006_v28 = vadd.f32 %v4005_v51, %v4004_v4  ;;  %v4611_v18 = vpack.c.bf16 %v10105_v11, %v10105_v11  ;;  %vm2480_vm8 = vcmp.eq.s32.totalorder %v10094_v59, %v7772_v44  ;;  %vm2479_vm9 = vcmp.eq.s32.totalorder %v10079_v34, %v7772_v44 }
 0x2d4   : > { %v4207_v4 = vadd.f32 %v4206_v47, %v4205_v5  ;;  %v5840_v26 = vunpack.c.l.b16 %v4605_v53  ;;  %v4130_v50 = vadd.f32 %v4129_v41, %v4128_v42  ;;  %v5958_v51 = vsel %vm5898_vm7, %v5832_v27, %v9895_v16 }
 0x2d5   : > { %2132 = vbcast.lane.b32.xlu1 %v11184_v61, 272  ;;  %2117 = vbcast.lane.b32.xlu0 %v11182_v10, 272  ;;  %v6653_v10 = vsel %vm2434_vm14, 1.0, %v11149_v39  ;;  %v4202_v35 = vadd.f32 %v4201_v8, %v4200_v40  ;;  %v6699_v34 = vsel %vm2480_vm8, 1.0, %v11149_v39  ;;  %vm2504_vm11 = vcmp.eq.s32.totalorder %v10122_v55, %v7772_v44 }
 0x2d6   : > { %v4007_v14 = vadd.f32 %v6654_v45, %v6653_v10  ;;  %v4077_v45 = vrot.slane %v4076_v7, 1  ;;  %v4208_v16 = vrot.slane %v4207_v4, 4  ;;  %vm2503_vm12 = vcmp.eq.s32.totalorder %v10124_v43, %v7772_v44 }
 0x2d7   : > { %v10145_v12 = vpop.permute.xlu1 %1374  ;;  %v1368_v61 = vpop.permute.xlu0 %1367  ;;  %v4131_v40 = vrot.slane %v4130_v50, 1  ;;  %v6723_v43 = vsel %vm2504_vm11, 1.0, %v11149_v39 }
 0x2d8   : > { %vm2436_vm2 = vcmp.eq.s32.totalorder %v1368_v61, %v7772_v44 }
 0x2d9   : > { %v6655_v21 = vsel %vm2436_vm2, 1.0, %v11149_v39  ;;  %2143 = vbcast.lane.b32.xlu1 %v9835_v46, 264  ;;  %2139 = vbcast.lane.b32.xlu0 %v9835_v46, 256  ;;  %vm2437_vm2 = vcmp.eq.s32.totalorder %v10145_v12, %v7772_v44 }
 0x2da   : > { %v4008_v30 = vsel %vm3377_vm6, %v6655_v21, 0.0 }
 0x2db   : > { %v4009_v9 = vadd.f32 %v4008_v30, %v4007_v14  ;;  %v1488_v3 = vpop.permute.xlu1 %1487  ;;  %v10162_v13 = vpop.permute.xlu0 %1378  ;;  %v10179_v14 = vadd.f32 %v4194_v17, %v10119_v31  ;;  %v4598_v30 = vpack.c.bf16 %v4006_v28, %v4006_v28  ;;  %v6698_v31 = vsel %vm2479_vm9, 1.0, %v11149_v39 }
 0x2dc   : > { %vm2460_vm10 = vcmp.eq.s32.totalorder %v1488_v3, %v7772_v44  ;;  %v4142_v59 = vadd.f32 %v6699_v34, %v6698_v31  ;;  %v4203_v3 = vrot.slane %v4202_v35, 1  ;;  %vm2438_vm15 = vcmp.eq.s32.totalorder %v10162_v13, %v7772_v44 }
 0x2dd   : > { %v4010_v49 = vrot.slane %v4009_v9, 4  ;;  %v6679_v19 = vsel %vm2460_vm10, 1.0, %v11149_v39  ;;  %1809 = vbcast.lane.b32.xlu1 %v9852_v25, 256  ;;  %1802 = vbcast.lane.b32.xlu0 %v9795_v22, 272  ;;  %v4137_v22 = vadd.f32 %v4136_v23, %v4135_v57  ;;  %v5833_v41 = vunpack.c.l.b16 %v4598_v30 }
 0x2de   : > { %v4080_v1 = vsel %vm3377_vm6, %v6679_v19, 0.0  ;;  %vm11185_vm10 = vcmask 1045509  }
 0x2df   : > { %v4011_v20 = vadd.f32 %v4010_v49, %v4009_v9  ;;  %v4081_v2 = vadd.f32 %v4080_v1, %v4079_v24  ;;  %v10174_v61 = vpop.permute.xlu1 %1498  ;;  %v10176_v10 = vpop.permute.xlu0 %1494  ;;  %v4078_v9 = vadd.f32 %v4077_v45, %v4076_v7  ;;  %v4138_v53 = vrot.slane %v4137_v22, 2  ;;  %vm11186_vm8 = vmmov %vm11185_vm10 }
 0x2e0   : > { %v6722_v24 = vsel %vm2503_vm12, 1.0, %v11149_v39  ;;  %v4209_v45 = vadd.f32 %v4208_v16, %v4207_v4  ;;  %vm2462_vm0 = vcmp.eq.s32.totalorder %v10174_v61, %v7772_v44  ;;  %vm2461_vm1 = vcmp.eq.s32.totalorder %v10176_v10, %v7772_v44 }
 0x2e1   : > { %v4082_v21 = vrot.slane %v4081_v2, 4  ;;  %1922 = vbcast.lane.b32.xlu1 %v9800_v48, 272  ;;  %1813 = vbcast.lane.b32.xlu0 %v9852_v25, 264  ;;  %v4012_v42 = vrot.slane %v4011_v20, 2  ;;  %v4606_v5 = vpack.c.bf16 %v4078_v9, %v4078_v9  ;;  %v4139_v28 = vadd.f32 %v4138_v53, %v4137_v22 }
 0x2e2   : > { %v5965_v4 = vsel %vm5898_vm7, %v5840_v26, %v10112_v62  ;;  %v6681_v62 = vsel %vm2462_vm0, 1.0, %v11149_v39  ;;  %v6680_v12 = vsel %vm2461_vm1, 1.0, %v11149_v39  ;;  %v10239_v26 = vadd.f32 %v4203_v3, %v4202_v35 }
 0x2e3   : > { %v4083_v48 = vadd.f32 %v4082_v21, %v4081_v2  ;;  %v10194_v57 = vpop.permute.xlu1 %1599  ;;  %v1593_v17 = vpop.permute.xlu0 %1592  ;;  %v4013_v47 = vadd.f32 %v4012_v42, %v4011_v20  ;;  %v10220_v20 = vadd.f32 %v4131_v40, %v4130_v50  ;;  %v5841_v2 = vunpack.c.l.b16 %v4606_v5 }
 0x2e4   : > { %vm2481_vm13 = vcmp.eq.s32.totalorder %v1593_v17, %v7772_v44  ;;  %v4214_v21 = vadd.f32 %v6723_v43, %v6722_v24  ;;  %v4140_v50 = vrot.slane %v4139_v28, 1  ;;  %v10244_v13 = vsel %vm11185_vm10, %v5833_v41, %v5958_v51 }
 0x2e5   : > { %v4084_v7 = vrot.slane %v4083_v48, 2  ;;  %v6700_v27 = vsel %vm2481_vm13, 1.0, %v11149_v39  ;;  %1933 = vbcast.lane.b32.xlu1 %v9868_v54, 264  ;;  %1929 = vbcast.lane.b32.xlu0 %v9868_v54, 256  ;;  %v4014_v30 = vrot.slane %v4013_v47, 1  ;;  %v6656_v17 = vsel %vm2437_vm2, 1.0, %v11149_v39 }
 0x2e6   : > { %v4143_v23 = vsel %vm3377_vm6, %v6700_v27, 0.0  ;;  %v10248_v16 = vsel %vm11186_vm8, %v5841_v2, %v5965_v4  ;;  %v4088_v35 = vadd.f32 %v6681_v62, %v6680_v12  ;;  %vm2482_vm9 = vcmp.eq.s32.totalorder %v10194_v57, %v7772_v44 }
 0x2e7   : > { %v4144_v49 = vadd.f32 %v4143_v23, %v4142_v59  ;;  %v1713_v19 = vpop.permute.xlu1 %1712  ;;  %v10208_v8 = vpop.permute.xlu0 %1603  ;;  %v4085_v1 = vadd.f32 %v4084_v7, %v4083_v48  ;;  %v4210_v48 = vrot.slane %v4209_v45, 2  ;;  %v4015_v10 = vadd.f32 %v4014_v30, %v4013_v47  ;;  %v11187_v30 = vld [vmem:[#allocation47_spill] sm:$0xff] }
 0x2e8   : > { %vm2505_vm14 = vcmp.eq.s32.totalorder %v1713_v19, %v7772_v44  ;;  %vm2483_vm11 = vcmp.eq.s32.totalorder %v10208_v8, %v7772_v44  ;;  %v10264_v43 = vadd.f32 %v4140_v50, %v4139_v28  ;;  %v6701_v2 = vsel %vm2482_vm9, 1.0, %v11149_v39 }
 0x2e9   : > { %v6724_v55 = vsel %vm2505_vm14, 1.0, %v11149_v39  ;;  %2034 = vbcast.lane.b32.xlu1 %v9885_v36, 256  ;;  %2027 = vbcast.lane.b32.xlu0 %v9830_v29, 272  ;;  %v4145_v22 = vrot.slane %v4144_v49, 4  ;;  %v4086_v42 = vrot.slane %v4085_v1, 1  ;;  %v6657_v29 = vsel %vm2438_vm15, 1.0, %v11149_v39 }
 0x2ea   : > { %v4215_v9 = vsel %vm3377_vm6, %v6724_v55, 0.0  ;;  %v4016_v40 = vadd.f32 %v6657_v29, %v6656_v17  ;;  %v10266_v24 = vadd.f32 %v4210_v48, %v4209_v45  ;;  %v4599_v55 = vpack.c.bf16 %v4015_v10, %v4015_v10 }
 0x2eb   : > { %v1724_v34 = vpop.permute.xlu1 %1723  ;;  %v1720_v31 = vpop.permute.xlu0 %1719  ;;  %v4146_v61 = vadd.f32 %v4145_v22, %v4144_v49  ;;  %v4216_v53 = vadd.f32 %v4215_v9, %v4214_v21  ;;  %v4087_v7 = vadd.f32 %v4086_v42, %v4085_v1  ;;  %v6702_v22 = vsel %vm2483_vm11, 1.0, %v11149_v39 }
 0x2ec   : > { %vm2507_vm14 = vcmp.eq.s32.totalorder %v1724_v34, %v7772_v44  ;;  %vm2506_vm15 = vcmp.eq.s32.totalorder %v1720_v31, %v7772_v44  ;;  %v4212_v29 = vrot.slane %v10266_v24, 1  ;;  %v4151_v34 = vadd.f32 %v6702_v22, %v6701_v2 }
 0x2ed   : > { %2147 = vbcast.lane.b32.xlu1 %v9835_v46, 272  ;;  %2038 = vbcast.lane.b32.xlu0 %v9885_v36, 264  ;;  %v4147_v3 = vrot.slane %v4146_v61, 2  ;;  %v4217_v41 = vrot.slane %v4216_v53, 4  ;;  %v6726_v28 = vsel %vm2507_vm14, 1.0, %v11149_v39  ;;  %v6725_v45 = vsel %vm2506_vm15, 1.0, %v11149_v39 }
 0x2ee   : > { %v4607_v57 = vpack.c.bf16 %v4087_v7, %v4087_v7  ;;  %v4223_v48 = vadd.f32 %v6726_v28, %v6725_v45  ;;  %v5834_v10 = vunpack.c.l.b16 %v4599_v55  ;;  %vm11190_vm15 = vcmask 1047559  }
 0x2ef   : > { %v1503_v59 = vpop.permute.xlu1 %1502  ;;  %v1383_v46 = vpop.permute.xlu0 %1382  ;;  %v10285_v9 = vadd.f32 %v4147_v3, %v4146_v61  ;;  %v4218_v8 = vadd.f32 %v4217_v41, %v4216_v53 }
 0x2f0   : > { %vm2463_vm12 = vcmp.eq.s32.totalorder %v1503_v59, %v7772_v44  ;;  %vm2439_vm13 = vcmp.eq.s32.totalorder %v1383_v46, %v7772_v44  ;;  %v5842_v46 = vunpack.c.l.b16 %v4607_v57 }
 0x2f1   : > { %v6682_v51 = vsel %vm2463_vm12, 1.0, %v11149_v39  ;;  %v6658_v27 = vsel %vm2439_vm13, 1.0, %v11149_v39  ;;  %2158 = vbcast.lane.b32.xlu1 %v9892_v32, 264  ;;  %2154 = vbcast.lane.b32.xlu0 %v9892_v32, 256  ;;  %v4149_v53 = vrot.slane %v10285_v9, 1  ;;  %vm11188_vm13 = vcmask 1046534  }
 0x2f2   : > { %v4089_v5 = vsel %vm3377_vm6, %v6682_v51, 0.0  ;;  %v4017_v23 = vsel %vm3377_vm6, %v6658_v27, 0.0  ;;  %vm11189_vm14 = vmmov %vm11188_vm13 }
 0x2f3   : > { %v4090_v47 = vadd.f32 %v4089_v5, %v4088_v35  ;;  %v4018_v49 = vadd.f32 %v4017_v23, %v4016_v40  ;;  %v1615_v19 = vpop.permute.xlu1 %1614  ;;  %v1608_v1 = vpop.permute.xlu0 %1607  ;;  %v4219_v35 = vrot.slane %v4218_v8, 2 }
 0x2f4   : > { %vm2484_vm0 = vcmp.eq.s32.totalorder %v1608_v1, %v7772_v44  ;;  %vm2485_vm10 = vcmp.eq.s32.totalorder %v1615_v19, %v7772_v44 }
 0x2f5   : > { %v4091_v4 = vrot.slane %v4090_v47, 4  ;;  %v4019_v21 = vrot.slane %v4018_v49, 4  ;;  %1824 = vbcast.lane.b32.xlu1 %v11187_v30, 256  ;;  %1817 = vbcast.lane.b32.xlu0 %v9852_v25, 272  ;;  %v6703_v42 = vsel %vm2484_vm0, 1.0, %v11149_v39  ;;  %v4220_v19 = vadd.f32 %v4219_v35, %v4218_v8  ;;  %vm11191_vm0 = vmmov %vm11190_vm15 }
 0x2f6   : > { %v4152_v17 = vsel %vm3377_vm6, %v6703_v42, 0.0  ;;  %v6704_v55 = vsel %vm2485_vm10, 1.0, %v11149_v39  ;;  %vm11194_vm10 = vmmov %vm11188_vm13 }
 0x2f7   : > { %v4092_v62 = vadd.f32 %v4091_v4, %v4090_v47  ;;  %v4020_v12 = vadd.f32 %v4019_v21, %v4018_v49  ;;  %v1728_v50 = vpop.permute.xlu1 %1727  ;;  %v1619_v31 = vpop.permute.xlu0 %1618  ;;  %v4153_v61 = vadd.f32 %v4152_v17, %v4151_v34 }
 0x2f8   : > { %vm2508_vm1 = vcmp.eq.s32.totalorder %v1728_v50, %v7772_v44  ;;  %vm2486_vm2 = vcmp.eq.s32.totalorder %v1619_v31, %v7772_v44 }
 0x2f9   : > { %v4093_v25 = vrot.slane %v4092_v62, 2  ;;  %v4021_v40 = vrot.slane %v4020_v12, 2  ;;  %1937 = vbcast.lane.b32.xlu1 %v9868_v54, 272  ;;  %1828 = vbcast.lane.b32.xlu0 %v11187_v30, 264  ;;  %v6727_v59 = vsel %vm2508_vm1, 1.0, %v11149_v39  ;;  %v4154_v27 = vrot.slane %v4153_v61, 4 }
 0x2fa   : > { %v4224_v5 = vsel %vm3377_vm6, %v6727_v59, 0.0  ;;  %v6705_v23 = vsel %vm2486_vm2, 1.0, %v11149_v39  ;;  %vm11192_vm1 = vcmask 1045509  }
 0x2fb   : > { %v4094_v7 = vadd.f32 %v4093_v25, %v4092_v62  ;;  %v4022_v51 = vadd.f32 %v4021_v40, %v4020_v12  ;;  %v1739_v3 = vpop.permute.xlu1 %1738  ;;  %v1735_v41 = vpop.permute.xlu0 %1734  ;;  %v4155_v49 = vadd.f32 %v4154_v27, %v4153_v61  ;;  %v4225_v1 = vadd.f32 %v4224_v5, %v4223_v48  ;;  %vm11193_vm2 = vmmov %vm11192_vm1 }
 0x2fc   : > { %vm2510_vm8 = vcmp.eq.s32.totalorder %v1739_v3, %v7772_v44  ;;  %vm2509_vm9 = vcmp.eq.s32.totalorder %v1735_v41, %v7772_v44  ;;  %v4160_v4 = vadd.f32 %v6705_v23, %v6704_v55  ;;  %v4221_v61 = vrot.slane %v4220_v19, 1 }
 0x2fd   : > { %v4095_v54 = vrot.slane %v4094_v7, 1  ;;  %v4023_v47 = vrot.slane %v4022_v51, 1  ;;  %1948 = vbcast.lane.b32.xlu1 %v9976_v58, 264  ;;  %1944 = vbcast.lane.b32.xlu0 %v9976_v58, 256  ;;  %v6729_v2 = vsel %vm2510_vm8, 1.0, %v11149_v39  ;;  %v6728_v22 = vsel %vm2509_vm9, 1.0, %v11149_v39  ;;  %vm11195_vm8 = vmmov %vm11194_vm10 }
 0x2fe   : > { %v4156_v28 = vrot.slane %v4155_v49, 2  ;;  %v4226_v45 = vrot.slane %v4225_v1, 4  ;;  %v4232_v34 = vadd.f32 %v6729_v2, %v6728_v22  ;;  %v4150_v55 = vadd.f32 %v4149_v53, %v10285_v9  ;;  %vm11196_vm9 = vmmov %vm11191_vm0 }
 0x2ff   : > { %v1743_v21 = vpop.permute.xlu1 %1742  ;;  %v1623_v57 = vpop.permute.xlu0 %1622  ;;  %v4024_v42 = vadd.f32 %v4023_v47, %v4022_v51  ;;  %v4096_v62 = vadd.f32 %v4095_v54, %v4094_v7  ;;  %v4620_v53 = vpack.c.bf16 %v10239_v26, %v10239_v26 }
 0x300   : > { %vm2511_vm11 = vcmp.eq.s32.totalorder %v1743_v21, %v7772_v44  ;;  %vm2487_vm12 = vcmp.eq.s32.totalorder %v1623_v57, %v7772_v44  ;;  %v4157_v12 = vadd.f32 %v4156_v28, %v4155_v49  ;;  %v4227_v8 = vadd.f32 %v4226_v45, %v4225_v1 }
 0x301   : > { %v6730_v50 = vsel %vm2511_vm11, 1.0, %v11149_v39  ;;  %v6706_v31 = vsel %vm2487_vm12, 1.0, %v11149_v39  ;;  %2049 = vbcast.lane.b32.xlu1 %v9989_v52, 256  ;;  %2042 = vbcast.lane.b32.xlu0 %v9885_v36, 272  ;;  %v4600_v25 = vpack.c.bf16 %v4024_v42, %v4024_v42  ;;  %v4608_v40 = vpack.c.bf16 %v4096_v62, %v4096_v62  ;;  %vm11197_vm11 = vmmov %vm11191_vm0 }
 0x302   : > { %v4233_v48 = vsel %vm3377_vm6, %v6730_v50, 0.0  ;;  %v4161_v17 = vsel %vm3377_vm6, %v6706_v31, 0.0  ;;  %v4228_v35 = vrot.slane %v4227_v8, 2  ;;  %v4158_v3 = vrot.slane %v4157_v12, 1  ;;  %v10354_v31 = vpop.f32.mrf.mxu0 }
 0x303   : > { %v4234_v59 = vadd.f32 %v4233_v48, %v4232_v34  ;;  %v4162_v7 = vadd.f32 %v4161_v17, %v4160_v4  ;;  %v10314_v51 = vpop.permute.xlu1 %1753  ;;  %v10316_v27 = vpop.permute.xlu0 %1749  ;;  %v5835_v41 = vunpack.c.l.b16 %v4600_v25  ;;  %v5843_v5 = vunpack.c.l.b16 %v4608_v40 }
 0x304   : > { %v5960_v36 = vsel %vm11188_vm13, %v5834_v10, %v10244_v13  ;;  %v4229_v23 = vadd.f32 %v4228_v35, %v4227_v8  ;;  %v5967_v49 = vsel %vm11189_vm14, %v5842_v46, %v10248_v16  ;;  %v4213_v1 = vadd.f32 %v4212_v29, %v10266_v24 }
 0x305   : > { %v4235_v54 = vrot.slane %v4234_v59, 4  ;;  %v4163_v47 = vrot.slane %v4162_v7, 4  ;;  %2162 = vbcast.lane.b32.xlu1 %v9892_v32, 272  ;;  %2053 = vbcast.lane.b32.xlu0 %v9989_v52, 264  ;;  %v5961_v2 = vsel %vm11190_vm15, %v5835_v41, %v5960_v36  ;;  %v5968_v13 = vsel %vm11191_vm0, %v5843_v5, %v5967_v49  ;;  %v7354_v36 = vld [vmem:[%s7665_s9 + $0x134] ss:$24 sps:$4 sm:$0xff]  }
 0x306   : > { %v4222_v10 = vadd.f32 %v4221_v61, %v4220_v19  ;;  %v4230_v22 = vrot.slane %v4229_v23, 1  ;;  %v4619_v16 = vpack.c.bf16 %v10179_v14, %v10179_v14  ;;  %v4612_v24 = vpack.c.bf16 %v10220_v20, %v10220_v20  ;;  %v7356_v49 = vld [vmem:[%s7665_s9 + $0x130] ss:$24 sps:$4 sm:$0xff]   ;;  %5619 = vmatprep.mubr.bf16.mxu0 %v7354_v36 }
 0x307   : > { %v4236_v28 = vadd.f32 %v4235_v54, %v4234_v59  ;;  %v4164_v45 = vadd.f32 %v4163_v47, %v4162_v7  ;;  %v10330_v32 = vpop.permute.xlu1 %1768  ;;  %v10332_v4 = vpop.permute.xlu0 %1764  ;;  %v4159_v29 = vadd.f32 %v4158_v3, %v4157_v12  ;;  %v6015_v9 = vpack.c.b16 %v5968_v13, %v5961_v2  ;;  %5620 = vmatmul.mubr.bf16.gmra.mxu0 %v7356_v49  ;;  %v11207_v36 = vld [vmem:[#allocation13_spill] sm:$0xff]  ;;  %v11211_v49 = vld [vmem:[#allocation28_spill] sm:$0xff] }
 0x308   : > { %v4231_v46 = vadd.f32 %v4230_v22, %v4229_v23  ;;  %v5853_v57 = vunpack.c.l.b16 %v4618_v60  ;;  %v5846_v14 = vunpack.c.l.b16 %v4611_v18  ;;  %v4613_v20 = vpack.c.bf16 %v10264_v43, %v10264_v43  ;;  %v10369_v23 = vpop.f32.mrf.mxu0 }
 0x309   : > { %v4237_v19 = vrot.slane %v4236_v28, 2  ;;  %v4165_v21 = vrot.slane %v4164_v45, 2  ;;  %2173 = vbcast.lane.b32.xlu1 %v9993_v0, 264  ;;  %2169 = vbcast.lane.b32.xlu0 %v9993_v0, 256  ;;  %v4621_v42 = vpack.c.bf16 %v4213_v1, %v4213_v1  ;;  %v4614_v26 = vpack.c.bf16 %v4150_v55, %v4150_v55 }
 0x30a   : > { %7166 = vmatprep.mubr.bf16.mxu1 %v6015_v9  ;;  %v4622_v34 = vpack.c.bf16 %v4222_v10, %v4222_v10  ;;  %v5854_v6 = vunpack.c.l.b16 %v4619_v16  ;;  %v5847_v60 = vunpack.c.l.b16 %v4612_v24  ;;  %v4615_v48 = vpack.c.bf16 %v4159_v29, %v4159_v29  ;;  %v10385_v29 = vpop.f32.mrf.mxu0 }
 0x30b   : > { %v4238_v62 = vadd.f32 %v4237_v19, %v4236_v28  ;;  %v4166_v12 = vadd.f32 %v4165_v21, %v4164_v45  ;;  %v10350_v8 = vpop.permute.xlu1 %1873  ;;  %v10352_v50 = vpop.permute.xlu0 %1869  ;;  %v4623_v11 = vpack.c.bf16 %v4231_v46, %v4231_v46  ;;  %v5969_v18 = vsel %vm5892_vm3, %v10030_v38, %v10014_v56  ;;  %v10394_v21 = vld [vmem:[%s7688_s23 + $0x70] sm:$0xff] }
 0x30c   : > { %v5855_v43 = vunpack.c.l.b16 %v4620_v53  ;;  %v5976_v40 = vsel %vm5892_vm3, %v5853_v57, %v10099_v63  ;;  %v5848_v61 = vunpack.c.l.b16 %v4613_v20  ;;  %v5856_v35 = vunpack.c.l.b16 %v4621_v42  ;;  %v11198_v57 = vld [vmem:[#allocation8_spill] sm:$0xff] }
 0x30d   : > { %v4239_v17 = vrot.slane %v4238_v62, 1  ;;  %v4167_v25 = vrot.slane %v4166_v12, 1  ;;  %1839 = vbcast.lane.b32.xlu1 %v10005_v15, 256  ;;  %1832 = vbcast.lane.b32.xlu0 %v11187_v30, 272  ;;  %v5970_v59 = vsel %vm5894_vm4, %v5846_v14, %v5969_v18  ;;  %v5849_v7 = vunpack.c.l.b16 %v4614_v26 }
 0x30e   : > { %v5857_v3 = vunpack.c.l.b16 %v4622_v34  ;;  %v5850_v30 = vunpack.c.l.b16 %v4615_v48  ;;  %v5858_v54 = vunpack.c.l.b16 %v4623_v11  ;;  %v5971_v63 = vsel %vm5896_vm5, %v5847_v60, %v5970_v59  ;;  %v7357_v34 = vld [vmem:[%s7665_s9 + $0x164] ss:$24 sps:$4 sm:$0xff]  }
 0x30f   : > { %v10364_v41 = vpop.permute.xlu1 %1888  ;;  %v10366_v56 = vpop.permute.xlu0 %1884  ;;  %v4168_v38 = vadd.f32 %v4167_v25, %v4166_v12  ;;  %v4240_v5 = vadd.f32 %v4239_v17, %v4238_v62  ;;  %v5977_v47 = vsel %vm5894_vm4, %v5854_v6, %v5976_v40  ;;  %v5972_v13 = vsel %vm5898_vm7, %v5848_v61, %v5971_v63  ;;  %v7359_v12 = vld [vmem:[%s7665_s9 + $0x160] ss:$24 sps:$4 sm:$0xff]   ;;  %5627 = vmatprep.mubr.bf16.mxu0 %v7357_v34  ;;  %v11202_v17 = vld [vmem:[#allocation17_spill] sm:$0xff]  ;;  %v11209_v63 = vld [vmem:[#allocation22_spill] sm:$0xff] }
 0x310   : > { %v5978_v2 = vsel %vm5896_vm5, %v5855_v43, %v5977_v47  ;;  %v10398_v14 = vrot.slane %v10394_v21, %v11198_v57  ;;  %v10405_v62 = vpop.f32.mrf.mxu0  ;;  %v11199_v6 = vld [vmem:[#allocation11_spill] sm:$0xff]  ;;  %v11200_v60 = vld [vmem:[#allocation12_spill] sm:$0xff]  ;;  %5628 = vmatmul.mubr.bf16.gmra.mxu0 %v7359_v12  ;;  %vm2540_vm13 = vcmp.eq.s32.totalorder %v10364_v41, %v7772_v44  ;;  %vm2539_vm14 = vcmp.eq.s32.totalorder %v10366_v56, %v7772_v44  ;;  %v11210_v47 = vld [vmem:[#allocation25_spill] sm:$0xff] }
 0x311   : > { %1952 = vbcast.lane.b32.xlu1 %v9976_v58, 272  ;;  %1843 = vbcast.lane.b32.xlu0 %v10005_v15, 264  ;;  %v4616_v1 = vpack.c.bf16 %v4168_v38, %v4168_v38  ;;  %v4624_v55 = vpack.c.bf16 %v4240_v5, %v4240_v5  ;;  %v5979_v10 = vsel %vm5898_vm7, %v5856_v35, %v5978_v2  ;;  %v11201_v43 = vld [vmem:[#allocation15_spill] sm:$0xff]  ;;  %v7428_v41 = vld [vmem:[%s7688_s23 + $0x60] sm:$0xff]  ;;  %v11217_v56 = vld [vmem:[#allocation14_spill] sm:$0xff] }
 0x312   : > { %v5973_v58 = vsel %vm11192_vm1, %v5849_v7, %v5972_v13  ;;  %v5980_v24 = vsel %vm11193_vm2, %v5857_v3, %v5979_v10  ;;  %v7016_v48 = vadd.f32 %v11200_v60, %v11199_v6  ;;  %v7019_v25 = vadd.f32 %v11202_v17, %v11201_v43  ;;  %v7084_v40 = vpop.f32.mrf.mxu0  ;;  %v10416_v61 = vld [vmem:[%s7688_s23 + $0x78] sm:$0xff]  ;;  %v11205_v3 = vld [vmem:[#allocation21_spill] sm:$0xff]  ;;  %v11213_v10 = vld [vmem:[#allocation30_spill] sm:$0xff] }
 0x313   : > { %v10379_v22 = vpop.permute.xlu1 %1772  ;;  %v10381_v28 = vpop.permute.xlu0 %1757  ;;  %v5851_v45 = vunpack.c.l.b16 %v4616_v1  ;;  %v5859_v16 = vunpack.c.l.b16 %v4624_v55  ;;  %v5974_v9 = vsel %vm11194_vm10, %v5850_v30, %v5973_v58  ;;  %v5981_v53 = vsel %vm11195_vm8, %v5858_v54, %v5980_v24  ;;  %v11204_v59 = vld [vmem:[#allocation19_spill] sm:$0xff]  ;;  %v11208_v54 = vld [vmem:[#allocation20_spill] sm:$0xff] }
 0x314   : > { %v10420_v35 = vrot.slane %v10416_v61, %v11198_v57  ;;  %v11206_v38 = vld [vmem:[#allocation23_spill] sm:$0xff]  ;;  %vm2537_vm0 = vcmp.eq.s32.totalorder %v10350_v8, %v7772_v44  ;;  %vm2536_vm1 = vcmp.eq.s32.totalorder %v10352_v50, %v7772_v44  ;;  %v10438_v30 = vadd.f32 %v7016_v48, %v11207_v36  ;;  %v11212_v8 = vld [vmem:[#allocation29_spill] sm:$0xff]  ;;  %v7085_v50 = vpop.f32.mrf.mxu0  ;;  %v11218_v6 = vld [vmem:[#allocation16_spill] sm:$0xff] }
 0x315   : > { %1963 = vbcast.lane.b32.xlu1 %v10024_v33, 264  ;;  %1959 = vbcast.lane.b32.xlu0 %v10024_v33, 256  ;;  %v5975_v46 = vsel %vm11196_vm9, %v5851_v45, %v5974_v9  ;;  %v5982_v19 = vsel %vm11197_vm11, %v5859_v16, %v5981_v53  ;;  %v7025_v5 = vadd.f32 %v11206_v38, %v11205_v3  ;;  %v6759_v16 = vsel %vm2540_vm13, 1.0, %v11149_v39  ;;  %v11214_v9 = vld [vmem:[#allocation32_spill] sm:$0xff]  ;;  %v11215_v53 = vld [vmem:[#allocation35_spill] sm:$0xff]  ;;  %v11219_v48 = vld [vmem:[#allocation26_spill] sm:$0xff] }
 0x316   : > { %v6016_v20 = vpack.c.b16 %v5982_v19, %v5975_v46  ;;  %v7028_v1 = vadd.f32 %v11211_v49, %v11210_v47  ;;  %v7031_v45 = vadd.f32 %v11213_v10, %v11212_v8  ;;  %v6758_v58 = vsel %vm2539_vm14, 1.0, %v11149_v39  ;;  %v11220_v43 = vld [vmem:[#allocation24_spill] sm:$0xff]  ;;  %v11221_v17 = vld [vmem:[#allocation27_spill] sm:$0xff]  ;;  %v11223_v47 = vld [vmem:[#allocation33_spill] sm:$0xff] }
 0x317   : > { %v10400_v42 = vpop.permute.xlu1 %1783  ;;  %v10402_v26 = vpop.permute.xlu0 %1779  ;;  %v7034_v46 = vadd.f32 %v11215_v53, %v11214_v9  ;;  %v6756_v19 = vsel %vm2537_vm0, 1.0, %v11149_v39  ;;  %v6755_v57 = vsel %vm2536_vm1, 1.0, %v11149_v39  ;;  %v10473_v12 = vadd.f32 %v7019_v25, %v11217_v56  ;;  %v11225_v8 = vld [vmem:[#allocation37_spill] sm:$0xff] }
 0x318   : > { %7167 = vmatmul.mubr.bf16.gmra.mxu1 %v6016_v20  ;;  %v11216_v20 = vld [vmem:[#allocation10_spill] sm:$0xff]  ;;  %v4322_v3 = vadd.f32 %v6759_v16, %v6758_v58  ;;  %v7429_v9 = vld [vmem:[%s7688_s23 + $0x68] sm:$0xff]  ;;  %vm2513_vm8 = vcmp.eq.s32.totalorder %v10314_v51, %v7772_v44  ;;  %vm2517_vm13 = vcmp.eq.s32.totalorder %v10379_v22, %v7772_v44  ;;  %vm2514_vm14 = vcmp.eq.s32.totalorder %v10381_v28, %v7772_v44 }
 0x319   : > { %2064 = vbcast.lane.b32.xlu1 %v10398_v14, 256  ;;  %2057 = vbcast.lane.b32.xlu0 %v9989_v52, 272  ;;  %v11203_v52 = vld [vmem:[#allocation18_spill] sm:$0xff]  ;;  %v10470_v34 = vrot.slane %v7428_v41, %v11216_v20  ;;  %v10510_v53 = vrot.slane %v7429_v9, %v11216_v20  ;;  %vm2515_vm0 = vcmp.eq.s32.totalorder %v10332_v4, %v7772_v44 }
 0x31a   : > { %v7022_v7 = vadd.f32 %v11204_v59, %v11203_v52  ;;  %v10482_v52 = vadd.f32 %v11221_v17, %v11220_v43  ;;  %v7086_v59 = vadd.f32 %v7085_v50, %v7084_v40  ;;  %v6733_v43 = vsel %vm2514_vm14, 1.0, %v11149_v39 }
 0x31b   : > { %v1893_v11 = vpop.permute.xlu1 %1892  ;;  %v1878_v18 = vpop.permute.xlu0 %1877  ;;  %v6734_v28 = vsel %vm2515_vm0, 1.0, %v11149_v39 }
 0x31c   : > { %vm2541_vm12 = vcmp.eq.s32.totalorder %v1893_v11, %v7772_v44  ;;  %vm2538_vm15 = vcmp.eq.s32.totalorder %v1878_v18, %v7772_v44  ;;  %v5485_v60 = vadd.f32 %v7022_v7, %v11218_v6  ;;  %v10477_v11 = vadd.f32 %v7025_v5, %v11219_v48 }
 0x31d   : > { %2177 = vbcast.lane.b32.xlu1 %v9993_v0, 272  ;;  %2068 = vbcast.lane.b32.xlu0 %v10398_v14, 264  ;;  %v6970_v0 = vadd.f32 %v11209_v63, %v11208_v54  ;;  %v6760_v55 = vsel %vm2541_vm12, 1.0, %v11149_v39  ;;  %v6757_v24 = vsel %vm2538_vm15, 1.0, %v11149_v39  ;;  %v11222_v63 = vld [vmem:[#allocation31_spill] sm:$0xff]  ;;  %v10489_v7 = vadd.f32 %v7031_v45, %v11223_v47 }
 0x31e   : > { %v4323_v18 = vsel %vm3377_vm6, %v6760_v55, 0.0  ;;  %v4314_v38 = vsel %vm3377_vm6, %v6757_v24, 0.0  ;;  %v10486_v25 = vadd.f32 %v7028_v1, %v11222_v63  ;;  %v4313_v5 = vadd.f32 %v6756_v19, %v6755_v57  ;;  %v11224_v55 = vld [vmem:[#allocation36_spill] sm:$0xff] }
 0x31f   : > { %v10445_v2 = vpop.permute.xlu1 %1903  ;;  %v10447_v13 = vpop.permute.xlu0 %1899  ;;  %v10492_v49 = vadd.f32 %v7034_v46, %v6970_v0  ;;  %v10496_v40 = vadd.f32 %v11225_v8, %v11224_v55  ;;  %v4324_v10 = vadd.f32 %v4323_v18, %v4322_v3  ;;  %v7080_v1 = vadd.f32 %v10369_v23, %v10354_v31 }
 0x320   : > { %v4315_v45 = vadd.f32 %v4314_v38, %v4313_v5  ;;  %v10506_v0 = vadd.f32 %v10405_v62, %v10385_v29  ;;  %v5582_v16 = vadd.f32 %v7086_v59, %v5485_v60  ;;  %v7087_v31 = vpop.f32.mrf.mxu0  ;;  %vm2512_vm12 = vcmp.eq.s32.totalorder %v10316_v27, %v7772_v44  ;;  %v7160_v60 = vpop.f32.mrf.mxu1 }
 0x321   : > { %2188 = vbcast.lane.b32.xlu1 %v10420_v35, 264  ;;  %2184 = vbcast.lane.b32.xlu0 %v10420_v35, 256  ;;  %v4325_v29 = vrot.slane %v4324_v10, 4  ;;  %v6732_v57 = vsel %vm2513_vm8, 1.0, %v11149_v39  ;;  %vm2516_vm15 = vcmp.eq.s32.totalorder %v10330_v32, %v7772_v44  ;;  %v6731_v48 = vsel %vm2512_vm12, 1.0, %v11149_v39 }
 0x322   : > { %v4316_v51 = vrot.slane %v4315_v45, 4  ;;  %v7088_v6 = vpop.f32.mrf.mxu0  ;;  %v6736_v18 = vsel %vm2517_vm13, 1.0, %v11149_v39  ;;  %v6735_v22 = vsel %vm2516_vm15, 1.0, %v11149_v39  ;;  %v5574_v63 = vadd.f32 %v7080_v1, %v10438_v30  ;;  %v6109_v30 = vpop.f32.mrf.mxu1 }
 0x323   : > { %v1994_v36 = vpop.permute.xlu1 %1993  ;;  %v1990_v54 = vpop.permute.xlu0 %1989  ;;  %v4326_v17 = vadd.f32 %v4325_v29, %v4324_v10  ;;  %v4241_v47 = vadd.f32 %v6732_v57, %v6731_v48  ;;  %v4251_v8 = vsel %vm3377_vm6, %v6736_v18, 0.0  ;;  %v4242_v32 = vsel %vm3377_vm6, %v6733_v43, 0.0 }
 0x324   : > { %vm2561_vm2 = vcmp.eq.s32.totalorder %v1994_v36, %v7772_v44  ;;  %vm2560_vm10 = vcmp.eq.s32.totalorder %v1990_v54, %v7772_v44  ;;  %v4317_v3 = vadd.f32 %v4316_v51, %v4315_v45  ;;  %v7089_v36 = vadd.f32 %v7088_v6, %v7087_v31  ;;  %v7161_v57 = vpop.f32.mrf.mxu1 }
 0x325   : > { %1854 = vbcast.lane.b32.xlu1 %v10470_v34, 256  ;;  %1847 = vbcast.lane.b32.xlu0 %v10005_v15, 272  ;;  %v6780_v50 = vsel %vm2561_vm2, 1.0, %v11149_v39  ;;  %v10514_v15 = vrot.slane %v10394_v21, %v11183_v37  ;;  %v6779_v23 = vsel %vm2560_vm10, 1.0, %v11149_v39  ;;  %v10568_v54 = vadd.f32 %v7160_v60, %v5582_v16 }
 0x326   : > { %v10525_v62 = vadd.f32 %v6780_v50, %v6779_v23  ;;  %v4250_v4 = vadd.f32 %v6735_v22, %v6734_v28  ;;  %v4327_v10 = vrot.slane %v4326_v17, 2  ;;  %v4318_v1 = vrot.slane %v4317_v3, 2 }
 0x327   : > { %v2009_v58 = vpop.permute.xlu1 %2008  ;;  %v2005_v24 = vpop.permute.xlu0 %2004  ;;  %v4243_v31 = vadd.f32 %v4242_v32, %v4241_v47  ;;  %v5577_v29 = vadd.f32 %v10506_v0, %v10473_v12  ;;  %vm2519_vm12 = vcmp.eq.s32.totalorder %v10400_v42, %v7772_v44  ;;  %vm2518_vm13 = vcmp.eq.s32.totalorder %v10402_v26, %v7772_v44 }
 0x328   : > { %vm2564_vm9 = vcmp.eq.s32.totalorder %v2009_v58, %v7772_v44  ;;  %vm2563_vm11 = vcmp.eq.s32.totalorder %v2005_v24, %v7772_v44  ;;  %v10587_v58 = vadd.f32 %v10496_v40, %v10482_v52  ;;  %v10590_v24 = vadd.f32 %v7089_v36, %v10477_v11  ;;  %v6112_v47 = vpop.f32.mrf.mxu1 }
 0x329   : > { %1967 = vbcast.lane.b32.xlu1 %v10024_v33, 272  ;;  %1858 = vbcast.lane.b32.xlu0 %v10470_v34, 264  ;;  %v6783_v46 = vsel %vm2564_vm9, 1.0, %v11149_v39  ;;  %v6782_v19 = vsel %vm2563_vm11, 1.0, %v11149_v39  ;;  %vm2543_vm9 = vcmp.eq.s32.totalorder %v10445_v2, %v7772_v44  ;;  %vm2542_vm11 = vcmp.eq.s32.totalorder %v10447_v13, %v7772_v44 }
 0x32a   : > { %v10538_v41 = vadd.f32 %v6783_v46, %v6782_v19  ;;  %v4252_v9 = vadd.f32 %v4251_v8, %v4250_v4  ;;  %v10600_v2 = vrot.slane %v10416_v61, %v11183_v37  ;;  %v4328_v13 = vadd.f32 %v4327_v10, %v4326_v17 }
 0x32b   : > { %v2114_v33 = vpop.permute.xlu1 %2113  ;;  %v2110_v56 = vpop.permute.xlu0 %2109  ;;  %v6762_v11 = vsel %vm2543_vm9, 1.0, %v11149_v39  ;;  %v6761_v52 = vsel %vm2542_vm11, 1.0, %v11149_v39  ;;  %v6174_v42 = vmax.f32 %v10568_v54, 0.0  ;;  %v6110_v12 = vadd.f32 %v6109_v30, %v5574_v63 }
 0x32c   : > { %vm2585_vm1 = vcmp.eq.s32.totalorder %v2114_v33, %v7772_v44  ;;  %vm2584_vm2 = vcmp.eq.s32.totalorder %v2110_v56, %v7772_v44  ;;  %v4319_v40 = vadd.f32 %v4318_v1, %v4317_v3  ;;  %v4253_v26 = vrot.slane %v4252_v9, 4 }
 0x32d   : > { %v6804_v59 = vsel %vm2585_vm1, 1.0, %v11149_v39  ;;  %v6803_v27 = vsel %vm2584_vm2, 1.0, %v11149_v39  ;;  %1978 = vbcast.lane.b32.xlu1 %v10510_v53, 264  ;;  %1974 = vbcast.lane.b32.xlu0 %v10510_v53, 256  ;;  %v4244_v37 = vrot.slane %v4243_v31, 4  ;;  %v6738_v0 = vsel %vm2519_vm12, 1.0, %v11149_v39 }
 0x32e   : > { %v10566_v38 = vadd.f32 %v6804_v59, %v6803_v27  ;;  %v6737_v51 = vsel %vm2518_vm13, 1.0, %v11149_v39  ;;  %v4331_v33 = vadd.f32 %v6762_v11, %v6761_v52  ;;  %v4329_v56 = vrot.slane %v4328_v13, 1  ;;  %v10625_v27 = vld [vmem:[%s11082_s4] ss:$0 sm:$0xff] }
 0x32f   : > { %v2129_v5 = vpop.permute.xlu1 %2128  ;;  %v2125_v55 = vpop.permute.xlu0 %2124  ;;  %v6172_v18 = vmax.f32 %v6110_v12, 0.0  ;;  %v4320_v43 = vrot.slane %v4319_v40, 1  ;;  %v4259_v22 = vadd.f32 %v6738_v0, %v6737_v51  ;;  %v10630_v63 = vrot.slane %v10394_v21, %v11216_v20 }
 0x330   : > { %vm2588_vm10 = vcmp.eq.s32.totalorder %v2129_v5, %v7772_v44  ;;  %vm2587_vm8 = vcmp.eq.s32.totalorder %v2125_v55, %v7772_v44  ;;  %v4254_v5 = vadd.f32 %v4253_v26, %v4252_v9  ;;  %v4245_v55 = vadd.f32 %v4244_v37, %v4243_v31 }
 0x331   : > { %v6807_v45 = vsel %vm2588_vm10, 1.0, %v11149_v39  ;;  %v6806_v50 = vsel %vm2587_vm8, 1.0, %v11149_v39  ;;  %2079 = vbcast.lane.b32.xlu1 %v10514_v15, 256  ;;  %2072 = vbcast.lane.b32.xlu0 %v10398_v14, 272  ;;  %v4330_v8 = vadd.f32 %v4329_v56, %v4328_v13  ;;  %v10639_v21 = vmul.f32 %v10625_v27, %v6174_v42 }
 0x332   : > { %v10583_v16 = vadd.f32 %v6807_v45, %v6806_v50  ;;  %v4321_v45 = vadd.f32 %v4320_v43, %v4319_v40  ;;  %v10644_v1 = vmul.f32 %v10625_v27, %v6172_v18  ;;  %v10647_v9 = vadd.f32 %v7161_v57, %v10590_v24 }
 0x333   : > { %v1795_v14 = vpop.permute.xlu1 %1794  ;;  %v1788_v23 = vpop.permute.xlu0 %1787  ;;  %v10649_v31 = vadd.f32 %v6112_v47, %v5577_v29  ;;  %v4255_v13 = vrot.slane %v4254_v5, 2  ;;  %v4634_v11 = vpack.c.bf16 %v4330_v8, %v4330_v8  ;;  %v2212_v57 = vrot.slane %v10416_v61, %v11216_v20 }
 0x334   : > { %vm2520_vm14 = vcmp.eq.s32.totalorder %v1788_v23, %v7772_v44  ;;  %vm2521_vm15 = vcmp.eq.s32.totalorder %v1795_v14, %v7772_v44  ;;  %v4633_v24 = vpack.c.bf16 %v4321_v45, %v4321_v45 }
 0x335   : > { %2192 = vbcast.lane.b32.xlu1 %v10420_v35, 272  ;;  %2083 = vbcast.lane.b32.xlu0 %v10514_v15, 264  ;;  %v6739_v35 = vsel %vm2520_vm14, 1.0, %v11149_v39  ;;  %v6740_v6 = vsel %vm2521_vm15, 1.0, %v11149_v39  ;;  %v5869_v56 = vunpack.c.l.b16 %v4634_v11  ;;  %v6173_v18 = vmax.f32 %v10649_v31, 0.0 }
 0x336   : > { %v4260_v28 = vsel %vm3377_vm6, %v6739_v35, 0.0 }
 0x337   : > { %v1908_v46 = vpop.permute.xlu1 %1907  ;;  %v1799_v19 = vpop.permute.xlu0 %1798  ;;  %v4261_v50 = vadd.f32 %v4260_v28, %v4259_v22 }
 0x338   : > { %vm2544_vm0 = vcmp.eq.s32.totalorder %v1908_v46, %v7772_v44  ;;  %vm2522_vm1 = vcmp.eq.s32.totalorder %v1799_v19, %v7772_v44 }
 0x339   : > { %v6763_v60 = vsel %vm2544_vm0, 1.0, %v11149_v39  ;;  %v6741_v48 = vsel %vm2522_vm1, 1.0, %v11149_v39  ;;  %2203 = vbcast.lane.b32.xlu1 %v10600_v2, 264  ;;  %2199 = vbcast.lane.b32.xlu0 %v10600_v2, 256  ;;  %v4262_v29 = vrot.slane %v4261_v50, 4 }
 0x33a   : > { %v4332_v17 = vsel %vm3377_vm6, %v6763_v60, 0.0  ;;  %v10620_v59 = vadd.f32 %v6741_v48, %v6740_v6 }
 0x33b   : > { %v4333_v3 = vadd.f32 %v4332_v17, %v4331_v33  ;;  %v1919_v36 = vpop.permute.xlu1 %1918  ;;  %v1915_v54 = vpop.permute.xlu0 %1914  ;;  %v10663_v33 = vadd.f32 %v4255_v13, %v4254_v5  ;;  %v4263_v61 = vadd.f32 %v4262_v29, %v4261_v50 }
 0x33c   : > { %vm2546_vm2 = vcmp.eq.s32.totalorder %v1919_v36, %v7772_v44  ;;  %vm2545_vm10 = vcmp.eq.s32.totalorder %v1915_v54, %v7772_v44 }
 0x33d   : > { %v4334_v32 = vrot.slane %v4333_v3, 4  ;;  %v6765_v4 = vsel %vm2546_vm2, 1.0, %v11149_v39  ;;  %v6764_v10 = vsel %vm2545_vm10, 1.0, %v11149_v39  ;;  %1982 = vbcast.lane.b32.xlu1 %v10510_v53, 272  ;;  %1862 = vbcast.lane.b32.xlu0 %v10470_v34, 272  ;;  %v4246_v34 = vrot.slane %v4245_v55, 2 }
 0x33e   : > { %v10641_v30 = vadd.f32 %v6765_v4, %v6764_v10  ;;  %v4257_v36 = vrot.slane %v10663_v33, 1  ;;  %v4264_v4 = vrot.slane %v4263_v61, 2 }
 0x33f   : > { %v4335_v14 = vadd.f32 %v4334_v32, %v4333_v3  ;;  %v2013_v23 = vpop.permute.xlu1 %2012  ;;  %v1998_v53 = vpop.permute.xlu0 %1997  ;;  %v10665_v35 = vadd.f32 %v4246_v34, %v4245_v55 }
 0x340   : > { %vm2565_vm8 = vcmp.eq.s32.totalorder %v2013_v23, %v7772_v44  ;;  %vm2562_vm9 = vcmp.eq.s32.totalorder %v1998_v53, %v7772_v44 }
 0x341   : > { %v4336_v52 = vrot.slane %v4335_v14, 2  ;;  %v6784_v42 = vsel %vm2565_vm8, 1.0, %v11149_v39  ;;  %v6781_v12 = vsel %vm2562_vm9, 1.0, %v11149_v39  ;;  %2094 = vbcast.lane.b32.xlu1 %v10630_v63, 256  ;;  %2087 = vbcast.lane.b32.xlu0 %v10514_v15, 272  ;;  %v10669_v15 = vpop.f32.mrf.mxu0  ;;  %v4248_v47 = vrot.slane %v10665_v35, 1 }
 0x342   : > { %v4395_v40 = vsel %vm3377_vm6, %v6784_v42, 0.0  ;;  %v4386_v26 = vsel %vm3377_vm6, %v6781_v12, 0.0 }
 0x343   : > { %v4337_v37 = vadd.f32 %v4336_v52, %v4335_v14  ;;  %v4396_v0 = vadd.f32 %v4395_v40, %v10538_v41  ;;  %v4387_v51 = vadd.f32 %v4386_v26, %v10525_v62  ;;  %v2024_v46 = vpop.permute.xlu1 %2023  ;;  %v2020_v19 = vpop.permute.xlu0 %2019  ;;  %v5868_v62 = vunpack.c.l.b16 %v4633_v24 }
 0x344   : > { %vm2567_vm11 = vcmp.eq.s32.totalorder %v2024_v46, %v7772_v44  ;;  %vm2566_vm12 = vcmp.eq.s32.totalorder %v2020_v19, %v7772_v44  ;;  %v4265_v26 = vadd.f32 %v4264_v4, %v4263_v61 }
 0x345   : > { %v4338_v6 = vrot.slane %v4337_v37, 1  ;;  %v4397_v41 = vrot.slane %v4396_v0, 4  ;;  %v4388_v60 = vrot.slane %v4387_v51, 4  ;;  %2207 = vbcast.lane.b32.xlu1 %v10600_v2, 272  ;;  %2098 = vbcast.lane.b32.xlu0 %v10630_v63, 264  ;;  %v6786_v20 = vsel %vm2567_vm11, 1.0, %v11149_v39  ;;  %v10681_v2 = vpop.f32.mrf.mxu0 }
 0x346   : > { %v6785_v48 = vsel %vm2566_vm12, 1.0, %v11149_v39  ;;  %v5990_v32 = vsel %vm5892_vm3, %v5869_v56, %v5868_v62 }
 0x347   : > { %v4339_v43 = vadd.f32 %v4338_v6, %v4337_v37  ;;  %v4398_v17 = vadd.f32 %v4397_v41, %v4396_v0  ;;  %v4389_v22 = vadd.f32 %v4388_v60, %v4387_v51  ;;  %v2133_v28 = vpop.permute.xlu1 %2132  ;;  %v2118_v3 = vpop.permute.xlu0 %2117  ;;  %v10677_v54 = vadd.f32 %v6786_v20, %v6785_v48 }
 0x348   : > { %vm2589_vm13 = vcmp.eq.s32.totalorder %v2133_v28, %v7772_v44  ;;  %vm2586_vm14 = vcmp.eq.s32.totalorder %v2118_v3, %v7772_v44  ;;  %v10692_v42 = vpop.f32.mrf.mxu0  ;;  %v10704_v60 = vadd.f32 %v4257_v36, %v10663_v33  ;;  %v4266_v48 = vrot.slane %v4265_v26, 1 }
 0x349   : > { %v4635_v5 = vpack.c.bf16 %v4339_v43, %v4339_v43  ;;  %v4399_v55 = vrot.slane %v4398_v17, 2  ;;  %v4390_v8 = vrot.slane %v4389_v22, 2  ;;  %2218 = vbcast.lane.b32.xlu1 %v2212_v57, 264  ;;  %2214 = vbcast.lane.b32.xlu0 %v2212_v57, 256  ;;  %v6808_v10 = vsel %vm2589_vm13, 1.0, %v11149_v39 }
 0x34a   : > { %v6805_v45 = vsel %vm2586_vm14, 1.0, %v11149_v39  ;;  %v4467_v53 = vsel %vm3377_vm6, %v6808_v10, 0.0 }
 0x34b   : > { %v5870_v50 = vunpack.c.l.b16 %v4635_v5  ;;  %v4400_v14 = vadd.f32 %v4399_v55, %v4398_v17  ;;  %v4391_v23 = vadd.f32 %v4390_v8, %v4389_v22  ;;  %v2144_v13 = vpop.permute.xlu1 %2143  ;;  %v2140_v34 = vpop.permute.xlu0 %2139  ;;  %v4468_v11 = vadd.f32 %v4467_v53, %v10583_v16 }
 0x34c   : > { %v4458_v52 = vsel %vm3377_vm6, %v6805_v45, 0.0  ;;  %vm2591_vm15 = vcmp.eq.s32.totalorder %v2144_v13, %v7772_v44  ;;  %vm2590_vm0 = vcmp.eq.s32.totalorder %v2140_v34, %v7772_v44  ;;  %v4267_v13 = vadd.f32 %v4266_v48, %v4265_v26 }
 0x34d   : > { %v10695_v12 = vsel %vm5894_vm4, %v5870_v50, %v5990_v32  ;;  %v4401_v24 = vrot.slane %v4400_v14, 1  ;;  %v4392_v29 = vrot.slane %v4391_v23, 1  ;;  %v4459_v40 = vadd.f32 %v4458_v52, %v10566_v38  ;;  %2222 = vbcast.lane.b32.xlu1 %v2212_v57, 272  ;;  %2102 = vbcast.lane.b32.xlu0 %v10630_v63, 272  ;;  %v10708_v63 = vpop.f32.mrf.mxu0 }
 0x34e   : > { %v4469_v16 = vrot.slane %v4468_v11, 4  ;;  %v6810_v37 = vsel %vm2591_vm15, 1.0, %v11149_v39  ;;  %v6809_v0 = vsel %vm2590_vm0, 1.0, %v11149_v39  ;;  %v4249_v57 = vadd.f32 %v4248_v47, %v10665_v35 }
 0x34f   : > { %v4402_v51 = vadd.f32 %v4401_v24, %v4400_v14  ;;  %v4393_v46 = vadd.f32 %v4392_v29, %v4391_v23  ;;  %v4460_v19 = vrot.slane %v4459_v40, 4  ;;  %v10701_v56 = vadd.f32 %v6810_v37, %v6809_v0  ;;  %v1810_v6 = vpop.permute.xlu1 %1809  ;;  %v1803_v41 = vpop.permute.xlu0 %1802 }
 0x350   : > { %v4470_v38 = vadd.f32 %v4469_v16, %v4468_v11  ;;  %vm2524_vm1 = vcmp.eq.s32.totalorder %v1810_v6, %v7772_v44  ;;  %vm2523_vm2 = vcmp.eq.s32.totalorder %v1803_v41, %v7772_v44  ;;  %v7096_v35 = vpop.f32.mrf.mxu0 }
 0x351   : > { %v4642_v62 = vpack.c.bf16 %v4402_v51, %v4402_v51  ;;  %v4641_v61 = vpack.c.bf16 %v4393_v46, %v4393_v46  ;;  %v4461_v20 = vadd.f32 %v4460_v19, %v4459_v40  ;;  %v6743_v17 = vsel %vm2524_vm1, 1.0, %v11149_v39 }
 0x352   : > { %v4471_v43 = vrot.slane %v4470_v38, 2  ;;  %v6742_v22 = vsel %vm2523_vm2, 1.0, %v11149_v39  ;;  %v7097_v16 = vpop.f32.mrf.mxu0  ;;  %v4625_v19 = vpack.c.bf16 %v4249_v57, %v4249_v57 }
 0x353   : > { %v5877_v33 = vunpack.c.l.b16 %v4642_v62  ;;  %v5876_v28 = vunpack.c.l.b16 %v4641_v61  ;;  %v4462_v3 = vrot.slane %v4461_v20, 2  ;;  %v4269_v36 = vsel %vm3377_vm6, %v6742_v22, 0.0  ;;  %v1923_v5 = vpop.permute.xlu1 %1922  ;;  %v1814_v55 = vpop.permute.xlu0 %1813 }
 0x354   : > { %v4472_v8 = vadd.f32 %v4471_v43, %v4470_v38  ;;  %v4270_v32 = vadd.f32 %v4269_v36, %v10620_v59  ;;  %vm2547_vm10 = vcmp.eq.s32.totalorder %v1923_v5, %v7772_v44  ;;  %vm2525_vm8 = vcmp.eq.s32.totalorder %v1814_v55, %v7772_v44  ;;  %v7099_v36 = vpop.f32.mrf.mxu0 }
 0x355   : > { %v10718_v47 = vsel %vm5892_vm3, %v5877_v33, %v5876_v28  ;;  %v4463_v4 = vadd.f32 %v4462_v3, %v4461_v20  ;;  %v6766_v10 = vsel %vm2547_vm10, 1.0, %v11149_v39  ;;  %v6744_v45 = vsel %vm2525_vm8, 1.0, %v11149_v39 }
 0x356   : > { %v4473_v50 = vrot.slane %v4472_v8, 1  ;;  %v4271_v14 = vrot.slane %v4270_v32, 4  ;;  %v4341_v23 = vsel %vm3377_vm6, %v6766_v10, 0.0  ;;  %v10723_v53 = vadd.f32 %v6744_v45, %v6743_v17 }
 0x357   : > { %v4626_v59 = vpack.c.bf16 %v10704_v60, %v10704_v60  ;;  %v4464_v34 = vrot.slane %v4463_v4, 1  ;;  %v4342_v11 = vadd.f32 %v4341_v23, %v10641_v30  ;;  %v1934_v52 = vpop.permute.xlu1 %1933  ;;  %v1930_v24 = vpop.permute.xlu0 %1929  ;;  %v7092_v30 = vadd.f32 %v10681_v2, %v10669_v15 }
 0x358   : > { %v4474_v29 = vadd.f32 %v4473_v50, %v4472_v8  ;;  %v4272_v40 = vadd.f32 %v4271_v14, %v4270_v32  ;;  %vm2549_vm9 = vcmp.eq.s32.totalorder %v1934_v52, %v7772_v44  ;;  %vm2548_vm11 = vcmp.eq.s32.totalorder %v1930_v24, %v7772_v44  ;;  %v10739_v15 = vpop.f32.mrf.mxu1 }
 0x359   : > { %v4465_v37 = vadd.f32 %v4464_v34, %v4463_v4  ;;  %v4343_v0 = vrot.slane %v4342_v11, 4  ;;  %v6768_v51 = vsel %vm2549_vm9, 1.0, %v11149_v39  ;;  %v6767_v46 = vsel %vm2548_vm11, 1.0, %v11149_v39  ;;  %v7100_v34 = vpop.f32.mrf.mxu0 }
 0x35a   : > { %v4650_v26 = vpack.c.bf16 %v4474_v29, %v4474_v29  ;;  %v4273_v6 = vrot.slane %v4272_v40, 2  ;;  %v10732_v41 = vadd.f32 %v6768_v51, %v6767_v46  ;;  %v4627_v60 = vpack.c.bf16 %v4267_v13, %v4267_v13  ;;  %v6125_v52 = vpop.f32.mrf.mxu1 }
 0x35b   : > { %v4649_v38 = vpack.c.bf16 %v4465_v37, %v4465_v37  ;;  %v4344_v62 = vadd.f32 %v4343_v0, %v4342_v11  ;;  %v2035_v61 = vpop.permute.xlu1 %2034  ;;  %v2028_v20 = vpop.permute.xlu0 %2027  ;;  %v7098_v48 = vadd.f32 %v7097_v16, %v7096_v35  ;;  %v5861_v28 = vunpack.c.l.b16 %v4626_v59 }
 0x35c   : > { %v5885_v43 = vunpack.c.l.b16 %v4650_v26  ;;  %v4274_v17 = vadd.f32 %v4273_v6, %v4272_v40  ;;  %vm2568_vm12 = vcmp.eq.s32.totalorder %v2028_v20, %v7772_v44  ;;  %vm2569_vm13 = vcmp.eq.s32.totalorder %v2035_v61, %v7772_v44  ;;  %v7165_v61 = vpop.f32.mrf.mxu1 }
 0x35d   : > { %v5884_v22 = vunpack.c.l.b16 %v4649_v38  ;;  %v4345_v33 = vrot.slane %v4344_v62, 2  ;;  %v6787_v57 = vsel %vm2568_vm12, 1.0, %v11149_v39  ;;  %v5860_v3 = vunpack.c.l.b16 %v4625_v19 }
 0x35e   : > { %v4275_v2 = vrot.slane %v4274_v17, 1  ;;  %v4404_v5 = vsel %vm3377_vm6, %v6787_v57, 0.0  ;;  %v5862_v55 = vunpack.c.l.b16 %v4627_v60  ;;  %v6788_v50 = vsel %vm2569_vm13, 1.0, %v11149_v39 }
 0x35f   : > { %v10743_v8 = vsel %vm5892_vm3, %v5885_v43, %v5884_v22  ;;  %v4346_v32 = vadd.f32 %v4345_v33, %v4344_v62  ;;  %v4405_v35 = vadd.f32 %v4404_v5, %v10677_v54  ;;  %v2148_v4 = vpop.permute.xlu1 %2147  ;;  %v2039_v10 = vpop.permute.xlu0 %2038  ;;  %v5590_v11 = vadd.f32 %v7092_v30, %v10486_v25 }
 0x360   : > { %v4276_v45 = vadd.f32 %v4275_v2, %v4274_v17  ;;  %vm2592_vm14 = vcmp.eq.s32.totalorder %v2148_v4, %v7772_v44  ;;  %vm2570_vm15 = vcmp.eq.s32.totalorder %v2039_v10, %v7772_v44  ;;  %v5983_v40 = vsel %vm5892_vm3, %v5861_v28, %v5860_v3  ;;  %v6128_v4 = vpop.f32.mrf.mxu1 }
 0x361   : > { %v4347_v14 = vrot.slane %v4346_v32, 1  ;;  %v4406_v23 = vrot.slane %v4405_v35, 4  ;;  %v6811_v59 = vsel %vm2592_vm14, 1.0, %v11149_v39  ;;  %v6789_v13 = vsel %vm2570_vm15, 1.0, %v11149_v39 }
 0x362   : > { %v4628_v54 = vpack.c.bf16 %v4276_v45, %v4276_v45  ;;  %v4476_v24 = vsel %vm3377_vm6, %v6811_v59, 0.0  ;;  %v10753_v29 = vadd.f32 %v6789_v13, %v6788_v50  ;;  %v5984_v19 = vsel %vm5894_vm4, %v5862_v55, %v5983_v40 }
 0x363   : > { %v4348_v16 = vadd.f32 %v4347_v14, %v4346_v32  ;;  %v4407_v37 = vadd.f32 %v4406_v23, %v4405_v35  ;;  %v4477_v0 = vadd.f32 %v4476_v24, %v10701_v56  ;;  %v2159_v51 = vpop.permute.xlu1 %2158  ;;  %v2155_v46 = vpop.permute.xlu0 %2154  ;;  %v7095_v38 = vadd.f32 %v10708_v63, %v10692_v42 }
 0x364   : > { %v5863_v26 = vunpack.c.l.b16 %v4628_v54  ;;  %vm2594_vm0 = vcmp.eq.s32.totalorder %v2159_v51, %v7772_v44  ;;  %vm2593_vm1 = vcmp.eq.s32.totalorder %v2155_v46, %v7772_v44  ;;  %v7101_v62 = vadd.f32 %v7100_v34, %v7099_v36 }
 0x365   : > { %v4636_v25 = vpack.c.bf16 %v4348_v16, %v4348_v16  ;;  %v4408_v6 = vrot.slane %v4407_v37, 2  ;;  %v4478_v30 = vrot.slane %v4477_v0, 4  ;;  %v6813_v60 = vsel %vm2594_vm0, 1.0, %v11149_v39 }
 0x366   : > { %v6812_v56 = vsel %vm2593_vm1, 1.0, %v11149_v39  ;;  %v10765_v20 = vsel %vm5896_vm5, %v5863_v26, %v5984_v19  ;;  %v6175_v3 = vmax.f32 %v10647_v9, 0.0  ;;  %v5598_v2 = vadd.f32 %v7098_v48, %v10492_v49 }
 0x367   : > { %v5871_v43 = vunpack.c.l.b16 %v4636_v25  ;;  %v4409_v17 = vadd.f32 %v4408_v6, %v4407_v37  ;;  %v4479_v22 = vadd.f32 %v4478_v30, %v4477_v0  ;;  %v10767_v33 = vadd.f32 %v6813_v60, %v6812_v56  ;;  %v1825_v57 = vpop.permute.xlu1 %1824  ;;  %v1818_v28 = vpop.permute.xlu0 %1817 }
 0x368   : > { %v6126_v5 = vadd.f32 %v6125_v52, %v5590_v11  ;;  %vm2526_vm3 = vcmp.eq.s32.totalorder %v1818_v28, %v7772_v44  ;;  %v6196_v42 = vmul.f32 %v10625_v27, %v6173_v18  ;;  %v5601_v32 = vadd.f32 %v7101_v62, %v10587_v58 }
 0x369   : > { %v4410_v63 = vrot.slane %v4409_v17, 1  ;;  %v4480_v36 = vrot.slane %v4479_v22, 2  ;;  %v6745_v55 = vsel %vm2526_vm3, 1.0, %v11149_v39  ;;  %v5593_v35 = vadd.f32 %v7095_v38, %v10489_v7 }
 0x36a   : > { %v4278_v9 = vsel %vm3377_vm6, %v6745_v55, 0.0  ;;  %v10781_v49 = vsel %vm5896_vm5, %v5871_v43, %v10695_v12  ;;  %vm2527_vm2 = vcmp.eq.s32.totalorder %v1825_v57, %v7772_v44  ;;  %v6134_v50 = vadd.f32 %v10739_v15, %v5598_v2 }
 0x36b   : > { %v4411_v48 = vadd.f32 %v4410_v63, %v4409_v17  ;;  %v4481_v10 = vadd.f32 %v4480_v36, %v4479_v22  ;;  %v4279_v31 = vadd.f32 %v4278_v9, %v10723_v53  ;;  %v1938_v18 = vpop.permute.xlu1 %1937  ;;  %v1829_v45 = vpop.permute.xlu0 %1828  ;;  %v6176_v58 = vmax.f32 %v6126_v5, 0.0 }
 0x36c   : > { %vm2550_vm10 = vcmp.eq.s32.totalorder %v1938_v18, %v7772_v44  ;;  %vm2528_vm8 = vcmp.eq.s32.totalorder %v1829_v45, %v7772_v44  ;;  %6211 = vadd.xlane.f32.xlu0 %v10644_v1  ;;  %v6129_v59 = vadd.f32 %v6128_v4, %v5593_v35  ;;  %v6746_v13 = vsel %vm2527_vm2, 1.0, %v11149_v39 }
 0x36d   : > { %v4643_v7 = vpack.c.bf16 %v4411_v48, %v4411_v48  ;;  %v4482_v12 = vrot.slane %v4481_v10, 1  ;;  %v4280_v14 = vrot.slane %v4279_v31, 4  ;;  %v6769_v23 = vsel %vm2550_vm10, 1.0, %v11149_v39 }
 0x36e   : > { %v4350_v53 = vsel %vm3377_vm6, %v6769_v23, 0.0  ;;  %v6747_v34 = vsel %vm2528_vm8, 1.0, %v11149_v39  ;;  %v6198_v46 = vmul.f32 %v10625_v27, %v6175_v3  ;;  %v6178_v19 = vmax.f32 %v6134_v50, 0.0 }
 0x36f   : > { %v5878_v15 = vunpack.c.l.b16 %v4643_v7  ;;  %v4483_v11 = vadd.f32 %v4482_v12, %v4481_v10  ;;  %v4281_v52 = vadd.f32 %v4280_v14, %v4279_v31  ;;  %v4351_v54 = vadd.f32 %v4350_v53, %v10732_v41  ;;  %v10794_v24 = vpop.permute.xlu1 %1948  ;;  %v10796_v1 = vpop.permute.xlu0 %1944 }
 0x370   : > { %v10798_v40 = vadd.f32 %v6747_v34, %v6746_v13  ;;  %6215 = vadd.xlane.f32.xlu0 %v10639_v21  ;;  %v6137_v41 = vadd.f32 %v7165_v61, %v5601_v32  ;;  %v6177_v26 = vmax.f32 %v6129_v59, 0.0  ;;  %v6199_v25 = vmul.f32 %v10625_v27, %v6176_v58 }
 0x371   : > { %v10803_v16 = vsel %vm5894_vm4, %v5878_v15, %v10718_v47  ;;  %v4651_v37 = vpack.c.bf16 %v4483_v11, %v4483_v11  ;;  %v4282_v0 = vrot.slane %v4281_v52, 2  ;;  %v4352_v51 = vrot.slane %v4351_v54, 4  ;;  %6213 = vadd.xlane.f32.xlu1 %v6196_v42 }
 0x372   : > { %v6179_v61 = vmax.f32 %v6137_v41, 0.0  ;;  %v6200_v43 = vmul.f32 %v10625_v27, %v6177_v26  ;;  %v6201_v22 = vmul.f32 %v10625_v27, %v6178_v19  ;;  %vm2552_vm0 = vcmp.eq.s32.totalorder %v10794_v24, %v7772_v44 }
 0x373   : > { %v5886_v6 = vunpack.c.l.b16 %v4651_v37  ;;  %v4283_v30 = vadd.f32 %v4282_v0, %v4281_v52  ;;  %v4353_v60 = vadd.f32 %v4352_v51, %v4351_v54  ;;  %v2050_v38 = vpop.permute.xlu1 %2049  ;;  %v2043_v21 = vpop.permute.xlu0 %2042  ;;  %vm2551_vm1 = vcmp.eq.s32.totalorder %v10796_v1, %v7772_v44 }
 0x374   : > { %vm2571_vm9 = vcmp.eq.s32.totalorder %v2043_v21, %v7772_v44  ;;  %6217 = vadd.xlane.f32.xlu0 %v6198_v46  ;;  %vm2572_vm11 = vcmp.eq.s32.totalorder %v2050_v38, %v7772_v44  ;;  %v6202_v35 = vmul.f32 %v10625_v27, %v6179_v61 }
 0x375   : > { %v10810_v47 = vsel %vm5894_vm4, %v5886_v6, %v10743_v8  ;;  %v4284_v62 = vrot.slane %v4283_v30, 1  ;;  %v4354_v56 = vrot.slane %v4353_v60, 2  ;;  %6219 = vadd.xlane.f32.xlu1 %v6199_v25  ;;  %v6790_v17 = vsel %vm2571_vm9, 1.0, %v11149_v39 }
 0x376   : > { %v4413_v3 = vsel %vm3377_vm6, %v6790_v17, 0.0  ;;  %v6791_v8 = vsel %vm2572_vm11, 1.0, %v11149_v39 }
 0x377   : > { %v4285_v57 = vadd.f32 %v4284_v62, %v4283_v30  ;;  %v4355_v28 = vadd.f32 %v4354_v56, %v4353_v60  ;;  %v2163_v2 = vpop.permute.xlu1 %2162  ;;  %v2054_v5 = vpop.permute.xlu0 %2053  ;;  %v4414_v42 = vadd.f32 %v4413_v3, %v10753_v29  ;;  %v6771_v30 = vsel %vm2552_vm0, 1.0, %v11149_v39 }
 0x378   : > { %vm2595_vm4 = vcmp.eq.s32.totalorder %v2163_v2, %v7772_v44  ;;  %vm2573_vm12 = vcmp.eq.s32.totalorder %v2054_v5, %v7772_v44  ;;  %6221 = vadd.xlane.f32.xlu0 %v6200_v43 }
 0x379   : > { %v4629_v63 = vpack.c.bf16 %v4285_v57, %v4285_v57  ;;  %v4356_v36 = vrot.slane %v4355_v28, 1  ;;  %v6814_v55 = vsel %vm2595_vm4, 1.0, %v11149_v39  ;;  %v6792_v32 = vsel %vm2573_vm12, 1.0, %v11149_v39  ;;  %6223 = vadd.xlane.f32.xlu1 %v6201_v22 }
 0x37a   : > { %v4415_v4 = vrot.slane %v4414_v42, 4  ;;  %v4485_v9 = vsel %vm3377_vm6, %v6814_v55, 0.0  ;;  %v10825_v48 = vadd.f32 %v6792_v32, %v6791_v8  ;;  %vm11226_vm4 = vcmask 1045509  }
 0x37b   : > { %v5864_v29 = vunpack.c.l.b16 %v4629_v63  ;;  %v4357_v10 = vadd.f32 %v4356_v36, %v4355_v28  ;;  %v4486_v31 = vadd.f32 %v4485_v9, %v10767_v33  ;;  %v2174_v18 = vpop.permute.xlu1 %2173  ;;  %v2170_v45 = vpop.permute.xlu0 %2169 }
 0x37c   : > { %v4416_v50 = vadd.f32 %v4415_v4, %v4414_v42  ;;  %vm2597_vm13 = vcmp.eq.s32.totalorder %v2174_v18, %v7772_v44  ;;  %vm2596_vm14 = vcmp.eq.s32.totalorder %v2170_v45, %v7772_v44  ;;  %6225 = vadd.xlane.f32.xlu0 %v6202_v35 }
 0x37d   : > { %v4637_v58 = vpack.c.bf16 %v4357_v10, %v4357_v10  ;;  %v4487_v7 = vrot.slane %v4486_v31, 4  ;;  %v6816_v27 = vsel %vm2597_vm13, 1.0, %v11149_v39  ;;  %v6815_v12 = vsel %vm2596_vm14, 1.0, %v11149_v39 }
 0x37e   : > { %v4417_v14 = vrot.slane %v4416_v50, 2  ;;  %v4493_v23 = vadd.f32 %v6816_v27, %v6815_v12  ;;  %v10834_v59 = vsel %vm5898_vm7, %v5864_v29, %v10765_v20 }
 0x37f   : > { %v5872_v33 = vunpack.c.l.b16 %v4637_v58  ;;  %v4488_v13 = vadd.f32 %v4487_v7, %v4486_v31  ;;  %v10836_v53 = vpop.permute.xlu1 %1839  ;;  %v1833_v34 = vpop.permute.xlu0 %1832 }
 0x380   : > { %v4418_v15 = vadd.f32 %v4417_v14, %v4416_v50  ;;  %vm2529_vm15 = vcmp.eq.s32.totalorder %v1833_v34, %v7772_v44 }
 0x381   : > { %v4489_v11 = vrot.slane %v4488_v13, 2  ;;  %v6748_v52 = vsel %vm2529_vm15, 1.0, %v11149_v39  ;;  %v10842_v54 = vsel %vm5898_vm7, %v5872_v33, %v10781_v49 }
 0x382   : > { %v4419_v37 = vrot.slane %v4418_v15, 1  ;;  %v4287_v0 = vsel %vm3377_vm6, %v6748_v52, 0.0 }
 0x383   : > { %v4490_v20 = vadd.f32 %v4489_v11, %v4488_v13  ;;  %v4288_v51 = vadd.f32 %v4287_v0, %v10798_v40  ;;  %v1953_v46 = vpop.permute.xlu1 %1952  ;;  %v1844_v19 = vpop.permute.xlu0 %1843  ;;  %v6770_v40 = vsel %vm2551_vm1, 1.0, %v11149_v39 }
 0x384   : > { %v4420_v41 = vadd.f32 %v4419_v37, %v4418_v15  ;;  %vm2553_vm3 = vcmp.eq.s32.totalorder %v1953_v46, %v7772_v44  ;;  %v4358_v43 = vadd.f32 %v6771_v30, %v6770_v40  ;;  %vm2531_vm8 = vcmp.eq.s32.totalorder %v1844_v19, %v7772_v44 }
 0x385   : > { %v4491_v26 = vrot.slane %v4490_v20, 1  ;;  %v4289_v49 = vrot.slane %v4288_v51, 4  ;;  %v6772_v6 = vsel %vm2553_vm3, 1.0, %v11149_v39  ;;  %v6750_v58 = vsel %vm2531_vm8, 1.0, %v11149_v39 }
 0x386   : > { %v4644_v25 = vpack.c.bf16 %v4420_v41, %v4420_v41  ;;  %v4359_v1 = vsel %vm3377_vm6, %v6772_v6, 0.0 }
 0x387   : > { %v4492_v60 = vadd.f32 %v4491_v26, %v4490_v20  ;;  %v4290_v38 = vadd.f32 %v4289_v49, %v4288_v51  ;;  %v1964_v21 = vpop.permute.xlu1 %1963  ;;  %v1960_v62 = vpop.permute.xlu0 %1959  ;;  %v4360_v2 = vadd.f32 %v4359_v1, %v4358_v43 }
 0x388   : > { %v5879_v24 = vunpack.c.l.b16 %v4644_v25  ;;  %vm2555_vm9 = vcmp.eq.s32.totalorder %v1964_v21, %v7772_v44  ;;  %vm2554_vm11 = vcmp.eq.s32.totalorder %v1960_v62, %v7772_v44 }
 0x389   : > { %v4652_v56 = vpack.c.bf16 %v4492_v60, %v4492_v60  ;;  %v4291_v61 = vrot.slane %v4290_v38, 2  ;;  %v4361_v35 = vrot.slane %v4360_v2, 4  ;;  %v6774_v11 = vsel %vm2555_vm9, 1.0, %v11149_v39 }
 0x38a   : > { %v10857_v17 = vsel %vm5896_vm5, %v5879_v24, %v10803_v16  ;;  %v6773_v52 = vsel %vm2554_vm11, 1.0, %v11149_v39 }
 0x38b   : > { %v5887_v22 = vunpack.c.l.b16 %v4652_v56  ;;  %v4292_v57 = vadd.f32 %v4291_v61, %v4290_v38  ;;  %v10859_v28 = vpop.permute.xlu1 %2064  ;;  %v2058_v3 = vpop.permute.xlu0 %2057  ;;  %v4367_v25 = vadd.f32 %v6774_v11, %v6773_v52 }
 0x38c   : > { %vm2574_vm2 = vcmp.eq.s32.totalorder %v2058_v3, %v7772_v44  ;;  %vm2575_vm15 = vcmp.eq.s32.totalorder %v10859_v28, %v7772_v44 }
 0x38d   : > { %v4293_v5 = vrot.slane %v4292_v57, 1  ;;  %v6793_v8 = vsel %vm2574_vm2, 1.0, %v11149_v39  ;;  %v10866_v63 = vsel %vm5896_vm5, %v5887_v22, %v10810_v47  ;;  %vm2530_vm5 = vcmp.eq.s32.totalorder %v10836_v53, %v7772_v44 }
 0x38e   : > { %v4422_v42 = vsel %vm3377_vm6, %v6793_v8, 0.0  ;;  %v6749_v14 = vsel %vm2530_vm5, 1.0, %v11149_v39 }
 0x38f   : > { %v4294_v36 = vadd.f32 %v4293_v5, %v4292_v57  ;;  %v4423_v16 = vadd.f32 %v4422_v42, %v10825_v48  ;;  %v2178_v55 = vpop.permute.xlu1 %2177  ;;  %v2069_v32 = vpop.permute.xlu0 %2068  ;;  %v4362_v48 = vadd.f32 %v4361_v35, %v4360_v2  ;;  %v4295_v15 = vadd.f32 %v6750_v58, %v6749_v14 }
 0x390   : > { %vm2598_vm10 = vcmp.eq.s32.totalorder %v2178_v55, %v7772_v44  ;;  %vm2576_vm14 = vcmp.eq.s32.totalorder %v2069_v32, %v7772_v44  ;;  %v6794_v55 = vsel %vm2575_vm15, 1.0, %v11149_v39 }
 0x391   : > { %v4630_v4 = vpack.c.bf16 %v4294_v36, %v4294_v36  ;;  %v4424_v9 = vrot.slane %v4423_v16, 4  ;;  %v6817_v29 = vsel %vm2598_vm10, 1.0, %v11149_v39  ;;  %v4363_v34 = vrot.slane %v4362_v48, 2 }
 0x392   : > { %v4494_v10 = vsel %vm3377_vm6, %v6817_v29, 0.0  ;;  %v6795_v3 = vsel %vm2576_vm14, 1.0, %v11149_v39 }
 0x393   : > { %v5865_v31 = vunpack.c.l.b16 %v4630_v4  ;;  %v4425_v18 = vadd.f32 %v4424_v9, %v4423_v16  ;;  %v4495_v47 = vadd.f32 %v4494_v10, %v4493_v23  ;;  %v10873_v45 = vpop.permute.xlu1 %2188  ;;  %v10875_v50 = vpop.permute.xlu0 %2184  ;;  %v4364_v49 = vadd.f32 %v4363_v34, %v4362_v48 }
 0x394   : > { %v4430_v28 = vadd.f32 %v6795_v3, %v6794_v55  ;;  %vm2600_vm1 = vcmp.eq.s32.totalorder %v10873_v45, %v7772_v44  ;;  %vm2599_vm3 = vcmp.eq.s32.totalorder %v10875_v50, %v7772_v44 }
 0x395   : > { %v4426_v7 = vrot.slane %v4425_v18, 2  ;;  %v4496_v27 = vrot.slane %v4495_v47, 4  ;;  %v10884_v12 = vsel %vm11226_vm4, %v5865_v31, %v10834_v59  ;;  %v4365_v43 = vrot.slane %v4364_v49, 1 }
 0x396   : > { %v6819_v48 = vsel %vm2600_vm1, 1.0, %v11149_v39  ;;  %v6818_v45 = vsel %vm2599_vm3, 1.0, %v11149_v39 }
 0x397   : > { %v4427_v23 = vadd.f32 %v4426_v7, %v4425_v18  ;;  %v4497_v33 = vadd.f32 %v4496_v27, %v4495_v47  ;;  %v10887_v13 = vpop.permute.xlu1 %1854  ;;  %v1848_v53 = vpop.permute.xlu0 %1847  ;;  %v4366_v32 = vadd.f32 %v4365_v43, %v4364_v49 }
 0x398   : > { %vm2532_vm12 = vcmp.eq.s32.totalorder %v1848_v53, %v7772_v44 }
 0x399   : > { %v4428_v37 = vrot.slane %v4427_v23, 1  ;;  %v4498_v0 = vrot.slane %v4497_v33, 2  ;;  %v6751_v59 = vsel %vm2532_vm12, 1.0, %v11149_v39  ;;  %v4638_v58 = vpack.c.bf16 %v4366_v32, %v4366_v32 }
 0x39a   : > { %v4296_v20 = vsel %vm3377_vm6, %v6751_v59, 0.0 }
 0x39b   : > { %v4429_v51 = vadd.f32 %v4428_v37, %v4427_v23  ;;  %v4499_v46 = vadd.f32 %v4498_v0, %v4497_v33  ;;  %v4297_v19 = vadd.f32 %v4296_v20, %v4295_v15  ;;  %v1968_v41 = vpop.permute.xlu1 %1967  ;;  %v1859_v26 = vpop.permute.xlu0 %1858  ;;  %v4502_v33 = vadd.f32 %v6819_v48, %v6818_v45 }
 0x39c   : > { %vm2556_vm13 = vcmp.eq.s32.totalorder %v1968_v41, %v7772_v44  ;;  %vm2534_vm10 = vcmp.eq.s32.totalorder %v1859_v26, %v7772_v44  ;;  %v5873_v0 = vunpack.c.l.b16 %v4638_v58 }
 0x39d   : > { %v4645_v6 = vpack.c.bf16 %v4429_v51, %v4429_v51  ;;  %v4500_v30 = vrot.slane %v4499_v46, 1  ;;  %v4298_v40 = vrot.slane %v4297_v19, 4  ;;  %v6775_v60 = vsel %vm2556_vm13, 1.0, %v11149_v39 }
 0x39e   : > { %v4368_v38 = vsel %vm3377_vm6, %v6775_v60, 0.0  ;;  %v6753_v34 = vsel %vm2534_vm10, 1.0, %v11149_v39 }
 0x39f   : > { %v5880_v21 = vunpack.c.l.b16 %v4645_v6  ;;  %v4501_v62 = vadd.f32 %v4500_v30, %v4499_v46  ;;  %v4299_v24 = vadd.f32 %v4298_v40, %v4297_v19  ;;  %v4369_v56 = vadd.f32 %v4368_v38, %v4367_v25  ;;  %v1979_v61 = vpop.permute.xlu1 %1978  ;;  %v1975_v1 = vpop.permute.xlu0 %1974 }
 0x3a0   : > { %vm2558_vm8 = vcmp.eq.s32.totalorder %v1979_v61, %v7772_v44  ;;  %vm2557_vm5 = vcmp.eq.s32.totalorder %v1975_v1, %v7772_v44 }
 0x3a1   : > { %v4653_v22 = vpack.c.bf16 %v4501_v62, %v4501_v62  ;;  %v4370_v57 = vrot.slane %v4369_v56, 4  ;;  %v10903_v2 = vsel %vm5898_vm7, %v5880_v21, %v10857_v17  ;;  %v4300_v8 = vrot.slane %v4299_v24, 2 }
 0x3a2   : > { %v6777_v11 = vsel %vm2558_vm8, 1.0, %v11149_v39 }
 0x3a3   : > { %v5888_v5 = vunpack.c.l.b16 %v4653_v22  ;;  %v4371_v42 = vadd.f32 %v4370_v57, %v4369_v56  ;;  %v10905_v36 = vpop.permute.xlu1 %2079  ;;  %v2073_v16 = vpop.permute.xlu0 %2072  ;;  %v4301_v29 = vadd.f32 %v4300_v8, %v4299_v24 }
 0x3a4   : > { %vm2577_vm0 = vcmp.eq.s32.totalorder %v2073_v16, %v7772_v44  ;;  %vm2578_vm12 = vcmp.eq.s32.totalorder %v10905_v36, %v7772_v44 }
 0x3a5   : > { %v4372_v35 = vrot.slane %v4371_v42, 2  ;;  %v6796_v4 = vsel %vm2577_vm0, 1.0, %v11149_v39  ;;  %v10917_v9 = vsel %vm5898_vm7, %v5888_v5, %v10866_v63  ;;  %vm2533_vm7 = vcmp.eq.s32.totalorder %v10887_v13, %v7772_v44 }
 0x3a6   : > { %v4431_v17 = vsel %vm3377_vm6, %v6796_v4, 0.0  ;;  %v4302_v7 = vrot.slane %v4301_v29, 1  ;;  %v6752_v15 = vsel %vm2533_vm7, 1.0, %v11149_v39  ;;  %v6776_v13 = vsel %vm2557_vm5, 1.0, %v11149_v39 }
 0x3a7   : > { %v4432_v10 = vadd.f32 %v4431_v17, %v4430_v28  ;;  %v2193_v31 = vpop.permute.xlu1 %2192  ;;  %v2084_v18 = vpop.permute.xlu0 %2083  ;;  %v4373_v47 = vadd.f32 %v4372_v35, %v4371_v42  ;;  %v4304_v20 = vadd.f32 %v6753_v34, %v6752_v15  ;;  %v4376_v41 = vadd.f32 %v6777_v11, %v6776_v13 }
 0x3a8   : > { %vm2601_vm2 = vcmp.eq.s32.totalorder %v2193_v31, %v7772_v44  ;;  %v4303_v59 = vadd.f32 %v4302_v7, %v4301_v29  ;;  %vm2579_vm9 = vcmp.eq.s32.totalorder %v2084_v18, %v7772_v44  ;;  %v6797_v1 = vsel %vm2578_vm12, 1.0, %v11149_v39  ;;  %v10963_v29 = vpop.f32.mrf.mxu0 }
 0x3a9   : > { %v6820_v50 = vsel %vm2601_vm2, 1.0, %v11149_v39  ;;  %v4433_v63 = vrot.slane %v4432_v10, 4  ;;  %v4374_v53 = vrot.slane %v4373_v47, 1  ;;  %v6798_v38 = vsel %vm2579_vm9, 1.0, %v11149_v39 }
 0x3aa   : > { %v4503_v27 = vsel %vm3377_vm6, %v6820_v50, 0.0  ;;  %v4631_v60 = vpack.c.bf16 %v4303_v59, %v4303_v59  ;;  %vm11227_vm0 = vcmask 1045509   ;;  %v4439_v8 = vadd.f32 %v6798_v38, %v6797_v1 }
 0x3ab   : > { %v2204_v14 = vpop.permute.xlu1 %2203  ;;  %v2200_v23 = vpop.permute.xlu0 %2199  ;;  %v4434_v52 = vadd.f32 %v4433_v63, %v4432_v10  ;;  %v4504_v37 = vadd.f32 %v4503_v27, %v4502_v33  ;;  %v4375_v19 = vadd.f32 %v4374_v53, %v4373_v47  ;;  %v10952_v57 = vsel %vm11227_vm0, %v5873_v0, %v10842_v54  ;;  %vm11232_vm12 = vmmov %vm11227_vm0 }
 0x3ac   : > { %vm2603_vm13 = vcmp.eq.s32.totalorder %v2204_v14, %v7772_v44  ;;  %vm2602_vm14 = vcmp.eq.s32.totalorder %v2200_v23, %v7772_v44  ;;  %v5866_v4 = vunpack.c.l.b16 %v4631_v60  ;;  %v10973_v53 = vpop.f32.mrf.mxu0  ;;  %vm11228_vm9 = vcmask 1046534  }
 0x3ad   : > { %v4435_v25 = vrot.slane %v4434_v52, 2  ;;  %v4505_v6 = vrot.slane %v4504_v37, 4  ;;  %v4639_v61 = vpack.c.bf16 %v4375_v19, %v4375_v19  ;;  %v6822_v16 = vsel %vm2603_vm13, 1.0, %v11149_v39  ;;  %vm11233_vm13 = vmmov %vm11227_vm0 }
 0x3ae   : > { %v6821_v55 = vsel %vm2602_vm14, 1.0, %v11149_v39  ;;  %vm11234_vm14 = vmmov %vm11228_vm9 }
 0x3af   : > { %v1983_v51 = vpop.permute.xlu1 %1982  ;;  %v1863_v46 = vpop.permute.xlu0 %1862  ;;  %v10954_v3 = vadd.f32 %v4435_v25, %v4434_v52  ;;  %v4506_v5 = vadd.f32 %v4505_v6, %v4504_v37  ;;  %v10959_v17 = vunpack.c.l.b16 %v4639_v61  ;;  %v4511_v45 = vadd.f32 %v6822_v16, %v6821_v55 }
 0x3b0   : > { %vm2559_vm11 = vcmp.eq.s32.totalorder %v1983_v51, %v7772_v44  ;;  %vm2535_vm4 = vcmp.eq.s32.totalorder %v1863_v46, %v7772_v44  ;;  %v10980_v6 = vpop.f32.mrf.mxu0 }
 0x3b1   : > { %v6778_v26 = vsel %vm2559_vm11, 1.0, %v11149_v39  ;;  %v6754_v49 = vsel %vm2535_vm4, 1.0, %v11149_v39  ;;  %v4437_v47 = vrot.slane %v10954_v3, 1  ;;  %v4507_v48 = vrot.slane %v4506_v5, 2  ;;  %vm11229_vm11 = vmmov %vm11228_vm9 }
 0x3b2   : > { %v4377_v30 = vsel %vm3377_vm6, %v6778_v26, 0.0  ;;  %v4305_v40 = vsel %vm3377_vm6, %v6754_v49, 0.0  ;;  %v7106_v16 = vpop.f32.mrf.mxu0 }
 0x3b3   : > { %v4378_v21 = vadd.f32 %v4377_v30, %v4376_v41  ;;  %v4306_v62 = vadd.f32 %v4305_v40, %v4304_v20  ;;  %v2095_v24 = vpop.permute.xlu1 %2094  ;;  %v2088_v56 = vpop.permute.xlu0 %2087  ;;  %v4508_v52 = vadd.f32 %v4507_v48, %v4506_v5 }
 0x3b4   : > { %vm2580_vm15 = vcmp.eq.s32.totalorder %v2088_v56, %v7772_v44  ;;  %vm2581_vm2 = vcmp.eq.s32.totalorder %v2095_v24, %v7772_v44 }
 0x3b5   : > { %v4379_v43 = vrot.slane %v4378_v21, 4  ;;  %v4307_v22 = vrot.slane %v4306_v62, 4  ;;  %v6799_v42 = vsel %vm2580_vm15, 1.0, %v11149_v39  ;;  %v6800_v37 = vsel %vm2581_vm2, 1.0, %v11149_v39  ;;  %vm11235_vm15 = vmmov %vm11228_vm9 }
 0x3b6   : > { %v4440_v54 = vsel %vm3377_vm6, %v6799_v42, 0.0  ;;  %v4509_v61 = vrot.slane %v4508_v52, 1  ;;  %v5988_v42 = vsel %vm11228_vm9, %v5866_v4, %v10884_v12  ;;  %v7108_v4 = vpop.f32.mrf.mxu0 }
 0x3b7   : > { %v4380_v32 = vadd.f32 %v4379_v43, %v4378_v21  ;;  %v4308_v28 = vadd.f32 %v4307_v22, %v4306_v62  ;;  %v2208_v36 = vpop.permute.xlu1 %2207  ;;  %v2099_v35 = vpop.permute.xlu0 %2098  ;;  %v4441_v18 = vadd.f32 %v4440_v54, %v4439_v8 }
 0x3b8   : > { %vm2604_vm1 = vcmp.eq.s32.totalorder %v2208_v36, %v7772_v44  ;;  %vm2582_vm3 = vcmp.eq.s32.totalorder %v2099_v35, %v7772_v44  ;;  %v4438_v36 = vadd.f32 %v4437_v47, %v10954_v3 }
 0x3b9   : > { %v4381_v10 = vrot.slane %v4380_v32, 2  ;;  %v4309_v31 = vrot.slane %v4308_v28, 2  ;;  %v6823_v50 = vsel %vm2604_vm1, 1.0, %v11149_v39  ;;  %v4442_v7 = vrot.slane %v4441_v18, 4 }
 0x3ba   : > { %v4512_v23 = vsel %vm3377_vm6, %v6823_v50, 0.0  ;;  %v6801_v33 = vsel %vm2582_vm3, 1.0, %v11149_v39  ;;  %vm6323_vm3 = vcmask 7168  }
 0x3bb   : > { %v4382_v58 = vadd.f32 %v4381_v10, %v4380_v32  ;;  %v4310_v63 = vadd.f32 %v4309_v31, %v4308_v28  ;;  %v2219_v27 = vpop.permute.xlu1 %2218  ;;  %v2215_v14 = vpop.permute.xlu0 %2214  ;;  %v4443_v11 = vadd.f32 %v4442_v7, %v4441_v18  ;;  %v4513_v13 = vadd.f32 %v4512_v23, %v4511_v45 }
 0x3bc   : > { %vm2606_vm10 = vcmp.eq.s32.totalorder %v2219_v27, %v7772_v44  ;;  %vm2605_vm7 = vcmp.eq.s32.totalorder %v2215_v14, %v7772_v44  ;;  %v4448_v49 = vadd.f32 %v6801_v33, %v6800_v37  ;;  %v5995_v28 = vsel %vm11229_vm11, %v10959_v17, %v10952_v57  ;;  %v7109_v14 = vpop.f32.mrf.mxu0 }
 0x3bd   : > { %v4383_v34 = vrot.slane %v4382_v58, 1  ;;  %v4311_v15 = vrot.slane %v4310_v63, 1  ;;  %v6825_v0 = vsel %vm2606_vm10, 1.0, %v11149_v39  ;;  %v6824_v59 = vsel %vm2605_vm7, 1.0, %v11149_v39 }
 0x3be   : > { %v4444_v46 = vrot.slane %v4443_v11, 2  ;;  %v4514_v19 = vrot.slane %v4513_v13, 4  ;;  %v4520_v25 = vadd.f32 %v6825_v0, %v6824_v59  ;;  %v4510_v10 = vadd.f32 %v4509_v61, %v4508_v52  ;;  %v7111_v0 = vpop.f32.mrf.mxu0 }
 0x3bf   : > { %v4384_v20 = vadd.f32 %v4383_v34, %v4382_v58  ;;  %v4312_v51 = vadd.f32 %v4311_v15, %v4310_v63  ;;  %v2223_v41 = vpop.permute.xlu1 %2222  ;;  %v2103_v26 = vpop.permute.xlu0 %2102  ;;  %v4646_v7 = vpack.c.bf16 %v4438_v36, %v4438_v36 }
 0x3c0   : > { %vm2607_vm8 = vcmp.eq.s32.totalorder %v2223_v41, %v7772_v44  ;;  %vm2583_vm5 = vcmp.eq.s32.totalorder %v2103_v26, %v7772_v44  ;;  %v4445_v30 = vadd.f32 %v4444_v46, %v4443_v11  ;;  %v4515_v40 = vadd.f32 %v4514_v19, %v4513_v13 }
 0x3c1   : > { %v6826_v60 = vsel %vm2607_vm8, 1.0, %v11149_v39  ;;  %v6802_v38 = vsel %vm2583_vm5, 1.0, %v11149_v39  ;;  %v4632_v24 = vpack.c.bf16 %v4312_v51, %v4312_v51  ;;  %v4640_v56 = vpack.c.bf16 %v4384_v20, %v4384_v20 }
 0x3c2   : > { %v4521_v21 = vsel %vm3377_vm6, %v6826_v60, 0.0  ;;  %v4449_v62 = vsel %vm3377_vm6, %v6802_v38, 0.0  ;;  %v4516_v1 = vrot.slane %v4515_v40, 2  ;;  %v4446_v5 = vrot.slane %v4445_v30, 1 }
 0x3c3   : > { %v4522_v43 = vadd.f32 %v4521_v21, %v4520_v25  ;;  %v4450_v22 = vadd.f32 %v4449_v62, %v4448_v49  ;;  %v5867_v44 = vunpack.c.l.b16 %v4632_v24  ;;  %v5875_v8 = vunpack.c.l.b16 %v4640_v56  ;;  %v7112_v25 = vpop.f32.mrf.mxu0  ;;  %v11238_v62 = vld [vmem:[#allocation40_spill] sm:$0xff]  ;;  %v11239_v56 = vld [vmem:[#allocation38_spill] sm:$0xff] }
 0x3c4   : > { %v4517_v55 = vadd.f32 %v4516_v1, %v4515_v40  ;;  %vm11230_vm6 = vcmask 1047559   ;;  %v4447_v45 = vadd.f32 %v4446_v5, %v4445_v30  ;;  %v4654_v27 = vpack.c.bf16 %v4510_v10, %v4510_v10 }
 0x3c5   : > { %v4523_v32 = vrot.slane %v4522_v43, 4  ;;  %v4451_v39 = vrot.slane %v4450_v22, 4  ;;  %v5989_v35 = vsel %vm11230_vm6, %v5867_v44, %v5988_v42  ;;  %vm11231_vm4 = vmmov %vm11230_vm6  ;;  %v5881_v34 = vunpack.c.l.b16 %v4646_v7  ;;  %v11241_v44 = vld [vmem:[#allocation39_spill] sm:$0xff] }
 0x3c6   : > { %v5996_v54 = vsel %vm11231_vm4, %v5875_v8, %v5995_v28  ;;  %v4518_v31 = vrot.slane %v4517_v55, 1  ;;  %v4647_v3 = vpack.c.bf16 %v4447_v45, %v4447_v45  ;;  %v5889_v15 = vunpack.c.l.b16 %v4654_v27  ;;  %vm11236_vm0 = vmmov %vm11231_vm4 }
 0x3c7   : > { %v4524_v18 = vadd.f32 %v4523_v32, %v4522_v43  ;;  %v4452_v48 = vadd.f32 %v4451_v39, %v4450_v22  ;;  %v6017_v12 = vpack.c.b16 %v5996_v54, %v5989_v35  ;;  %v7104_v51 = vadd.f32 %v10973_v53, %v10963_v29  ;;  %vm11237_vm1 = vmmov %vm11236_vm0  ;;  %v11240_v22 = vld [vmem:[#allocation41_spill] sm:$0xff] }
 0x3c8   : > { %v4519_v50 = vadd.f32 %v4518_v31, %v4517_v55  ;;  %v5882_v52 = vunpack.c.l.b16 %v4647_v3  ;;  %v7110_v46 = vadd.f32 %v7109_v14, %v7108_v4  ;;  %v6001_v26 = vsel %vm11232_vm12, %v5881_v34, %v10903_v2 }
 0x3c9   : > { %v4525_v58 = vrot.slane %v4524_v18, 2  ;;  %v4453_v63 = vrot.slane %v4452_v48, 2  ;;  %7170 = vmatprep.mubr.bf16.mxu1 %v6017_v12  ;;  %v6008_v49 = vsel %vm11233_vm13, %v5889_v15, %v10917_v9  ;;  %v7107_v29 = vadd.f32 %v7106_v16, %v10980_v6  ;;  %v11012_v6 = vld [vmem:[%s11082_s4] ss:$0 sm:$0xff] }
 0x3ca   : > { %v4655_v47 = vpack.c.bf16 %v4519_v50, %v4519_v50  ;;  %v6002_v30 = vsel %vm11234_vm14, %v5882_v52, %v6001_v26  ;;  %v7113_v53 = vadd.f32 %v7112_v25, %v7111_v0  ;;  %v5614_v24 = vadd.f32 %v7110_v46, %v11238_v62 }
 0x3cb   : > { %v4526_v57 = vadd.f32 %v4525_v58, %v4524_v18  ;;  %v4454_v17 = vadd.f32 %v4453_v63, %v4452_v48  ;;  %v5606_v2 = vadd.f32 %v7104_v51, %v11239_v56  ;;  %v5609_v8 = vadd.f32 %v7107_v29, %v11241_v44 }
 0x3cc   : > { %v5890_v37 = vunpack.c.l.b16 %v4655_v47  ;;  %v5617_v5 = vadd.f32 %v7113_v53, %v11240_v22 }
 0x3cd   : > { %v4527_v23 = vrot.slane %v4526_v57, 1  ;;  %v4455_v33 = vrot.slane %v4454_v17, 1 }
 0x3ce   : > { %v6009_v40 = vsel %vm11235_vm15, %v5890_v37, %v6008_v49 }
 0x3cf   : > { %v4528_v11 = vadd.f32 %v4527_v23, %v4526_v57  ;;  %v4456_v13 = vadd.f32 %v4455_v33, %v4454_v17 }
 0x3d1   : > { %v4648_v59 = vpack.c.bf16 %v4456_v13, %v4456_v13  ;;  %v4656_v20 = vpack.c.bf16 %v4528_v11, %v4528_v11 }
 0x3d3   : > { %v5883_v19 = vunpack.c.l.b16 %v4648_v59  ;;  %v5891_v41 = vunpack.c.l.b16 %v4656_v20 }
 0x3d5   : > { %v6003_v60 = vsel %vm11236_vm0, %v5883_v19, %v6002_v30  ;;  %v6010_v38 = vsel %vm11237_vm1, %v5891_v41, %v6009_v40 }
 0x3d6   : > { %v6018_v21 = vpack.c.b16 %v6010_v38, %v6003_v60 }
 0x3d8   : > { %v7168_v61 = vpop.f32.mrf.mxu1  ;;  %7171 = vmatmul.mubr.bf16.gmra.mxu1 %v6018_v21 }
 0x3d9   : > { %v6150_v1 = vadd.f32 %v7168_v61, %v5614_v24 }
 0x3da   : > { %v6141_v9 = vpop.f32.mrf.mxu1 }
 0x3db   : > { %v6142_v43 = vadd.f32 %v6141_v9, %v5606_v2  ;;  %v6182_v39 = vmax.f32 %v6150_v1, 0.0 }
 0x3dc   : > { %v7169_v42 = vpop.f32.mrf.mxu1 }
 0x3dd   : > { %v6180_v55 = vmax.f32 %v6142_v43, 0.0  ;;  %v6153_v28 = vadd.f32 %v7169_v42, %v5617_v5  ;;  %v6205_v54 = vmul.f32 %v11012_v6, %v6182_v39 }
 0x3de   : > { %v6144_v32 = vpop.f32.mrf.mxu1 }
 0x3df   : > { %v6203_v16 = vmul.f32 %v11012_v6, %v6180_v55  ;;  %v6145_v36 = vadd.f32 %v6144_v32, %v5609_v8  ;;  %v6183_v10 = vmax.f32 %v6153_v28, 0.0 }
 0x3e1   : > { %v6181_v35 = vmax.f32 %v6145_v36, 0.0  ;;  %6227 = vadd.xlane.f32.xlu1 %v6203_v16  ;;  %v6206_v18 = vmul.f32 %v11012_v6, %v6183_v10  ;;  %v7114_v10 = vpop.f32.mrf.mxu0 }
 0x3e3   : > { %v6204_v31 = vmul.f32 %v11012_v6, %v6181_v35 }
 0x3e5   : > { %6231 = vadd.xlane.f32.xlu1 %v6205_v54  ;;  %6229 = vadd.xlane.f32.xlu0 %v6204_v31 }
 0x3e9   : > { %6233 = vadd.xlane.f32.xlu0 %v6206_v18 }
 0x3f5   : > { %v6212_v48 = vpop.xlane.xlu0 %6211 }
 0x3f6   : > { %v6243_v45 = vsub.f32 0.0, %v6212_v48  ;;  %v7115_v48 = vpop.f32.mrf.mxu0 }
 0x3f8   : > { %v6259_v12 = vmul.f32 1.442695, %v6243_v45 }
 0x3f9   : > { %v6216_v4 = vpop.xlane.xlu0 %6215 }
 0x3fa   : > { %7360 = vpow2.f32 %v6259_v12  ;;  %v6245_v50 = vsub.f32 0.0, %v6216_v4  ;;  %v6214_v58 = vpop.xlane.xlu1 %6213 }
 0x3fb   : > { %v6244_v63 = vsub.f32 0.0, %v6214_v58 }
 0x3fc   : > { %v6263_v7 = vmul.f32 1.442695, %v6245_v50  ;;  %v7117_v50 = vpop.f32.mrf.mxu0 }
 0x3fd   : > { %v6261_v27 = vmul.f32 1.442695, %v6244_v63  ;;  %v6218_v57 = vpop.xlane.xlu0 %6217 }
 0x3fe   : > { %7362 = vpow2.f32 %v6263_v7  ;;  %v6246_v17 = vsub.f32 0.0, %v6218_v57  ;;  %v6220_v3 = vpop.xlane.xlu1 %6219 }
 0x3ff   : > { %7364 = vpow2.f32 %v6261_v27  ;;  %v6247_v47 = vsub.f32 0.0, %v6220_v3  ;;  %v7118_v27 = vpop.f32.mrf.mxu0 }
 0x400   : > { %v6265_v14 = vmul.f32 1.442695, %v6246_v17 }
 0x401   : > { %v6267_v23 = vmul.f32 1.442695, %v6247_v47  ;;  %v6222_v33 = vpop.xlane.xlu0 %6221  ;;  %v7120_v57 = vpop.f32.mrf.mxu0 }
 0x402   : > { %7366 = vpow2.f32 %v6265_v14  ;;  %v6248_v34 = vsub.f32 0.0, %v6222_v33  ;;  %v6224_v15 = vpop.xlane.xlu1 %6223 }
 0x403   : > { %7368 = vpow2.f32 %v6267_v23  ;;  %v6249_v11 = vsub.f32 0.0, %v6224_v15  ;;  %v7121_v3 = vpop.f32.mrf.mxu0 }
 0x404   : > { %v6269_v13 = vmul.f32 1.442695, %v6248_v34  ;;  %v7116_v34 = vadd.f32 %v7115_v48, %v7114_v10  ;;  %v7122_v15 = vadd.f32 %v7121_v3, %v7120_v57 }
 0x405   : > { %v6271_v52 = vmul.f32 1.442695, %v6249_v11  ;;  %v6226_v37 = vpop.xlane.xlu0 %6225  ;;  %v7123_v23 = vpop.f32.mrf.mxu0 }
 0x406   : > { %7370 = vpow2.f32 %v6269_v13  ;;  %v6250_v0 = vsub.f32 0.0, %v6226_v37 }
 0x407   : > { %v7361_v59 = vpop.eup %7360  ;;  %7372 = vpow2.f32 %v6271_v52  ;;  %v7124_v11 = vpop.f32.mrf.mxu0  ;;  %v7119_v52 = vadd.f32 %v7118_v27, %v7117_v50 }
 0x408   : > { %v6291_v20 = vadd.f32 1.0, %v7361_v59  ;;  %v6273_v51 = vmul.f32 1.442695, %v6250_v0  ;;  %v7125_v37 = vadd.f32 %v7124_v11, %v7123_v23  ;;  %v11242_v0 = vld [vmem:[#allocation44_spill] sm:$0xff] }
 0x409   : > { %v5630_v59 = vadd.f32 %v7122_v15, %v11242_v0 }
 0x40a   : > { %7374 = vrcp.f32 %v6291_v20  ;;  %v11243_v20 = vld [vmem:[#allocation42_spill] sm:$0xff] }
 0x40b   : > { %v7363_v46 = vpop.eup %7362  ;;  %7376 = vpow2.f32 %v6273_v51  ;;  %v5622_v51 = vadd.f32 %v7116_v34, %v11243_v20 }
 0x40c   : > { %v7365_v19 = vpop.eup %7364  ;;  %v6293_v41 = vadd.f32 1.0, %v7363_v46 }
 0x40d   : > { %v6292_v26 = vadd.f32 1.0, %v7365_v19 }
 0x40e   : > { %7378 = vrcp.f32 %v6293_v41 }
 0x40f   : > { %v7367_v49 = vpop.eup %7366  ;;  %7380 = vrcp.f32 %v6292_v26 }
 0x410   : > { %v7369_v25 = vpop.eup %7368  ;;  %v6294_v30 = vadd.f32 1.0, %v7367_v49 }
 0x411   : > { %v6295_v40 = vadd.f32 1.0, %v7369_v25  ;;  %v11244_v25 = vld [vmem:[#allocation45_spill] sm:$0xff] }
 0x412   : > { %7382 = vrcp.f32 %v6294_v30  ;;  %v5633_v30 = vadd.f32 %v7125_v37, %v11244_v25 }
 0x413   : > { %v7371_v60 = vpop.eup %7370  ;;  %7384 = vrcp.f32 %v6295_v40  ;;  %v11245_v40 = vld [vmem:[#allocation43_spill] sm:$0xff] }
 0x414   : > { %v7373_v38 = vpop.eup %7372  ;;  %v6296_v21 = vadd.f32 1.0, %v7371_v60  ;;  %v5625_v60 = vadd.f32 %v7119_v52, %v11245_v40 }
 0x415   : > { %v6297_v29 = vadd.f32 1.0, %v7373_v38 }
 0x416   : > { %7386 = vrcp.f32 %v6296_v21 }
 0x417   : > { %v7375_v53 = vpop.eup %7374  ;;  %7388 = vrcp.f32 %v6297_v29 }
 0x418   : > { %v7377_v62 = vpop.eup %7376  ;;  %6324 = vst.msk [vmem:[%s11023_s30] sm:$0xff] %vm6323_vm3, %v7375_v53 }
 0x419   : > { %v6298_v24 = vadd.f32 1.0, %v7377_v62 }
 0x41b   : > { %v7379_v56 = vpop.eup %7378  ;;  %7390 = vrcp.f32 %v6298_v24 }
 0x41c   : > { %v7381_v2 = vpop.eup %7380  ;;  %6326 = vst.msk [vmem:[%s11023_s30 + $0x10] sm:$0xff] %vm6323_vm3, %v7379_v56 }
 0x41d   : > { %6325 = vst.msk [vmem:[%s11023_s30 + $0x8] sm:$0xff] %vm6323_vm3, %v7381_v2 }
 0x41f   : > { %v7383_v61 = vpop.eup %7382 }
 0x420   : > { %v7385_v9 = vpop.eup %7384  ;;  %6327 = vst.msk [vmem:[%s11023_s30 + $0x18] sm:$0xff] %vm6323_vm3, %v7383_v61 }
 0x421   : > { %6328 = vst.msk [vmem:[%s11023_s30 + $0x20] sm:$0xff] %vm6323_vm3, %v7385_v9 }
 0x423   : > { %v7387_v1 = vpop.eup %7386 }
 0x424   : > { %v7389_v43 = vpop.eup %7388  ;;  %6329 = vst.msk [vmem:[%s11023_s30 + $0x28] sm:$0xff] %vm6323_vm3, %v7387_v1 }
 0x425   : > { %6330 = vst.msk [vmem:[%s11023_s30 + $0x30] sm:$0xff] %vm6323_vm3, %v7389_v43 }
 0x428   : > { %v7391_v22 = vpop.eup %7390 }
 0x429   : > { %6331 = vst.msk [vmem:[%s11023_s30 + $0x38] sm:$0xff] %vm6323_vm3, %v7391_v22 }
 0x46a   : > { %v6228_v5 = vpop.xlane.xlu1 %6227 }
 0x46b   : > { %v6251_v44 = vsub.f32 0.0, %v6228_v5 }
 0x46d   : > { %v6275_v8 = vmul.f32 1.442695, %v6251_v44 }
 0x46e   : > { %v6232_v42 = vpop.xlane.xlu1 %6231  ;;  %v6230_v55 = vpop.xlane.xlu0 %6229 }
 0x46f   : > { %7392 = vpow2.f32 %v6275_v8  ;;  %v6253_v32 = vsub.f32 0.0, %v6232_v42  ;;  %v6252_v39 = vsub.f32 0.0, %v6230_v55 }
 0x471   : > { %v6279_v16 = vmul.f32 1.442695, %v6253_v32  ;;  %v6277_v28 = vmul.f32 1.442695, %v6252_v39 }
 0x472   : > { %v6234_v36 = vpop.xlane.xlu0 %6233 }
 0x473   : > { %7394 = vpow2.f32 %v6279_v16  ;;  %v6254_v35 = vsub.f32 0.0, %v6234_v36 }
 0x474   : > { %7396 = vpow2.f32 %v6277_v28 }
 0x475   : > { %v6281_v54 = vmul.f32 1.442695, %v6254_v35 }
 0x477   : > { %7398 = vpow2.f32 %v6281_v54 }
 0x47c   : > { %v7393_v31 = vpop.eup %7392 }
 0x47d   : > { %v6299_v18 = vadd.f32 1.0, %v7393_v31 }
 0x47f   : > { %7400 = vrcp.f32 %v6299_v18 }
 0x480   : > { %v7395_v45 = vpop.eup %7394 }
 0x481   : > { %v7397_v12 = vpop.eup %7396  ;;  %v6301_v4 = vadd.f32 1.0, %v7395_v45 }
 0x482   : > { %v6300_v58 = vadd.f32 1.0, %v7397_v12 }
 0x483   : > { %7402 = vrcp.f32 %v6301_v4 }
 0x484   : > { %v7399_v63 = vpop.eup %7398  ;;  %7404 = vrcp.f32 %v6300_v58 }
 0x485   : > { %v6302_v7 = vadd.f32 1.0, %v7399_v63 }
 0x487   : > { %7406 = vrcp.f32 %v6302_v7 }
 0x48c   : > { %v7401_v17 = vpop.eup %7400 }
 0x48d   : > { %6332 = vst.msk [vmem:[%s11023_s30 + $0x40] sm:$0xff] %vm6323_vm3, %v7401_v17 }
 0x490   : > { %v7403_v47 = vpop.eup %7402 }
 0x491   : > { %v7405_v14 = vpop.eup %7404  ;;  %6334 = vst.msk [vmem:[%s11023_s30 + $0x50] sm:$0xff] %vm6323_vm3, %v7403_v47 }
 0x492   : > { %6333 = vst.msk [vmem:[%s11023_s30 + $0x48] sm:$0xff] %vm6323_vm3, %v7405_v14 }
 0x494   : > { %v7407_v33 = vpop.eup %7406 }
 0x495   : > { %6335 = vst.msk [vmem:[%s11023_s30 + $0x58] sm:$0xff] %vm6323_vm3, %v7407_v33 }
 0x498   : > { %v7172_v13 = vpop.f32.mrf.mxu1 }
 0x499   : > { %v6166_v19 = vadd.f32 %v7172_v13, %v5630_v59 }
 0x49a   : > { %v6157_v46 = vpop.f32.mrf.mxu1 }
 0x49b   : > { %v6158_v41 = vadd.f32 %v6157_v46, %v5622_v51  ;;  %v6186_v21 = vmax.f32 %v6166_v19, 0.0 }
 0x49c   : > { %v7173_v26 = vpop.f32.mrf.mxu1 }
 0x49d   : > { %v6184_v49 = vmax.f32 %v6158_v41, 0.0  ;;  %v6169_v53 = vadd.f32 %v7173_v26, %v5633_v30  ;;  %v6209_v56 = vmul.f32 %v11012_v6, %v6186_v21 }
 0x49e   : > { %v6160_v38 = vpop.f32.mrf.mxu1 }
 0x49f   : > { %v6207_v29 = vmul.f32 %v11012_v6, %v6184_v49  ;;  %v6161_v62 = vadd.f32 %v6160_v38, %v5625_v60  ;;  %v6187_v2 = vmax.f32 %v6169_v53, 0.0 }
 0x4a1   : > { %v6185_v24 = vmax.f32 %v6161_v62, 0.0  ;;  %6235 = vadd.xlane.f32.xlu1 %v6207_v29  ;;  %v6210_v9 = vmul.f32 %v11012_v6, %v6187_v2 }
 0x4a3   : > { %v6208_v61 = vmul.f32 %v11012_v6, %v6185_v24 }
 0x4a5   : > { %6237 = vadd.xlane.f32.xlu0 %v6208_v61  ;;  %6239 = vadd.xlane.f32.xlu1 %v6209_v56 }
 0x4a9   : > { %6241 = vadd.xlane.f32.xlu0 %v6210_v9 }
 0x52a   : > { %v6236_v1 = vpop.xlane.xlu1 %6235 }
 0x52b   : > { %v6255_v43 = vsub.f32 0.0, %v6236_v1 }
 0x52d   : > { %v6283_v22 = vmul.f32 1.442695, %v6255_v43 }
 0x52e   : > { %v6240_v5 = vpop.xlane.xlu1 %6239  ;;  %v6238_v44 = vpop.xlane.xlu0 %6237 }
 0x52f   : > { %7408 = vpow2.f32 %v6283_v22  ;;  %v6257_v8 = vsub.f32 0.0, %v6240_v5  ;;  %v6256_v42 = vsub.f32 0.0, %v6238_v44 }
 0x531   : > { %v6287_v55 = vmul.f32 1.442695, %v6257_v8  ;;  %v6285_v32 = vmul.f32 1.442695, %v6256_v42 }
 0x532   : > { %v6242_v39 = vpop.xlane.xlu0 %6241 }
 0x533   : > { %7410 = vpow2.f32 %v6287_v55  ;;  %v6258_v16 = vsub.f32 0.0, %v6242_v39 }
 0x534   : > { %7412 = vpow2.f32 %v6285_v32 }
 0x535   : > { %v6289_v28 = vmul.f32 1.442695, %v6258_v16 }
 0x537   : > { %7414 = vpow2.f32 %v6289_v28 }
 0x53c   : > { %v7409_v36 = vpop.eup %7408 }
 0x53d   : > { %v6303_v6 = vadd.f32 1.0, %v7409_v36 }
 0x53f   : > { %7416 = vrcp.f32 %v6303_v6 }
 0x540   : > { %v7411_v35 = vpop.eup %7410 }
 0x541   : > { %v7413_v54 = vpop.eup %7412  ;;  %v6305_v10 = vadd.f32 1.0, %v7411_v35 }
 0x542   : > { %v6304_v31 = vadd.f32 1.0, %v7413_v54 }
 0x543   : > { %7418 = vrcp.f32 %v6305_v10 }
 0x544   : > { %v7415_v18 = vpop.eup %7414  ;;  %7420 = vrcp.f32 %v6304_v31 }
 0x545   : > { %v6306_v48 = vadd.f32 1.0, %v7415_v18 }
 0x547   : > { %7422 = vrcp.f32 %v6306_v48 }
 0x54c   : > { %v7417_v45 = vpop.eup %7416 }
 0x54d   : > { %6336 = vst.msk [vmem:[%s11023_s30 + $0x60] sm:$0xff] %vm6323_vm3, %v7417_v45 }
 0x550   : > { %v7419_v12 = vpop.eup %7418 }
 0x551   : > { %v7421_v4 = vpop.eup %7420  ;;  %6338 = vst.msk [vmem:[%s11023_s30 + $0x70] sm:$0xff] %vm6323_vm3, %v7419_v12 }
 0x552   : > { %6337 = vst.msk [vmem:[%s11023_s30 + $0x68] sm:$0xff] %vm6323_vm3, %v7421_v4 }
 0x554   : > { %v7423_v50 = vpop.eup %7422 }
 0x555   : > { %6339 = vst.msk [vmem:[%s11023_s30 + $0x78] sm:$0xff] %vm6323_vm3, %v7423_v50 }
 0x556 PF: > { %p16_p11 = scmp.ge.s32.totalorder %s7609_s29, 4   ;;  %s11246_s18 = smov %s7515_s19 }
 0x557   : > { %s11247_s19 = smov %s7519_s20  ;;  %s11248_s20 = smov %s7626_s12 }
 0x558   : > { %s11249_s21 = smov %s7609_s29  ;;  %18 = sbr.rel (!%p16_p11) target bundleno = 4 (0x4), region = 87 }
 0x55d   :  { %6362 = vsyncpa [#allocation3], 1 }
 0x55e   :  { %6364 = vsyncpa [#allocation3 + $0x1], 1 }
 0x55f   :  { %6365 = vsyncpa [#allocation5], 1 }

</bundles_post_ra>
